<compile_context>
chip_gen: v6e
topology: v6e:2x2x1
jax: 0.10.0
libtpu: 0.0.40
codegen_flags: <defaults>
</compile_context>

<pallas_src>
import jax
import jax.numpy as jnp
import numpy as np
from jax.experimental import pallas as pl
from jax.experimental.pallas import tpu as pltpu


def res_module_kernel(x_ref, w1_ref, w23_ref, bn_ref, out_ref, y1_pad_ref, col_ref):
    # x_ref:    (1, H+2, W+2, Cin) f32   -- zero-padded input for the 3x3 convs
    # w1_ref:   (9*Cin, Cout) bf16       -- conv1 weights stacked along K (tap-major)
    # w23_ref:  (9*Cout + 9*Cin, Cout) bf16 -- conv2 then conv3 weights stacked along K
    # bn_ref:   (4, Cout) f32            -- rows = [a1, c1, a2, c2] folded BN scale/shift
    # out_ref:  (1, H, W, Cout) f32
    # y1_pad_ref: (H+2, W+2, Cout) f32 scratch (zero halo, interior rewritten each step)
    # col_ref:  (H*W, 9*Cout + 9*Cin) f32 scratch -- fused im2col buffer
    Hp, Wp, Cin = x_ref.shape[1], x_ref.shape[2], x_ref.shape[3]
    H, W = Hp - 2, Wp - 2
    Cout = y1_pad_ref.shape[2]
    KY = 9 * Cout                       # column offset where the x taps start
    M = H * W

    # Zero only the 1-element halo of the padding scratch (interior is fully overwritten
    # every step). Done every step -- NOT once under program_id==0 -- because the batch
    # axis is megacore-"parallel" and each core owns its own scratch instance.
    y1_pad_ref[0:1, :, :] = jnp.zeros((1, Wp, Cout), jnp.float32)
    y1_pad_ref[H + 1:H + 2, :, :] = jnp.zeros((1, Wp, Cout), jnp.float32)
    y1_pad_ref[:, 0:1, :] = jnp.zeros((Hp, 1, Cout), jnp.float32)
    y1_pad_ref[:, W + 1:W + 2, :] = jnp.zeros((Hp, 1, Cout), jnp.float32)

    x = x_ref[0]  # (Hp, Wp, Cin) f32

    # ---------- im2col of x (materialized ONCE; reused by conv1 and conv3) ----------
    for dy in range(3):
        for dx in range(3):
            t = dy * 3 + dx
            col_ref[:, KY + t * Cin:KY + (t + 1) * Cin] = (
                x[dy:dy + H, dx:dx + W, :].reshape(M, Cin))

    # ---------- conv1 as a single GEMM: (M, 9*Cin) @ (9*Cin, Cout) on the MXU ----------
    xcol = col_ref[:, KY:].astype(jnp.bfloat16)
    acc1 = jnp.dot(xcol, w1_ref[...], preferred_element_type=jnp.float32)

    # BatchNorm1 (eval running stats folded with conv1 bias) + LeakyReLU(0.01)
    y1 = acc1 * bn_ref[0:1, :] + bn_ref[1:2, :]
    y1 = jnp.where(y1 > 0, y1, 0.01 * y1)
    # TODO(synk): nn.Dropout(0.5) has no deterministic forward; identity (eval mode).

    # Stage y1 so the second conv sees padding=1 (interior write; halo stays zero).
    y1_pad_ref[1:H + 1, 1:W + 1, :] = y1.reshape(H, W, Cout)

    # ---------- im2col of y1 into the same fused column buffer ----------
    for dy in range(3):
        for dx in range(3):
            t = dy * 3 + dx
            col_ref[:, t * Cout:(t + 1) * Cout] = (
                y1_pad_ref[dy:dy + H, dx:dx + W, :].reshape(M, Cout))

    # ---------- conv2(y1) + conv3(x) fused into ONE GEMM, K = 9*Cout + 9*Cin ----------
    col2 = col_ref[...].astype(jnp.bfloat16)
    acc2 = jnp.dot(col2, w23_ref[...], preferred_element_type=jnp.float32)

    # BatchNorm2 (eval stats folded with conv2+conv3 biases) + LeakyReLU(0.1)
    out = acc2 * bn_ref[2:3, :] + bn_ref[3:4, :]
    out = jnp.where(out > 0, out, 0.1 * out)
    # NOTE: a lane-dense (H, W*Cout) output view would make the writeback unmasked, but
    # the required (M, Cout)->(H, W*Cout) minor-dim fold is a risky relayout and the
    # output is tiny at these shapes; kept as plain NHWC.
    out_ref[0] = out.reshape(H, W, Cout)


def res_module_forward(x_nchw, params):
    """x_nchw: (N, Cin, H, W) float32 -> (N, Cout, H, W) float32."""
    (w1s, w23s, bn) = params
    x = jnp.transpose(x_nchw, (0, 2, 3, 1))          # NHWC
    N, H, W, Cin = x.shape
    Cout = w1s.shape[-1]
    x_pad = jnp.pad(x, ((0, 0), (1, 1), (1, 1), (0, 0)))

    out_nhwc = pl.pallas_call(
        res_module_kernel,
        out_shape=jax.ShapeDtypeStruct((N, H, W, Cout), jnp.float32),
        grid_spec=pltpu.PrefetchScalarGridSpec(
            num_scalar_prefetch=0,
            grid=(N,),
            in_specs=[
                pl.BlockSpec((1, H + 2, W + 2, Cin), lambda n: (n, 0, 0, 0)),
                pl.BlockSpec((9 * Cin, Cout), lambda n: (0, 0)),
                pl.BlockSpec((9 * Cout + 9 * Cin, Cout), lambda n: (0, 0)),
                pl.BlockSpec((4, Cout), lambda n: (0, 0)),
            ],
            out_specs=pl.BlockSpec((1, H, W, Cout), lambda n: (n, 0, 0, 0)),
            scratch_shapes=[
                pltpu.VMEM((H + 2, W + 2, Cout), jnp.float32),
                pltpu.VMEM((H * W, 9 * Cout + 9 * Cin), jnp.float32),
            ],
        ),
        compiler_params=pltpu.CompilerParams(
            dimension_semantics=("parallel",),
            vmem_limit_bytes=32 * 1024 * 1024,
        ),
    )(x_pad, w1s, w23s, bn)

    return jnp.transpose(out_nhwc, (0, 3, 1, 2))      # back to NCHW


def make_params(key, cin, cout, eps=1e-5):
    ks = jax.random.split(key, 14)
    # PyTorch-shaped parameters (OIHW conv weights), deterministic synthetic init.
    w1_oihw = 0.2 * jax.random.normal(ks[0], (cout, cin, 3, 3), jnp.float32)
    b1 = 0.1 * jax.random.normal(ks[1], (cout,), jnp.float32)
    g1 = 1.0 + 0.1 * jax.random.normal(ks[2], (cout,), jnp.float32)
    be1 = 0.1 * jax.random.normal(ks[3], (cout,), jnp.float32)
    m1 = 0.1 * jax.random.normal(ks[4], (cout,), jnp.float32)
    v1 = jax.random.uniform(ks[5], (cout,), jnp.float32, 0.5, 1.5)

    w2_oihw = 0.2 * jax.random.normal(ks[6], (cout, cout, 3, 3), jnp.float32)
    b2 = 0.1 * jax.random.normal(ks[7], (cout,), jnp.float32)
    w3_oihw = 0.2 * jax.random.normal(ks[8], (cout, cin, 3, 3), jnp.float32)
    b3 = 0.1 * jax.random.normal(ks[9], (cout,), jnp.float32)

    g2 = 1.0 + 0.1 * jax.random.normal(ks[10], (cout,), jnp.float32)
    be2 = 0.1 * jax.random.normal(ks[11], (cout,), jnp.float32)
    m2 = 0.1 * jax.random.normal(ks[12], (cout,), jnp.float32)
    v2 = jax.random.uniform(ks[13], (cout,), jnp.float32, 0.5, 1.5)

    # OIHW -> HWIO for NHWC convs.
    w1 = jnp.transpose(w1_oihw, (2, 3, 1, 0))
    w2 = jnp.transpose(w2_oihw, (2, 3, 1, 0))
    w3 = jnp.transpose(w3_oihw, (2, 3, 1, 0))

    # Fold BN (eval) with conv biases into per-channel scale/shift.
    s1 = g1 / jnp.sqrt(v1 + eps)
    t1 = be1 - m1 * s1
    a1 = s1
    c1 = b1 * s1 + t1

    s2 = g2 / jnp.sqrt(v2 + eps)
    t2 = be2 - m2 * s2
    a2 = s2
    c2 = (b2 + b3) * s2 + t2

    # Stack for the kernel: weights tap-major along K (matches in-kernel im2col layout),
    # bf16 for the MXU; BN scale/shift as a single (4, Cout) f32 operand.
    w1s = w1.reshape(9 * cin, cout).astype(jnp.bfloat16)
    w23s = jnp.concatenate(
        [w2.reshape(9 * cout, cout), w3.reshape(9 * cin, cout)], axis=0
    ).astype(jnp.bfloat16)
    bn = jnp.stack([a1, c1, a2, c2], axis=0).astype(jnp.float32)

    kernel_params = (w1s, w23s, bn)
    raw = dict(w1=w1, w2=w2, w3=w3, b1=b1, b2=b2, b3=b3,
               s1=s1, t1=t1, s2=s2, t2=t2)
    return kernel_params, raw


def ref_forward(x_nchw, raw):
    """Pure-JAX f32 reference (same eval-mode semantics) for validation."""
    x = jnp.transpose(x_nchw, (0, 2, 3, 1))

    def conv(xx, w_hwio, b):
        y = jax.lax.conv_general_dilated(
            xx, w_hwio, window_strides=(1, 1), padding="SAME",
            dimension_numbers=("NHWC", "HWIO", "NHWC"))
        return y + b

    y1 = conv(x, raw["w1"], raw["b1"]) * raw["s1"] + raw["t1"]
    y1 = jnp.where(y1 > 0, y1, 0.01 * y1)
    out = conv(y1, raw["w2"], raw["b2"]) + conv(x, raw["w3"], raw["b3"])
    out = out * raw["s2"] + raw["t2"]
    out = jnp.where(out > 0, out, 0.1 * out)
    return jnp.transpose(out, (0, 3, 1, 2))


if __name__ == "__main__":
    key = jax.random.PRNGKey(0)
    k_x, k_p = jax.random.split(key)

    N, Cin, Cout, H, W = 2, 4, 8, 16, 16
    x = jax.random.normal(k_x, (N, Cin, H, W), jnp.float32)
    kernel_params, raw = make_params(k_p, Cin, Cout)

    out = jax.block_until_ready(res_module_forward(x, kernel_params))
    ref = jax.block_until_ready(ref_forward(x, raw))

    assert out.shape == (N, Cout, H, W), out.shape
    # bf16 MXU operands (f32 accumulate) -> tolerance loosened vs the all-f32 version.
    np.testing.assert_allclose(np.asarray(out), np.asarray(ref),
                               rtol=5e-2, atol=5e-2)
    print("KERNEL_OK")
</pallas_src>

<mosaic_0001>
module attributes {stable_mosaic.version = 11 : i64} {
  func.func @res_module_kernel(%arg0: i32, %arg1: memref<1x18x18x4xf32, #tpu.memory_space<vmem>>, %arg2: memref<36x8xbf16, #tpu.memory_space<vmem>>, %arg3: memref<108x8xbf16, #tpu.memory_space<vmem>>, %arg4: memref<4x8xf32, #tpu.memory_space<vmem>>, %arg5: memref<1x16x16x8xf32, #tpu.memory_space<vmem>>, %arg6: memref<18x18x8xf32, #tpu.memory_space<vmem>>, %arg7: memref<256x108xf32, #tpu.memory_space<vmem>>) attributes {dimension_semantics = [#tpu.dimension_semantics<parallel>], iteration_bounds = array<i64: 2>, scalar_prefetch = 0 : i64, scratch_operands = 2 : i64, tpu.core_type = #tpu.core_type<tc>, window_params = [{transform_indices = @transform_0, window_bounds = array<i64: 1, 18, 18, 4>}, {pipeline_mode = #tpu.pipeline_mode<synchronous>, transform_indices = @transform_1, window_bounds = array<i64: 36, 8>}, {pipeline_mode = #tpu.pipeline_mode<synchronous>, transform_indices = @transform_2, window_bounds = array<i64: 108, 8>}, {pipeline_mode = #tpu.pipeline_mode<synchronous>, transform_indices = @transform_3, window_bounds = array<i64: 4, 8>}, {transform_indices = @transform_4, window_bounds = array<i64: 1, 16, 16, 8>}]} {
    %cst = arith.constant 0.000000e+00 : f32
    %0 = vector.broadcast %cst : f32 to vector<1x18x8xf32>
    %c0 = arith.constant 0 : index
    %c0_0 = arith.constant 0 : index
    %c0_1 = arith.constant 0 : index
    %1 = vector.load %arg6[%c0, %c0_0, %c0_1] : memref<18x18x8xf32, #tpu.memory_space<vmem>>, vector<1x18x8xf32>
    tpu.vector_store %arg6[%c0, %c0_0, %c0_1], %0 {strides = array<i32>} : memref<18x18x8xf32, #tpu.memory_space<vmem>>, vector<1x18x8xf32>,
    %cst_2 = arith.constant 0.000000e+00 : f32
    %2 = vector.broadcast %cst_2 : f32 to vector<1x18x8xf32>
    %c17 = arith.constant 17 : index
    %c0_3 = arith.constant 0 : index
    %c0_4 = arith.constant 0 : index
    %3 = vector.load %arg6[%c17, %c0_3, %c0_4] : memref<18x18x8xf32, #tpu.memory_space<vmem>>, vector<1x18x8xf32>
    tpu.vector_store %arg6[%c17, %c0_3, %c0_4], %2 {strides = array<i32>} : memref<18x18x8xf32, #tpu.memory_space<vmem>>, vector<1x18x8xf32>,
    %cst_5 = arith.constant 0.000000e+00 : f32
    %4 = vector.broadcast %cst_5 : f32 to vector<18x1x8xf32>
    %c0_6 = arith.constant 0 : index
    %c0_7 = arith.constant 0 : index
    %c0_8 = arith.constant 0 : index
    %5 = vector.load %arg6[%c0_6, %c0_7, %c0_8] : memref<18x18x8xf32, #tpu.memory_space<vmem>>, vector<18x1x8xf32>
    tpu.vector_store %arg6[%c0_6, %c0_7, %c0_8], %4 {strides = array<i32>} : memref<18x18x8xf32, #tpu.memory_space<vmem>>, vector<18x1x8xf32>,
    %cst_9 = arith.constant 0.000000e+00 : f32
    %6 = vector.broadcast %cst_9 : f32 to vector<18x1x8xf32>
    %c0_10 = arith.constant 0 : index
    %c17_11 = arith.constant 17 : index
    %c0_12 = arith.constant 0 : index
    %7 = vector.load %arg6[%c0_10, %c17_11, %c0_12] : memref<18x18x8xf32, #tpu.memory_space<vmem>>, vector<18x1x8xf32>
    tpu.vector_store %arg6[%c0_10, %c17_11, %c0_12], %6 {strides = array<i32>} : memref<18x18x8xf32, #tpu.memory_space<vmem>>, vector<18x1x8xf32>,
    %c0_13 = arith.constant 0 : index
    %c0_14 = arith.constant 0 : index
    %c0_15 = arith.constant 0 : index
    %c0_16 = arith.constant 0 : index
    %8 = vector.load %arg1[%c0_13, %c0_14, %c0_15, %c0_16] : memref<1x18x18x4xf32, #tpu.memory_space<vmem>>, vector<1x18x18x4xf32>
    %9 = vector.shape_cast %8 : vector<1x18x18x4xf32> to vector<18x18x4xf32>
    %10 = vector.extract_strided_slice %9 {offsets = [0, 0, 0], sizes = [16, 16, 4], strides = [1, 1, 1]} : vector<18x18x4xf32> to vector<16x16x4xf32>
    %11 = vector.shape_cast %10 : vector<16x16x4xf32> to vector<256x4xf32>
    %c0_17 = arith.constant 0 : index
    %c72 = arith.constant 72 : index
    %12 = vector.load %arg7[%c0_17, %c72] : memref<256x108xf32, #tpu.memory_space<vmem>>, vector<256x4xf32>
    tpu.vector_store %arg7[%c0_17, %c72], %11 {strides = array<i32>} : memref<256x108xf32, #tpu.memory_space<vmem>>, vector<256x4xf32>,
    %13 = vector.extract_strided_slice %9 {offsets = [0, 1, 0], sizes = [16, 16, 4], strides = [1, 1, 1]} : vector<18x18x4xf32> to vector<16x16x4xf32>
    %14 = vector.shape_cast %13 : vector<16x16x4xf32> to vector<256x4xf32>
    %c0_18 = arith.constant 0 : index
    %c76 = arith.constant 76 : index
    %15 = vector.load %arg7[%c0_18, %c76] : memref<256x108xf32, #tpu.memory_space<vmem>>, vector<256x4xf32>
    tpu.vector_store %arg7[%c0_18, %c76], %14 {strides = array<i32>} : memref<256x108xf32, #tpu.memory_space<vmem>>, vector<256x4xf32>,
    %16 = vector.extract_strided_slice %9 {offsets = [0, 2, 0], sizes = [16, 16, 4], strides = [1, 1, 1]} : vector<18x18x4xf32> to vector<16x16x4xf32>
    %17 = vector.shape_cast %16 : vector<16x16x4xf32> to vector<256x4xf32>
    %c0_19 = arith.constant 0 : index
    %c80 = arith.constant 80 : index
    %18 = vector.load %arg7[%c0_19, %c80] : memref<256x108xf32, #tpu.memory_space<vmem>>, vector<256x4xf32>
    tpu.vector_store %arg7[%c0_19, %c80], %17 {strides = array<i32>} : memref<256x108xf32, #tpu.memory_space<vmem>>, vector<256x4xf32>,
    %19 = vector.extract_strided_slice %9 {offsets = [1, 0, 0], sizes = [16, 16, 4], strides = [1, 1, 1]} : vector<18x18x4xf32> to vector<16x16x4xf32>
    %20 = vector.shape_cast %19 : vector<16x16x4xf32> to vector<256x4xf32>
    %c0_20 = arith.constant 0 : index
    %c84 = arith.constant 84 : index
    %21 = vector.load %arg7[%c0_20, %c84] : memref<256x108xf32, #tpu.memory_space<vmem>>, vector<256x4xf32>
    tpu.vector_store %arg7[%c0_20, %c84], %20 {strides = array<i32>} : memref<256x108xf32, #tpu.memory_space<vmem>>, vector<256x4xf32>,
    %22 = vector.extract_strided_slice %9 {offsets = [1, 1, 0], sizes = [16, 16, 4], strides = [1, 1, 1]} : vector<18x18x4xf32> to vector<16x16x4xf32>
    %23 = vector.shape_cast %22 : vector<16x16x4xf32> to vector<256x4xf32>
    %c0_21 = arith.constant 0 : index
    %c88 = arith.constant 88 : index
    %24 = vector.load %arg7[%c0_21, %c88] : memref<256x108xf32, #tpu.memory_space<vmem>>, vector<256x4xf32>
    tpu.vector_store %arg7[%c0_21, %c88], %23 {strides = array<i32>} : memref<256x108xf32, #tpu.memory_space<vmem>>, vector<256x4xf32>,
    %25 = vector.extract_strided_slice %9 {offsets = [1, 2, 0], sizes = [16, 16, 4], strides = [1, 1, 1]} : vector<18x18x4xf32> to vector<16x16x4xf32>
    %26 = vector.shape_cast %25 : vector<16x16x4xf32> to vector<256x4xf32>
    %c0_22 = arith.constant 0 : index
    %c92 = arith.constant 92 : index
    %27 = vector.load %arg7[%c0_22, %c92] : memref<256x108xf32, #tpu.memory_space<vmem>>, vector<256x4xf32>
    tpu.vector_store %arg7[%c0_22, %c92], %26 {strides = array<i32>} : memref<256x108xf32, #tpu.memory_space<vmem>>, vector<256x4xf32>,
    %28 = vector.extract_strided_slice %9 {offsets = [2, 0, 0], sizes = [16, 16, 4], strides = [1, 1, 1]} : vector<18x18x4xf32> to vector<16x16x4xf32>
    %29 = vector.shape_cast %28 : vector<16x16x4xf32> to vector<256x4xf32>
    %c0_23 = arith.constant 0 : index
    %c96 = arith.constant 96 : index
    %30 = vector.load %arg7[%c0_23, %c96] : memref<256x108xf32, #tpu.memory_space<vmem>>, vector<256x4xf32>
    tpu.vector_store %arg7[%c0_23, %c96], %29 {strides = array<i32>} : memref<256x108xf32, #tpu.memory_space<vmem>>, vector<256x4xf32>,
    %31 = vector.extract_strided_slice %9 {offsets = [2, 1, 0], sizes = [16, 16, 4], strides = [1, 1, 1]} : vector<18x18x4xf32> to vector<16x16x4xf32>
    %32 = vector.shape_cast %31 : vector<16x16x4xf32> to vector<256x4xf32>
    %c0_24 = arith.constant 0 : index
    %c100 = arith.constant 100 : index
    %33 = vector.load %arg7[%c0_24, %c100] : memref<256x108xf32, #tpu.memory_space<vmem>>, vector<256x4xf32>
    tpu.vector_store %arg7[%c0_24, %c100], %32 {strides = array<i32>} : memref<256x108xf32, #tpu.memory_space<vmem>>, vector<256x4xf32>,
    %34 = vector.extract_strided_slice %9 {offsets = [2, 2, 0], sizes = [16, 16, 4], strides = [1, 1, 1]} : vector<18x18x4xf32> to vector<16x16x4xf32>
    %35 = vector.shape_cast %34 : vector<16x16x4xf32> to vector<256x4xf32>
    %c0_25 = arith.constant 0 : index
    %c104 = arith.constant 104 : index
    %36 = vector.load %arg7[%c0_25, %c104] : memref<256x108xf32, #tpu.memory_space<vmem>>, vector<256x4xf32>
    tpu.vector_store %arg7[%c0_25, %c104], %35 {strides = array<i32>} : memref<256x108xf32, #tpu.memory_space<vmem>>, vector<256x4xf32>,
    %c0_26 = arith.constant 0 : index
    %c72_27 = arith.constant 72 : index
    %37 = vector.load %arg7[%c0_26, %c72_27] : memref<256x108xf32, #tpu.memory_space<vmem>>, vector<256x36xf32>
    %38 = arith.truncf %37 : vector<256x36xf32> to vector<256x36xbf16>
    %c0_28 = arith.constant 0 : index
    %c0_29 = arith.constant 0 : index
    %39 = vector.load %arg2[%c0_28, %c0_29] : memref<36x8xbf16, #tpu.memory_space<vmem>>, vector<36x8xbf16>
    %cst_30 = arith.constant dense<0.000000e+00> : vector<256x8xf32>
    %40 = tpu.matmul %38, %39, %cst_30 {dimension_numbers = #tpu.dot_dimension_numbers<[1], [0], [0], [1], [0, 0, 1, 1], [], []>} : vector<256x36xbf16>, vector<36x8xbf16>, vector<256x8xf32> -> vector<256x8xf32>
    %c0_31 = arith.constant 0 : index
    %c0_32 = arith.constant 0 : index
    %41 = vector.load %arg4[%c0_31, %c0_32] : memref<4x8xf32, #tpu.memory_space<vmem>>, vector<1x8xf32>
    %42 = vector.broadcast %41 : vector<1x8xf32> to vector<256x8xf32>
    %43 = arith.mulf %40, %42 : vector<256x8xf32>
    %c1 = arith.constant 1 : index
    %c0_33 = arith.constant 0 : index
    %44 = vector.load %arg4[%c1, %c0_33] : memref<4x8xf32, #tpu.memory_space<vmem>>, vector<1x8xf32>
    %45 = vector.broadcast %44 : vector<1x8xf32> to vector<256x8xf32>
    %46 = arith.addf %43, %45 : vector<256x8xf32>
    %cst_34 = arith.constant 0.000000e+00 : f32
    %47 = vector.broadcast %cst_34 : f32 to vector<256x8xf32>
    %48 = arith.cmpf ogt, %46, %47 : vector<256x8xf32>
    %cst_35 = arith.constant 0.00999999977 : f32
    %49 = vector.broadcast %cst_35 : f32 to vector<256x8xf32>
    %50 = arith.mulf %49, %46 : vector<256x8xf32>
    %51 = arith.select %48, %46, %50 : vector<256x8xi1>, vector<256x8xf32>
    %52 = vector.shape_cast %51 : vector<256x8xf32> to vector<16x16x8xf32>
    %c1_36 = arith.constant 1 : index
    %c1_37 = arith.constant 1 : index
    %c0_38 = arith.constant 0 : index
    %53 = vector.load %arg6[%c1_36, %c1_37, %c0_38] : memref<18x18x8xf32, #tpu.memory_space<vmem>>, vector<16x16x8xf32>
    tpu.vector_store %arg6[%c1_36, %c1_37, %c0_38], %52 {strides = array<i32>} : memref<18x18x8xf32, #tpu.memory_space<vmem>>, vector<16x16x8xf32>,
    %c0_39 = arith.constant 0 : index
    %c0_40 = arith.constant 0 : index
    %c0_41 = arith.constant 0 : index
    %54 = vector.load %arg6[%c0_39, %c0_40, %c0_41] : memref<18x18x8xf32, #tpu.memory_space<vmem>>, vector<16x16x8xf32>
    %55 = vector.shape_cast %54 : vector<16x16x8xf32> to vector<256x8xf32>
    %c0_42 = arith.constant 0 : index
    %c0_43 = arith.constant 0 : index
    %56 = vector.load %arg7[%c0_42, %c0_43] : memref<256x108xf32, #tpu.memory_space<vmem>>, vector<256x8xf32>
    tpu.vector_store %arg7[%c0_42, %c0_43], %55 {strides = array<i32>} : memref<256x108xf32, #tpu.memory_space<vmem>>, vector<256x8xf32>,
    %c0_44 = arith.constant 0 : index
    %c1_45 = arith.constant 1 : index
    %c0_46 = arith.constant 0 : index
    %57 = vector.load %arg6[%c0_44, %c1_45, %c0_46] : memref<18x18x8xf32, #tpu.memory_space<vmem>>, vector<16x16x8xf32>
    %58 = vector.shape_cast %57 : vector<16x16x8xf32> to vector<256x8xf32>
    %c0_47 = arith.constant 0 : index
    %c8 = arith.constant 8 : index
    %59 = vector.load %arg7[%c0_47, %c8] : memref<256x108xf32, #tpu.memory_space<vmem>>, vector<256x8xf32>
    tpu.vector_store %arg7[%c0_47, %c8], %58 {strides = array<i32>} : memref<256x108xf32, #tpu.memory_space<vmem>>, vector<256x8xf32>,
    %c0_48 = arith.constant 0 : index
    %c2 = arith.constant 2 : index
    %c0_49 = arith.constant 0 : index
    %60 = vector.load %arg6[%c0_48, %c2, %c0_49] : memref<18x18x8xf32, #tpu.memory_space<vmem>>, vector<16x16x8xf32>
    %61 = vector.shape_cast %60 : vector<16x16x8xf32> to vector<256x8xf32>
    %c0_50 = arith.constant 0 : index
    %c16 = arith.constant 16 : index
    %62 = vector.load %arg7[%c0_50, %c16] : memref<256x108xf32, #tpu.memory_space<vmem>>, vector<256x8xf32>
    tpu.vector_store %arg7[%c0_50, %c16], %61 {strides = array<i32>} : memref<256x108xf32, #tpu.memory_space<vmem>>, vector<256x8xf32>,
    %c1_51 = arith.constant 1 : index
    %c0_52 = arith.constant 0 : index
    %c0_53 = arith.constant 0 : index
    %63 = vector.load %arg6[%c1_51, %c0_52, %c0_53] : memref<18x18x8xf32, #tpu.memory_space<vmem>>, vector<16x16x8xf32>
    %64 = vector.shape_cast %63 : vector<16x16x8xf32> to vector<256x8xf32>
    %c0_54 = arith.constant 0 : index
    %c24 = arith.constant 24 : index
    %65 = vector.load %arg7[%c0_54, %c24] : memref<256x108xf32, #tpu.memory_space<vmem>>, vector<256x8xf32>
    tpu.vector_store %arg7[%c0_54, %c24], %64 {strides = array<i32>} : memref<256x108xf32, #tpu.memory_space<vmem>>, vector<256x8xf32>,
    %c1_55 = arith.constant 1 : index
    %c1_56 = arith.constant 1 : index
    %c0_57 = arith.constant 0 : index
    %66 = vector.load %arg6[%c1_55, %c1_56, %c0_57] : memref<18x18x8xf32, #tpu.memory_space<vmem>>, vector<16x16x8xf32>
    %67 = vector.shape_cast %66 : vector<16x16x8xf32> to vector<256x8xf32>
    %c0_58 = arith.constant 0 : index
    %c32 = arith.constant 32 : index
    %68 = vector.load %arg7[%c0_58, %c32] : memref<256x108xf32, #tpu.memory_space<vmem>>, vector<256x8xf32>
    tpu.vector_store %arg7[%c0_58, %c32], %67 {strides = array<i32>} : memref<256x108xf32, #tpu.memory_space<vmem>>, vector<256x8xf32>,
    %c1_59 = arith.constant 1 : index
    %c2_60 = arith.constant 2 : index
    %c0_61 = arith.constant 0 : index
    %69 = vector.load %arg6[%c1_59, %c2_60, %c0_61] : memref<18x18x8xf32, #tpu.memory_space<vmem>>, vector<16x16x8xf32>
    %70 = vector.shape_cast %69 : vector<16x16x8xf32> to vector<256x8xf32>
    %c0_62 = arith.constant 0 : index
    %c40 = arith.constant 40 : index
    %71 = vector.load %arg7[%c0_62, %c40] : memref<256x108xf32, #tpu.memory_space<vmem>>, vector<256x8xf32>
    tpu.vector_store %arg7[%c0_62, %c40], %70 {strides = array<i32>} : memref<256x108xf32, #tpu.memory_space<vmem>>, vector<256x8xf32>,
    %c2_63 = arith.constant 2 : index
    %c0_64 = arith.constant 0 : index
    %c0_65 = arith.constant 0 : index
    %72 = vector.load %arg6[%c2_63, %c0_64, %c0_65] : memref<18x18x8xf32, #tpu.memory_space<vmem>>, vector<16x16x8xf32>
    %73 = vector.shape_cast %72 : vector<16x16x8xf32> to vector<256x8xf32>
    %c0_66 = arith.constant 0 : index
    %c48 = arith.constant 48 : index
    %74 = vector.load %arg7[%c0_66, %c48] : memref<256x108xf32, #tpu.memory_space<vmem>>, vector<256x8xf32>
    tpu.vector_store %arg7[%c0_66, %c48], %73 {strides = array<i32>} : memref<256x108xf32, #tpu.memory_space<vmem>>, vector<256x8xf32>,
    %c2_67 = arith.constant 2 : index
    %c1_68 = arith.constant 1 : index
    %c0_69 = arith.constant 0 : index
    %75 = vector.load %arg6[%c2_67, %c1_68, %c0_69] : memref<18x18x8xf32, #tpu.memory_space<vmem>>, vector<16x16x8xf32>
    %76 = vector.shape_cast %75 : vector<16x16x8xf32> to vector<256x8xf32>
    %c0_70 = arith.constant 0 : index
    %c56 = arith.constant 56 : index
    %77 = vector.load %arg7[%c0_70, %c56] : memref<256x108xf32, #tpu.memory_space<vmem>>, vector<256x8xf32>
    tpu.vector_store %arg7[%c0_70, %c56], %76 {strides = array<i32>} : memref<256x108xf32, #tpu.memory_space<vmem>>, vector<256x8xf32>,
    %c2_71 = arith.constant 2 : index
    %c2_72 = arith.constant 2 : index
    %c0_73 = arith.constant 0 : index
    %78 = vector.load %arg6[%c2_71, %c2_72, %c0_73] : memref<18x18x8xf32, #tpu.memory_space<vmem>>, vector<16x16x8xf32>
    %79 = vector.shape_cast %78 : vector<16x16x8xf32> to vector<256x8xf32>
    %c0_74 = arith.constant 0 : index
    %c64 = arith.constant 64 : index
    %80 = vector.load %arg7[%c0_74, %c64] : memref<256x108xf32, #tpu.memory_space<vmem>>, vector<256x8xf32>
    tpu.vector_store %arg7[%c0_74, %c64], %79 {strides = array<i32>} : memref<256x108xf32, #tpu.memory_space<vmem>>, vector<256x8xf32>,
    %c0_75 = arith.constant 0 : index
    %c0_76 = arith.constant 0 : index
    %81 = vector.load %arg7[%c0_75, %c0_76] : memref<256x108xf32, #tpu.memory_space<vmem>>, vector<256x108xf32>
    %82 = arith.truncf %81 : vector<256x108xf32> to vector<256x108xbf16>
    %c0_77 = arith.constant 0 : index
    %c0_78 = arith.constant 0 : index
    %83 = vector.load %arg3[%c0_77, %c0_78] : memref<108x8xbf16, #tpu.memory_space<vmem>>, vector<108x8xbf16>
    %cst_79 = arith.constant dense<0.000000e+00> : vector<256x8xf32>
    %84 = tpu.matmul %82, %83, %cst_79 {dimension_numbers = #tpu.dot_dimension_numbers<[1], [0], [0], [1], [0, 0, 1, 1], [], []>} : vector<256x108xbf16>, vector<108x8xbf16>, vector<256x8xf32> -> vector<256x8xf32>
    %c2_80 = arith.constant 2 : index
    %c0_81 = arith.constant 0 : index
    %85 = vector.load %arg4[%c2_80, %c0_81] : memref<4x8xf32, #tpu.memory_space<vmem>>, vector<1x8xf32>
    %86 = vector.broadcast %85 : vector<1x8xf32> to vector<256x8xf32>
    %87 = arith.mulf %84, %86 : vector<256x8xf32>
    %c3 = arith.constant 3 : index
    %c0_82 = arith.constant 0 : index
    %88 = vector.load %arg4[%c3, %c0_82] : memref<4x8xf32, #tpu.memory_space<vmem>>, vector<1x8xf32>
    %89 = vector.broadcast %88 : vector<1x8xf32> to vector<256x8xf32>
    %90 = arith.addf %87, %89 : vector<256x8xf32>
    %cst_83 = arith.constant 0.000000e+00 : f32
    %91 = vector.broadcast %cst_83 : f32 to vector<256x8xf32>
    %92 = arith.cmpf ogt, %90, %91 : vector<256x8xf32>
    %cst_84 = arith.constant 1.000000e-01 : f32
    %93 = vector.broadcast %cst_84 : f32 to vector<256x8xf32>
    %94 = arith.mulf %93, %90 : vector<256x8xf32>
    %95 = arith.select %92, %90, %94 : vector<256x8xi1>, vector<256x8xf32>
    %96 = vector.shape_cast %95 : vector<256x8xf32> to vector<16x16x8xf32>
    %c0_85 = arith.constant 0 : index
    %c0_86 = arith.constant 0 : index
    %c0_87 = arith.constant 0 : index
    %c0_88 = arith.constant 0 : index
    %97 = vector.load %arg5[%c0_85, %c0_86, %c0_87, %c0_88] : memref<1x16x16x8xf32, #tpu.memory_space<vmem>>, vector<1x16x16x8xf32>
    %98 = vector.shape_cast %97 : vector<1x16x16x8xf32> to vector<16x16x8xf32>
    %99 = vector.shape_cast %96 : vector<16x16x8xf32> to vector<1x16x16x8xf32>
    tpu.vector_store %arg5[%c0_85, %c0_86, %c0_87, %c0_88], %99 {strides = array<i32>} : memref<1x16x16x8xf32, #tpu.memory_space<vmem>>, vector<1x16x16x8xf32>,
    return
  }
  func.func @transform_0(%arg0: i32) -> (i32, i32, i32, i32) {
    %c0_i32 = arith.constant 0 : i32
    %c0_i32_0 = arith.constant 0 : i32
    %c0_i32_1 = arith.constant 0 : i32
    %c0_i32_2 = arith.constant 0 : i32
    return %arg0, %c0_i32, %c0_i32_0, %c0_i32_1 : i32, i32, i32, i32
  }
  func.func @transform_1(%arg0: i32) -> (i32, i32) {
    %c0_i32 = arith.constant 0 : i32
    %c0_i32_0 = arith.constant 0 : i32
    %c0_i32_1 = arith.constant 0 : i32
    return %c0_i32, %c0_i32_0 : i32, i32
  }
  func.func @transform_2(%arg0: i32) -> (i32, i32) {
    %c0_i32 = arith.constant 0 : i32
    %c0_i32_0 = arith.constant 0 : i32
    %c0_i32_1 = arith.constant 0 : i32
    return %c0_i32, %c0_i32_0 : i32, i32
  }
  func.func @transform_3(%arg0: i32) -> (i32, i32) {
    %c0_i32 = arith.constant 0 : i32
    %c0_i32_0 = arith.constant 0 : i32
    %c0_i32_1 = arith.constant 0 : i32
    return %c0_i32, %c0_i32_0 : i32, i32
  }
  func.func @transform_4(%arg0: i32) -> (i32, i32, i32, i32) {
    %c0_i32 = arith.constant 0 : i32
    %c0_i32_0 = arith.constant 0 : i32
    %c0_i32_1 = arith.constant 0 : i32
    %c0_i32_2 = arith.constant 0 : i32
    return %arg0, %c0_i32, %c0_i32_0, %c0_i32_1 : i32, i32, i32, i32
  }
}

</mosaic_0001>

<bundles_post_ra>
// kernel: tpu_custom_call.1
= control target key start
LH: loop header
LB: loop body
LE: loop exit
PB: predicated region body
PF: predicated region fallthrough
CT: control target
= control target key end

     0   :  { %s4727_s15 = smov 0   ;;  %s7272_s0 = inlined_call_operand.vmem [shape: f32[2,18,18,4], index: 0, kind: input, shape index: {}]   ;;  %s7273_s1 = inlined_call_operand.vmem [shape: bf16[36,8], index: 1, kind: input, shape index: {}]   ;;  %s7274_s2 = inlined_call_operand.vmem [shape: bf16[108,8], index: 2, kind: input, shape index: {}]   ;;  %s7275_s3 = inlined_call_operand.vmem [shape: f32[4,8], index: 3, kind: input, shape index: {}]   ;;  %s7276_s4 = inlined_call_operand.vmem [shape: f32[2,16,16,8], index: 4, kind: output, shape index: {}]  }
   0x1 LB: > { %s4411_s16 = sadd.s32 4294967295, %s4682_s15   ;;  %p4415_p0 = scmp.ge.s32.totalorder %s4682_s15, 1  ;;  %s4682_s15 = sphi %s4727_s15, %s14_s15  }
   0x2   : > { %p162_p1 = scmp.lt.s32.totalorder %s4682_s15, 3 }
   0x4   : > { %p163_p2 = pnand %p4415_p0, %p162_p1 }
   0x6   : > { %166 = sbr.rel (%p163_p2) target bundleno = 1825 (0x721), region = 36 }
   0xb   : > { %p188_p3 = scmp.lt.s32.totalorder %s4411_s16, 1  ;;  %s4684_s21 = smov 72   ;;  %vm686_vm0 = vcmask 1045504   ;;  %vm476_vm1 = vcmask 1046528   ;;  %vm427_vm2 = vcmask 622144   ;;  %vm653_vm3 = vcmask 654944  }
   0xc   : > { %s4685_s22 = smov 76   ;;  %s4686_s23 = smov 80   ;;  %vm863_vm4 = vcmask 687744   ;;  %vm994_vm5 = vcmask 720544   ;;  %vm1129_vm6 = vcmask 753344   ;;  %vm1263_vm7 = vcmask 786144  }
   0xd   : > { %s7424_s16 = smov (!%p188_p3, %s4411_s16), 1  ;;  %s4687_s24 = smov 84   ;;  %vm1394_vm8 = vcmask 818944   ;;  %vm1529_vm9 = vcmask 851744   ;;  %vm1861_vm10 = vcmask 1041408   ;;  %vm1663_vm11 = vcmask 884544  }
   0xe   : > { %s4611_s17 = smul.u32 432, %s7424_s16  ;;  %s4688_s25 = smov 88   ;;  %vm1812_vm12 = vcmask 293888   ;;  %vm199_vm13 = vcmask 64512   ;;  %vm208_vm14 = vcmask 57344   ;;  %vm202_vm15 = vcmask 58368  }
   0xf   : > { %s4689_s26 = smov 92   ;;  %s4690_s27 = smov 96  }
  0x10   : > { %s4741_s20 = scalar_lea.vmem %s7272_s0, %s4611_s17  ;;  %s4691_s28 = smov 100  }
  0x11   : > { %v4744_v0 = vld [vmem:[%s4741_s20 + $0x18] sm:$0xff]  ;;  %v4747_v1 = vld [vmem:[%s4741_s20] sm:$0xff]  ;;  %v4757_v3 = vld [vmem:[%s4741_s20 + $0x8] sm:$0xff]  ;;  %s4692_s29 = smov 104   ;;  %s4693_s10 = smov 56  }
  0x12   : > { %335 = vrot.lane.b32.xlu1 %v4744_v0, %s4684_s21  ;;  %331 = vrot.lane.b32.xlu0 %v4747_v1, %s4684_s21  ;;  %v4754_v2 = vld [vmem:[%s4741_s20 + $0x20] sm:$0xff]  ;;  %v4764_v4 = vld [vmem:[%s4741_s20 + $0x38] sm:$0xff]  ;;  %v687_v6 = vrot.slane %v4747_v1, 2  ;;  %v688_v7 = vrot.slane %v4757_v3, 2  ;;  %v477_v36 = vrot.slane %v4747_v1, 1  ;;  %v478_v37 = vrot.slane %v4757_v3, 1 }
  0x13   : > { %v4767_v5 = vld [vmem:[%s4741_s20 + $0x30] sm:$0xff]  ;;  %v4779_v9 = vld [vmem:[%s4741_s20 + $0x48] sm:$0xff]  ;;  %v4792_v12 = vld [vmem:[%s4741_s20 + $0x60] sm:$0xff]  ;;  %v483_v42 = vrot.slane %v4754_v2, 1  ;;  %v482_v46 = vrot.slane %v4744_v0, 1  ;;  %v488_v48 = vrot.slane %v4764_v4, 1 }
  0x14   : > { %v4776_v8 = vld [vmem:[%s4741_s20 + $0x50] sm:$0xff]  ;;  %v4782_v10 = vsel %vm686_vm0, %v687_v6, %v688_v7  ;;  %v4789_v11 = vld [vmem:[%s4741_s20 + $0x68] sm:$0xff]  ;;  %v4799_v13 = vld [vmem:[%s4741_s20 + $0x80] sm:$0xff]  ;;  %v479_v44 = vsel %vm476_vm1, %v477_v36, %v478_v37  ;;  %v487_v52 = vrot.slane %v4767_v5, 1  ;;  %v492_v58 = vrot.slane %v4779_v9, 1  ;;  %s4695_s11 = smov 8  }
  0x15   : > { %v4802_v14 = vld [vmem:[%s4741_s20 + $0x78] sm:$0xff]  ;;  %v247_v15 = vld [vmem:[%s4741_s20 + $0x10] sm:$0x3]  ;;  %v4826_v21 = vld [vmem:[%s4741_s20 + $0xa8] sm:$0xff]  ;;  %v4932_v50 = vsel %vm476_vm1, %v482_v46, %v483_v42  ;;  %v493_v54 = vrot.slane %v4776_v8, 1  ;;  %v498_v60 = vrot.slane %v4789_v11, 1 }
  0x16   : > { %337 = vrot.lane.b32.xlu1 %v4754_v2, %s4684_s21  ;;  %333 = vrot.lane.b32.xlu0 %v4757_v3, %s4684_s21  ;;  %v690_v16 = vrot.slane %v247_v15, 2  ;;  %v4810_v17 = vld [vmem:[%s4741_s20 + $0x98] sm:$0xff]  ;;  %v4813_v18 = vld [vmem:[%s4741_s20 + $0x90] sm:$0xff]  ;;  %v480_v40 = vrot.slane %v247_v15, 1  ;;  %v4948_v56 = vsel %vm476_vm1, %v487_v52, %v488_v48  ;;  %v497_v1 = vrot.slane %v4792_v12, 1  ;;  %s4696_s18 = smov 16  }
  0x17   : > { %v4823_v20 = vld [vmem:[%s4741_s20 + $0xb0] sm:$0xff]  ;;  %v4833_v22 = vld [vmem:[%s4741_s20 + $0xc8] sm:$0xff]  ;;  %v4836_v23 = vld [vmem:[%s4741_s20 + $0xc0] sm:$0xff]  ;;  %v4964_v62 = vsel %vm476_vm1, %v492_v58, %v493_v54  ;;  %v503_v6 = vrot.slane %v4799_v13, 1  ;;  %v502_v36 = vrot.slane %v4802_v14, 1  ;;  %s4697_s19 = smov 24  }
  0x18   : > { %v4816_v19 = vsel %vm686_vm0, %v688_v7, %v690_v16  ;;  %v4843_v24 = vld [vmem:[%s4741_s20 + $0xe0] sm:$0xff]  ;;  %v4846_v25 = vld [vmem:[%s4741_s20 + $0xd8] sm:$0xff]  ;;  %v4856_v27 = vld [vmem:[%s4741_s20 + $0xf0] sm:$0xff]  ;;  %v481_v43 = vsel %vm476_vm1, %v478_v37, %v480_v40  ;;  %7347 = vst [vmem:[#allocation4_spill] sm:$0xff] %v4964_v62  ;;  %v4980_v15 = vsel %vm476_vm1, %v497_v1, %v498_v60  ;;  %v508_v40 = vrot.slane %v4810_v17, 1  ;;  %s4701_s12 = smov 64  }
  0x19   : > { %v4853_v26 = vld [vmem:[%s4741_s20 + $0xf8] sm:$0xff]  ;;  %v4863_v28 = vld [vmem:[%s4741_s20 + $0x110] sm:$0xff]  ;;  %v4866_v29 = vld [vmem:[%s4741_s20 + $0x108] sm:$0xff]  ;;  %7349 = vst [vmem:[#allocation6_spill] sm:$0xff] %v4980_v15 }
  0x1a   : > { %341 = vrot.lane.b32.xlu1 %v4764_v4, %s4684_s21  ;;  %339 = vrot.lane.b32.xlu0 %v4767_v5, %s4684_s21  ;;  %v4873_v30 = vld [vmem:[%s4741_s20 + $0x128] sm:$0xff]  ;;  %v4876_v31 = vld [vmem:[%s4741_s20 + $0x120] sm:$0xff] }
  0x1b   : > { %v4883_v32 = vld [vmem:[%s4741_s20 + $0x140] sm:$0xff]  ;;  %v4886_v33 = vld [vmem:[%s4741_s20 + $0x138] sm:$0xff]  ;;  %v4896_v35 = vld [vmem:[%s4741_s20 + $0x150] sm:$0xff] }
  0x1c   : > { %v4893_v34 = vld [vmem:[%s4741_s20 + $0x158] sm:$0xff]  ;;  %v4905_v38 = vld [vmem:[%s4741_s20 + $0x170] sm:$0xff]  ;;  %v4908_v39 = vld [vmem:[%s4741_s20 + $0x168] sm:$0xff] }
  0x1d   : > { %v4911_v41 = vld [vmem:[%s4741_s20 + $0x28] sm:$0x3]  ;;  %v4923_v47 = vld [vmem:[%s4741_s20 + $0x40] sm:$0x3]  ;;  %v4937_v53 = vld [vmem:[%s4741_s20 + $0x58] sm:$0x3] }
  0x1e   : > { %345 = vrot.lane.b32.xlu1 %v4776_v8, %s4684_s21  ;;  %343 = vrot.lane.b32.xlu0 %v4779_v9, %s4684_s21  ;;  %v485_v45 = vrot.slane %v4911_v41, 1  ;;  %v490_v51 = vrot.slane %v4923_v47, 1  ;;  %v495_v57 = vrot.slane %v4937_v53, 1  ;;  %v4953_v59 = vld [vmem:[%s4741_s20 + $0x70] sm:$0x3] }
  0x1f   : > { %v500_v63 = vrot.slane %v4953_v59, 1  ;;  %v4969_v3 = vld [vmem:[%s4741_s20 + $0x88] sm:$0x3]  ;;  %v4985_v37 = vld [vmem:[%s4741_s20 + $0xa0] sm:$0x3] }
  0x20   : > { %v4929_v49 = vsel %vm476_vm1, %v483_v42, %v485_v45  ;;  %v4945_v55 = vsel %vm476_vm1, %v488_v48, %v490_v51  ;;  %v4961_v61 = vsel %vm476_vm1, %v493_v54, %v495_v57  ;;  %v505_v16 = vrot.slane %v4969_v3, 1  ;;  %v5001_v46 = vld [vmem:[%s4741_s20 + $0xb8] sm:$0x3]  ;;  %v5017_v58 = vld [vmem:[%s4741_s20 + $0xd0] sm:$0x3] }
  0x21   : > { %v4977_v7 = vsel %vm476_vm1, %v498_v60, %v500_v63  ;;  %v507_v45 = vrot.slane %v4813_v18, 1  ;;  %v513_v48 = vrot.slane %v4823_v20, 1  ;;  %v515_v54 = vrot.slane %v5001_v46, 1 }
  0x22   : > { %349 = vrot.lane.b32.xlu1 %v4789_v11, %s4684_s21  ;;  %347 = vrot.lane.b32.xlu0 %v4792_v12, %s4684_s21  ;;  %7348 = vst [vmem:[#allocation5_spill] sm:$0xff] %v4977_v7  ;;  %v4993_v42 = vsel %vm476_vm1, %v503_v6, %v505_v16  ;;  %v512_v57 = vrot.slane %v4826_v21, 1  ;;  %v518_v60 = vrot.slane %v4833_v22, 1  ;;  %v517_v16 = vrot.slane %v4836_v23, 1 }
  0x23   : > { %7350 = vst [vmem:[#allocation7_spill] sm:$0xff] %v4993_v42  ;;  %v5012_v52 = vsel %vm476_vm1, %v507_v45, %v508_v40  ;;  %v5025_v63 = vsel %vm476_vm1, %v513_v48, %v515_v54  ;;  %v522_v54 = vrot.slane %v4846_v25, 1 }
  0x24   : > { %7353 = vst [vmem:[#allocation10_spill] sm:$0xff] %v5012_v52  ;;  %7354 = vst [vmem:[#allocation11_spill] sm:$0xff] %v5025_v63  ;;  %v5028_v1 = vsel %vm476_vm1, %v512_v57, %v513_v48  ;;  %v5044_v45 = vsel %vm476_vm1, %v517_v16, %v518_v60  ;;  %v5049_v57 = vld [vmem:[%s4741_s20 + $0x100] sm:$0x3] }
  0x25   : > { %7355 = vst [vmem:[#allocation12_spill] sm:$0xff] %v5028_v1  ;;  %7357 = vst [vmem:[#allocation14_spill] sm:$0xff] %v5044_v45  ;;  %v530_v16 = vrot.slane %v5049_v57, 1 }
  0x26   : > { %353 = vrot.lane.b32.xlu1 %v4799_v13, %s4684_s21  ;;  %351 = vrot.lane.b32.xlu0 %v4802_v14, %s4684_s21 }
  0x2a   : > { %357 = vrot.lane.b32.xlu1 %v4810_v17, %s4684_s21  ;;  %355 = vrot.lane.b32.xlu0 %v4813_v18, %s4684_s21 }
  0x2e   : > { %361 = vrot.lane.b32.xlu1 %v4823_v20, %s4684_s21  ;;  %359 = vrot.lane.b32.xlu0 %v4826_v21, %s4684_s21 }
  0x32   : > { %365 = vrot.lane.b32.xlu1 %v4833_v22, %s4684_s21  ;;  %363 = vrot.lane.b32.xlu0 %v4836_v23, %s4684_s21 }
  0x36   : > { %369 = vrot.lane.b32.xlu1 %v4843_v24, %s4684_s21  ;;  %367 = vrot.lane.b32.xlu0 %v4846_v25, %s4684_s21 }
  0x3a   : > { %373 = vrot.lane.b32.xlu1 %v4853_v26, %s4684_s21  ;;  %371 = vrot.lane.b32.xlu0 %v4856_v27, %s4684_s21 }
  0x3e   : > { %377 = vrot.lane.b32.xlu1 %v4863_v28, %s4684_s21  ;;  %375 = vrot.lane.b32.xlu0 %v4866_v29, %s4684_s21 }
  0x42   : > { %381 = vrot.lane.b32.xlu1 %v4873_v30, %s4684_s21  ;;  %379 = vrot.lane.b32.xlu0 %v4876_v31, %s4684_s21 }
  0x46   : > { %385 = vrot.lane.b32.xlu1 %v4883_v32, %s4684_s21  ;;  %383 = vrot.lane.b32.xlu0 %v4886_v33, %s4684_s21 }
  0x4a   : > { %389 = vrot.lane.b32.xlu1 %v4893_v34, %s4684_s21  ;;  %387 = vrot.lane.b32.xlu0 %v4896_v35, %s4684_s21 }
  0x4e   : > { %393 = vrot.lane.b32.xlu1 %v4905_v38, %s4684_s21  ;;  %391 = vrot.lane.b32.xlu0 %v4908_v39, %s4684_s21 }
  0x52   : > { %559 = vrot.lane.b32.xlu1 %v481_v43, %s4685_s22  ;;  %557 = vrot.lane.b32.xlu0 %v479_v44, %s4685_s22  ;;  %v4996_v43 = vsel %vm476_vm1, %v502_v36, %v503_v6  ;;  %v510_v44 = vrot.slane %v4985_v37, 1  ;;  %v520_v6 = vrot.slane %v5017_v58, 1  ;;  %v5033_v36 = vld [vmem:[%s4741_s20 + $0xe8] sm:$0x3] }
  0x53   : > { %7351 = vst [vmem:[#allocation8_spill] sm:$0xff] %v4996_v43  ;;  %v525_v48 = vrot.slane %v5033_v36, 1 }
  0x54   : > { %v5009_v51 = vsel %vm476_vm1, %v508_v40, %v510_v44  ;;  %v523_v40 = vrot.slane %v4843_v24, 1  ;;  %v5041_v44 = vsel %vm476_vm1, %v518_v60, %v520_v6 }
  0x55   : > { %7352 = vst [vmem:[#allocation9_spill] sm:$0xff] %v5009_v51  ;;  %7356 = vst [vmem:[#allocation13_spill] sm:$0xff] %v5041_v44 }
  0x56   : > { %563 = vrot.lane.b32.xlu1 %v4929_v49, %s4685_s22  ;;  %561 = vrot.lane.b32.xlu0 %v4932_v50, %s4685_s22  ;;  %v5057_v6 = vsel %vm476_vm1, %v523_v40, %v525_v48  ;;  %v5060_v60 = vsel %vm476_vm1, %v522_v54, %v523_v40 }
  0x57   : > { %7358 = vst [vmem:[#allocation15_spill] sm:$0xff] %v5057_v6  ;;  %7359 = vst [vmem:[#allocation16_spill] sm:$0xff] %v5060_v60 }
  0x5a   : > { %567 = vrot.lane.b32.xlu1 %v4945_v55, %s4685_s22  ;;  %565 = vrot.lane.b32.xlu0 %v4948_v56, %s4685_s22 }
  0x5e   : > { %571 = vrot.lane.b32.xlu1 %v4961_v61, %s4685_s22  ;;  %569 = vrot.lane.b32.xlu0 %v4964_v62, %s4685_s22  ;;  %v5129_v62 = vld [vmem:[%s4741_s20 + $0x178] sm:$0x3] }
  0x62   : > { %575 = vrot.lane.b32.xlu1 %v4977_v7, %s4685_s22  ;;  %573 = vrot.lane.b32.xlu0 %v4980_v15, %s4685_s22 }
  0x66   : > { %579 = vrot.lane.b32.xlu1 %v4993_v42, %s4685_s22  ;;  %577 = vrot.lane.b32.xlu0 %v4996_v43, %s4685_s22  ;;  %v5097_v43 = vld [vmem:[%s4741_s20 + $0x148] sm:$0x3]  ;;  %v5113_v42 = vld [vmem:[%s4741_s20 + $0x160] sm:$0x3] }
  0x6a   : > { %583 = vrot.lane.b32.xlu1 %v5009_v51, %s4685_s22  ;;  %581 = vrot.lane.b32.xlu0 %v5012_v52, %s4685_s22  ;;  %v5065_v52 = vld [vmem:[%s4741_s20 + $0x118] sm:$0x3]  ;;  %v5081_v51 = vld [vmem:[%s4741_s20 + $0x130] sm:$0x3] }
  0x6b   : > { %v535_v54 = vrot.slane %v5065_v52, 1 }
  0x6e   : > { %587 = vrot.lane.b32.xlu1 %v5025_v63, %s4685_s22  ;;  %585 = vrot.lane.b32.xlu0 %v5028_v1, %s4685_s22  ;;  %v528_v1 = vrot.slane %v4853_v26, 1  ;;  %v527_v63 = vrot.slane %v4856_v27, 1 }
  0x70   : > { %v5073_v48 = vsel %vm476_vm1, %v528_v1, %v530_v16  ;;  %v5076_v40 = vsel %vm476_vm1, %v527_v63, %v528_v1  ;;  %v540_v1 = vrot.slane %v5081_v51, 1 }
  0x71   : > { %7360 = vst [vmem:[#allocation17_spill] sm:$0xff] %v5073_v48  ;;  %7361 = vst [vmem:[#allocation18_spill] sm:$0xff] %v5076_v40 }
  0x72   : > { %591 = vrot.lane.b32.xlu1 %v5041_v44, %s4685_s22  ;;  %589 = vrot.lane.b32.xlu0 %v5044_v45, %s4685_s22  ;;  %v533_v45 = vrot.slane %v4863_v28, 1  ;;  %v532_v44 = vrot.slane %v4866_v29, 1 }
  0x74   : > { %v5089_v16 = vsel %vm476_vm1, %v533_v45, %v535_v54  ;;  %v5092_v63 = vsel %vm476_vm1, %v532_v44, %v533_v45  ;;  %v545_v45 = vrot.slane %v5097_v43, 1 }
  0x75   : > { %7362 = vst [vmem:[#allocation19_spill] sm:$0xff] %v5089_v16  ;;  %7363 = vst [vmem:[#allocation20_spill] sm:$0xff] %v5092_v63 }
  0x76   : > { %595 = vrot.lane.b32.xlu1 %v5057_v6, %s4685_s22  ;;  %593 = vrot.lane.b32.xlu0 %v5060_v60, %s4685_s22  ;;  %v538_v60 = vrot.slane %v4873_v30, 1  ;;  %v537_v6 = vrot.slane %v4876_v31, 1 }
  0x78   : > { %v5105_v54 = vsel %vm476_vm1, %v538_v60, %v540_v1  ;;  %v5108_v44 = vsel %vm476_vm1, %v537_v6, %v538_v60  ;;  %v547_v1 = vrot.slane %v4896_v35, 1 }
  0x79   : > { %7364 = vst [vmem:[#allocation21_spill] sm:$0xff] %v5105_v54  ;;  %7365 = vst [vmem:[#allocation22_spill] sm:$0xff] %v5108_v44 }
  0x7a   : > { %599 = vrot.lane.b32.xlu1 %v5073_v48, %s4685_s22  ;;  %597 = vrot.lane.b32.xlu0 %v5076_v40, %s4685_s22  ;;  %v543_v40 = vrot.slane %v4883_v32, 1  ;;  %v542_v48 = vrot.slane %v4886_v33, 1 }
  0x7c   : > { %v5122_v6 = vsel %vm476_vm1, %v543_v40, %v545_v45  ;;  %v5125_v60 = vsel %vm476_vm1, %v542_v48, %v543_v40  ;;  %v553_v40 = vrot.slane %v4905_v38, 1 }
  0x7d   : > { %7366 = vst [vmem:[#allocation23_spill] sm:$0xff] %v5125_v60 }
  0x7e   : > { %603 = vrot.lane.b32.xlu1 %v5089_v16, %s4685_s22  ;;  %601 = vrot.lane.b32.xlu0 %v5092_v63, %s4685_s22  ;;  %v548_v63 = vrot.slane %v4893_v34, 1  ;;  %v550_v16 = vrot.slane %v5113_v42, 1 }
  0x80   : > { %v5138_v45 = vsel %vm476_vm1, %v547_v1, %v548_v63  ;;  %v5141_v48 = vsel %vm476_vm1, %v548_v63, %v550_v16 }
  0x82   : > { %607 = vrot.lane.b32.xlu1 %v5105_v54, %s4685_s22  ;;  %605 = vrot.lane.b32.xlu0 %v5108_v44, %s4685_s22  ;;  %v555_v44 = vrot.slane %v5129_v62, 1 }
  0x84   : > { %v336_v15 = vpop.permute.xlu1 %335  ;;  %v332_v7 = vpop.permute.xlu0 %331  ;;  %v5153_v16 = vsel %vm476_vm1, %v553_v40, %v555_v44  ;;  %v695_v44 = vrot.slane %v4911_v41, 2 }
  0x85   : > { %430 = vst.msk [vmem:[#allocation3 + $0x10] sm:$0xff] %vm427_vm2, %v336_v15  ;;  %428 = vst.msk [vmem:[#allocation3] sm:$0xff] %vm427_vm2, %v332_v7  ;;  %v552_v15 = vrot.slane %v4908_v39, 1 }
  0x86   : > { %611 = vrot.lane.b32.xlu1 %v5122_v6, %s4685_s22  ;;  %609 = vrot.lane.b32.xlu0 %v5125_v60, %s4685_s22  ;;  %7367 = vst [vmem:[#allocation24_spill] sm:$0xff] %v5153_v16 }
  0x87   : > { %v5156_v63 = vsel %vm476_vm1, %v552_v15, %v553_v40 }
  0x88   : > { %v338_v54 = vpop.permute.xlu1 %337  ;;  %v334_v7 = vpop.permute.xlu0 %333  ;;  %7368 = vst [vmem:[#allocation25_spill] sm:$0xff] %v5156_v63 }
  0x89   : > { %431 = vst.msk [vmem:[#allocation3 + $0x18] sm:$0xff] %vm427_vm2, %v338_v54  ;;  %429 = vst.msk [vmem:[#allocation3 + $0x8] sm:$0xff] %vm427_vm2, %v334_v7  ;;  %v693_v54 = vrot.slane %v4754_v2, 2  ;;  %v692_v7 = vrot.slane %v4744_v0, 2 }
  0x8a   : > { %615 = vrot.lane.b32.xlu1 %v5141_v48, %s4685_s22  ;;  %613 = vrot.lane.b32.xlu0 %v5138_v45, %s4685_s22 }
  0x8b   : > { %v5178_v41 = vsel %vm686_vm0, %v692_v7, %v693_v54 }
  0x8c   : > { %v342_v1 = vpop.permute.xlu1 %341  ;;  %v340_v60 = vpop.permute.xlu0 %339 }
  0x8d   : > { %433 = vst.msk [vmem:[#allocation3 + $0x28] sm:$0xff] %vm427_vm2, %v342_v1  ;;  %432 = vst.msk [vmem:[#allocation3 + $0x20] sm:$0xff] %vm427_vm2, %v340_v60  ;;  %v698_v60 = vrot.slane %v4764_v4, 2  ;;  %v5175_v1 = vsel %vm686_vm0, %v693_v54, %v695_v44  ;;  %v705_v54 = vrot.slane %v4937_v53, 2  ;;  %v702_v44 = vrot.slane %v4779_v9, 2 }
  0x8e   : > { %619 = vrot.lane.b32.xlu1 %v5153_v16, %s4685_s22  ;;  %617 = vrot.lane.b32.xlu0 %v5156_v63, %s4685_s22  ;;  %v700_v63 = vrot.slane %v4923_v47, 2 }
  0x90   : > { %v346_v40 = vpop.permute.xlu1 %345  ;;  %v344_v15 = vpop.permute.xlu0 %343 }
  0x91   : > { %435 = vst.msk [vmem:[#allocation3 + $0x38] sm:$0xff] %vm427_vm2, %v346_v40  ;;  %434 = vst.msk [vmem:[#allocation3 + $0x30] sm:$0xff] %vm427_vm2, %v344_v15  ;;  %v697_v40 = vrot.slane %v4767_v5, 2 }
  0x92   : > { %769 = vrot.lane.b32.xlu1 %v4816_v19, %s4686_s23  ;;  %767 = vrot.lane.b32.xlu0 %v4782_v10, %s4686_s23  ;;  %v703_v10 = vrot.slane %v4776_v8, 2  ;;  %v5190_v19 = vsel %vm686_vm0, %v698_v60, %v700_v63  ;;  %v708_v63 = vrot.slane %v4789_v11, 2 }
  0x93   : > { %v5193_v47 = vsel %vm686_vm0, %v697_v40, %v698_v60  ;;  %v710_v40 = vrot.slane %v4953_v59, 2 }
  0x94   : > { %v350_v15 = vpop.permute.xlu1 %349  ;;  %v348_v16 = vpop.permute.xlu0 %347  ;;  %7369 = vst [vmem:[#allocation26_spill] sm:$0xff] %v5193_v47  ;;  %v5205_v60 = vsel %vm686_vm0, %v703_v10, %v705_v54  ;;  %v5208_v53 = vsel %vm686_vm0, %v702_v44, %v703_v10  ;;  %v713_v54 = vrot.slane %v4799_v13, 2  ;;  %v715_v44 = vrot.slane %v4969_v3, 2 }
  0x95   : > { %437 = vst.msk [vmem:[#allocation3 + $0x48] sm:$0xff] %vm427_vm2, %v350_v15  ;;  %436 = vst.msk [vmem:[#allocation3 + $0x40] sm:$0xff] %vm427_vm2, %v348_v16  ;;  %v707_v15 = vrot.slane %v4792_v12, 2  ;;  %v5220_v10 = vsel %vm686_vm0, %v708_v63, %v710_v40  ;;  %v718_v40 = vrot.slane %v4810_v17, 2 }
  0x96   : > { %773 = vrot.lane.b32.xlu1 %v5175_v1, %s4686_s23  ;;  %771 = vrot.lane.b32.xlu0 %v5178_v41, %s4686_s23  ;;  %7370 = vst [vmem:[#allocation27_spill] sm:$0xff] %v5208_v53 }
  0x97   : > { %v5223_v59 = vsel %vm686_vm0, %v707_v15, %v708_v63  ;;  %v5235_v63 = vsel %vm686_vm0, %v713_v54, %v715_v44  ;;  %v720_v15 = vrot.slane %v4985_v37, 2  ;;  %v723_v44 = vrot.slane %v4823_v20, 2 }
  0x98   : > { %v354_v7 = vpop.permute.xlu1 %353  ;;  %v352_v16 = vpop.permute.xlu0 %351  ;;  %7371 = vst [vmem:[#allocation28_spill] sm:$0xff] %v5223_v59 }
  0x99   : > { %439 = vst.msk [vmem:[#allocation3 + $0x58] sm:$0xff] %vm427_vm2, %v354_v7  ;;  %438 = vst.msk [vmem:[#allocation3 + $0x50] sm:$0xff] %vm427_vm2, %v352_v16 }
  0x9a   : > { %777 = vrot.lane.b32.xlu1 %v5190_v19, %s4686_s23  ;;  %775 = vrot.lane.b32.xlu0 %v5193_v47, %s4686_s23 }
  0x9c   : > { %v358_v7 = vpop.permute.xlu1 %357  ;;  %v356_v16 = vpop.permute.xlu0 %355 }
  0x9d   : > { %441 = vst.msk [vmem:[#allocation3 + $0x68] sm:$0xff] %vm427_vm2, %v358_v7  ;;  %440 = vst.msk [vmem:[#allocation3 + $0x60] sm:$0xff] %vm427_vm2, %v356_v16  ;;  %v712_v7 = vrot.slane %v4802_v14, 2 }
  0x9e   : > { %781 = vrot.lane.b32.xlu1 %v5205_v60, %s4686_s23  ;;  %779 = vrot.lane.b32.xlu0 %v5208_v53, %s4686_s23 }
  0x9f   : > { %v5238_v3 = vsel %vm686_vm0, %v712_v7, %v713_v54  ;;  %v5250_v54 = vsel %vm686_vm0, %v718_v40, %v720_v15  ;;  %v725_v7 = vrot.slane %v5001_v46, 2  ;;  %v728_v15 = vrot.slane %v4833_v22, 2 }
  0xa0   : > { %v362_v47 = vpop.permute.xlu1 %361  ;;  %v360_v16 = vpop.permute.xlu0 %359  ;;  %7372 = vst [vmem:[#allocation29_spill] sm:$0xff] %v5238_v3 }
  0xa1   : > { %443 = vst.msk [vmem:[#allocation3 + $0x78] sm:$0xff] %vm427_vm2, %v362_v47  ;;  %442 = vst.msk [vmem:[#allocation3 + $0x70] sm:$0xff] %vm427_vm2, %v360_v16  ;;  %v717_v47 = vrot.slane %v4813_v18, 2  ;;  %v5266_v46 = vsel %vm686_vm0, %v723_v44, %v725_v7  ;;  %v733_v7 = vrot.slane %v4843_v24, 2 }
  0xa2   : > { %785 = vrot.lane.b32.xlu1 %v5220_v10, %s4686_s23  ;;  %783 = vrot.lane.b32.xlu0 %v5223_v59, %s4686_s23 }
  0xa3   : > { %v5253_v37 = vsel %vm686_vm0, %v717_v47, %v718_v40  ;;  %v730_v40 = vrot.slane %v5017_v58, 2 }
  0xa4   : > { %v366_v53 = vpop.permute.xlu1 %365  ;;  %v364_v16 = vpop.permute.xlu0 %363  ;;  %7373 = vst [vmem:[#allocation30_spill] sm:$0xff] %v5253_v37 }
  0xa5   : > { %445 = vst.msk [vmem:[#allocation3 + $0x88] sm:$0xff] %vm427_vm2, %v366_v53  ;;  %444 = vst.msk [vmem:[#allocation3 + $0x80] sm:$0xff] %vm427_vm2, %v364_v16  ;;  %v722_v53 = vrot.slane %v4826_v21, 2  ;;  %v5279_v58 = vsel %vm686_vm0, %v728_v15, %v730_v40  ;;  %v740_v40 = vrot.slane %v5049_v57, 2 }
  0xa6   : > { %789 = vrot.lane.b32.xlu1 %v5235_v63, %s4686_s23  ;;  %787 = vrot.lane.b32.xlu0 %v5238_v3, %s4686_s23 }
  0xa7   : > { %v5269_v47 = vsel %vm686_vm0, %v722_v53, %v723_v44  ;;  %v735_v53 = vrot.slane %v5033_v36, 2 }
  0xa8   : > { %v370_v59 = vpop.permute.xlu1 %369  ;;  %v368_v16 = vpop.permute.xlu0 %367  ;;  %7374 = vst [vmem:[#allocation31_spill] sm:$0xff] %v5269_v47 }
  0xa9   : > { %447 = vst.msk [vmem:[#allocation3 + $0x98] sm:$0xff] %vm427_vm2, %v370_v59  ;;  %446 = vst.msk [vmem:[#allocation3 + $0x90] sm:$0xff] %vm427_vm2, %v368_v16  ;;  %v727_v59 = vrot.slane %v4836_v23, 2  ;;  %v5296_v36 = vsel %vm686_vm0, %v733_v7, %v735_v53  ;;  %v743_v53 = vrot.slane %v4863_v28, 2 }
  0xaa   : > { %793 = vrot.lane.b32.xlu1 %v5250_v54, %s4686_s23  ;;  %791 = vrot.lane.b32.xlu0 %v5253_v37, %s4686_s23 }
  0xab   : > { %v5282_v44 = vsel %vm686_vm0, %v727_v59, %v728_v15  ;;  %v738_v15 = vrot.slane %v4853_v26, 2 }
  0xac   : > { %v374_v3 = vpop.permute.xlu1 %373  ;;  %v372_v16 = vpop.permute.xlu0 %371  ;;  %7375 = vst [vmem:[#allocation32_spill] sm:$0xff] %v5282_v44 }
  0xad   : > { %449 = vst.msk [vmem:[#allocation3 + $0xa8] sm:$0xff] %vm427_vm2, %v374_v3  ;;  %448 = vst.msk [vmem:[#allocation3 + $0xa0] sm:$0xff] %vm427_vm2, %v372_v16  ;;  %v732_v3 = vrot.slane %v4846_v25, 2  ;;  %v5309_v57 = vsel %vm686_vm0, %v738_v15, %v740_v40  ;;  %v750_v40 = vrot.slane %v5081_v51, 2 }
  0xae   : > { %797 = vrot.lane.b32.xlu1 %v5266_v46, %s4686_s23  ;;  %795 = vrot.lane.b32.xlu0 %v5269_v47, %s4686_s23 }
  0xaf   : > { %v5299_v59 = vsel %vm686_vm0, %v732_v3, %v733_v7  ;;  %v745_v3 = vrot.slane %v5065_v52, 2 }
  0xb0   : > { %v378_v37 = vpop.permute.xlu1 %377  ;;  %v376_v16 = vpop.permute.xlu0 %375  ;;  %7376 = vst [vmem:[#allocation33_spill] sm:$0xff] %v5299_v59 }
  0xb1   : > { %451 = vst.msk [vmem:[#allocation3 + $0xb8] sm:$0xff] %vm427_vm2, %v378_v37  ;;  %450 = vst.msk [vmem:[#allocation3 + $0xb0] sm:$0xff] %vm427_vm2, %v376_v16  ;;  %v737_v37 = vrot.slane %v4856_v27, 2  ;;  %v5326_v52 = vsel %vm686_vm0, %v743_v53, %v745_v3  ;;  %v753_v3 = vrot.slane %v4883_v32, 2 }
  0xb2   : > { %801 = vrot.lane.b32.xlu1 %v5279_v58, %s4686_s23  ;;  %799 = vrot.lane.b32.xlu0 %v5282_v44, %s4686_s23 }
  0xb3   : > { %v5312_v7 = vsel %vm686_vm0, %v737_v37, %v738_v15  ;;  %v748_v15 = vrot.slane %v4873_v30, 2 }
  0xb4   : > { %v382_v47 = vpop.permute.xlu1 %381  ;;  %v380_v16 = vpop.permute.xlu0 %379  ;;  %7377 = vst [vmem:[#allocation34_spill] sm:$0xff] %v5312_v7 }
  0xb5   : > { %453 = vst.msk [vmem:[#allocation3 + $0xc8] sm:$0xff] %vm427_vm2, %v382_v47  ;;  %452 = vst.msk [vmem:[#allocation3 + $0xc0] sm:$0xff] %vm427_vm2, %v380_v16  ;;  %v742_v47 = vrot.slane %v4866_v29, 2  ;;  %v5339_v51 = vsel %vm686_vm0, %v748_v15, %v750_v40  ;;  %v760_v40 = vrot.slane %v5113_v42, 2 }
  0xb6   : > { %805 = vrot.lane.b32.xlu1 %v5296_v36, %s4686_s23  ;;  %803 = vrot.lane.b32.xlu0 %v5299_v59, %s4686_s23 }
  0xb7   : > { %v5329_v37 = vsel %vm686_vm0, %v742_v47, %v743_v53  ;;  %v755_v47 = vrot.slane %v5097_v43, 2 }
  0xb8   : > { %v386_v44 = vpop.permute.xlu1 %385  ;;  %v384_v16 = vpop.permute.xlu0 %383  ;;  %7378 = vst [vmem:[#allocation35_spill] sm:$0xff] %v5329_v37 }
  0xb9   : > { %455 = vst.msk [vmem:[#allocation3 + $0xd8] sm:$0xff] %vm427_vm2, %v386_v44  ;;  %454 = vst.msk [vmem:[#allocation3 + $0xd0] sm:$0xff] %vm427_vm2, %v384_v16  ;;  %v747_v44 = vrot.slane %v4876_v31, 2  ;;  %v5356_v43 = vsel %vm686_vm0, %v753_v3, %v755_v47  ;;  %v763_v47 = vrot.slane %v4905_v38, 2 }
  0xba   : > { %809 = vrot.lane.b32.xlu1 %v5309_v57, %s4686_s23  ;;  %807 = vrot.lane.b32.xlu0 %v5312_v7, %s4686_s23 }
  0xbb   : > { %v5342_v53 = vsel %vm686_vm0, %v747_v44, %v748_v15  ;;  %v758_v15 = vrot.slane %v4893_v34, 2 }
  0xbc   : > { %v390_v59 = vpop.permute.xlu1 %389  ;;  %v388_v16 = vpop.permute.xlu0 %387  ;;  %7379 = vst [vmem:[#allocation36_spill] sm:$0xff] %v5342_v53 }
  0xbd   : > { %457 = vst.msk [vmem:[#allocation3 + $0xe8] sm:$0xff] %vm427_vm2, %v390_v59  ;;  %456 = vst.msk [vmem:[#allocation3 + $0xe0] sm:$0xff] %vm427_vm2, %v388_v16  ;;  %v752_v59 = vrot.slane %v4886_v33, 2  ;;  %v5369_v42 = vsel %vm686_vm0, %v758_v15, %v760_v40 }
  0xbe   : > { %813 = vrot.lane.b32.xlu1 %v5326_v52, %s4686_s23  ;;  %811 = vrot.lane.b32.xlu0 %v5329_v37, %s4686_s23 }
  0xbf   : > { %v5359_v44 = vsel %vm686_vm0, %v752_v59, %v753_v3  ;;  %v765_v59 = vrot.slane %v5129_v62, 2 }
  0xc0   : > { %v394_v7 = vpop.permute.xlu1 %393  ;;  %v392_v16 = vpop.permute.xlu0 %391 }
  0xc1   : > { %459 = vst.msk [vmem:[#allocation3 + $0xf8] sm:$0xff] %vm427_vm2, %v394_v7  ;;  %458 = vst.msk [vmem:[#allocation3 + $0xf0] sm:$0xff] %vm427_vm2, %v392_v16  ;;  %v757_v7 = vrot.slane %v4896_v35, 2 }
  0xc2   : > { %817 = vrot.lane.b32.xlu1 %v5339_v51, %s4686_s23  ;;  %815 = vrot.lane.b32.xlu0 %v5342_v53, %s4686_s23 }
  0xc3   : > { %v5372_v3 = vsel %vm686_vm0, %v757_v7, %v758_v15  ;;  %v5384_v15 = vsel %vm686_vm0, %v763_v47, %v765_v59 }
  0xc4   : > { %v560_v16 = vpop.permute.xlu1 %559  ;;  %v558_v37 = vpop.permute.xlu0 %557 }
  0xc5   : > { %655 = vst.msk [vmem:[#allocation3 + $0x8] sm:$0xff] %vm653_vm3, %v560_v16  ;;  %654 = vst.msk [vmem:[#allocation3] sm:$0xff] %vm653_vm3, %v558_v37  ;;  %v762_v16 = vrot.slane %v4908_v39, 2 }
  0xc6   : > { %821 = vrot.lane.b32.xlu1 %v5356_v43, %s4686_s23  ;;  %819 = vrot.lane.b32.xlu0 %v5359_v44, %s4686_s23 }
  0xc7   : > { %v5387_v40 = vsel %vm686_vm0, %v762_v16, %v763_v47 }
  0xc8   : > { %v564_v53 = vpop.permute.xlu1 %563  ;;  %v562_v37 = vpop.permute.xlu0 %561 }
  0xc9   : > { %657 = vst.msk [vmem:[#allocation3 + $0x18] sm:$0xff] %vm653_vm3, %v564_v53  ;;  %656 = vst.msk [vmem:[#allocation3 + $0x10] sm:$0xff] %vm653_vm3, %v562_v37 }
  0xca   : > { %825 = vrot.lane.b32.xlu1 %v5369_v42, %s4686_s23  ;;  %823 = vrot.lane.b32.xlu0 %v5372_v3, %s4686_s23 }
  0xcc   : > { %v568_v62 = vpop.permute.xlu1 %567  ;;  %v566_v7 = vpop.permute.xlu0 %565 }
  0xcd   : > { %659 = vst.msk [vmem:[#allocation3 + $0x28] sm:$0xff] %vm653_vm3, %v568_v62  ;;  %658 = vst.msk [vmem:[#allocation3 + $0x20] sm:$0xff] %vm653_vm3, %v566_v7 }
  0xce   : > { %829 = vrot.lane.b32.xlu1 %v5384_v15, %s4686_s23  ;;  %827 = vrot.lane.b32.xlu0 %v5387_v40, %s4686_s23  ;;  %s4699_s23 = smov 40  }
  0xd0   : > { %v572_v53 = vpop.permute.xlu1 %571  ;;  %v570_v37 = vpop.permute.xlu0 %569 }
  0xd1   : > { %661 = vst.msk [vmem:[#allocation3 + $0x38] sm:$0xff] %vm653_vm3, %v572_v53  ;;  %660 = vst.msk [vmem:[#allocation3 + $0x30] sm:$0xff] %vm653_vm3, %v570_v37 }
  0xd2   : > { %900 = vrot.lane.b32.xlu1 %v4754_v2, %s4687_s24  ;;  %898 = vrot.lane.b32.xlu0 %v4744_v0, %s4687_s24 }
  0xd4   : > { %v576_v47 = vpop.permute.xlu1 %575  ;;  %v574_v59 = vpop.permute.xlu0 %573 }
  0xd5   : > { %663 = vst.msk [vmem:[#allocation3 + $0x48] sm:$0xff] %vm653_vm3, %v576_v47  ;;  %662 = vst.msk [vmem:[#allocation3 + $0x40] sm:$0xff] %vm653_vm3, %v574_v59 }
  0xd6   : > { %904 = vrot.lane.b32.xlu1 %v4764_v4, %s4687_s24  ;;  %902 = vrot.lane.b32.xlu0 %v4767_v5, %s4687_s24 }
  0xd8   : > { %v580_v16 = vpop.permute.xlu1 %579  ;;  %v578_v62 = vpop.permute.xlu0 %577 }
  0xd9   : > { %665 = vst.msk [vmem:[#allocation3 + $0x58] sm:$0xff] %vm653_vm3, %v580_v16  ;;  %664 = vst.msk [vmem:[#allocation3 + $0x50] sm:$0xff] %vm653_vm3, %v578_v62  ;;  %v7382_v16 = vld [vmem:[#allocation5_spill] sm:$0xff]  ;;  %v7383_v62 = vld [vmem:[#allocation6_spill] sm:$0xff] }
  0xda   : > { %908 = vrot.lane.b32.xlu1 %v4776_v8, %s4687_s24  ;;  %906 = vrot.lane.b32.xlu0 %v4779_v9, %s4687_s24 }
  0xdc   : > { %v584_v0 = vpop.permute.xlu1 %583  ;;  %v582_v2 = vpop.permute.xlu0 %581 }
  0xdd   : > { %667 = vst.msk [vmem:[#allocation3 + $0x68] sm:$0xff] %vm653_vm3, %v584_v0  ;;  %666 = vst.msk [vmem:[#allocation3 + $0x60] sm:$0xff] %vm653_vm3, %v582_v2 }
  0xde   : > { %912 = vrot.lane.b32.xlu1 %v4789_v11, %s4687_s24  ;;  %910 = vrot.lane.b32.xlu0 %v4792_v12, %s4687_s24 }
  0xe0   : > { %v588_v4 = vpop.permute.xlu1 %587  ;;  %v586_v5 = vpop.permute.xlu0 %585 }
  0xe1   : > { %669 = vst.msk [vmem:[#allocation3 + $0x78] sm:$0xff] %vm653_vm3, %v588_v4  ;;  %668 = vst.msk [vmem:[#allocation3 + $0x70] sm:$0xff] %vm653_vm3, %v586_v5  ;;  %v7384_v4 = vld [vmem:[#allocation7_spill] sm:$0xff]  ;;  %v7385_v5 = vld [vmem:[#allocation8_spill] sm:$0xff] }
  0xe2   : > { %916 = vrot.lane.b32.xlu1 %v4799_v13, %s4687_s24  ;;  %914 = vrot.lane.b32.xlu0 %v4802_v14, %s4687_s24 }
  0xe4   : > { %v592_v8 = vpop.permute.xlu1 %591  ;;  %v590_v9 = vpop.permute.xlu0 %589 }
  0xe5   : > { %671 = vst.msk [vmem:[#allocation3 + $0x88] sm:$0xff] %vm653_vm3, %v592_v8  ;;  %670 = vst.msk [vmem:[#allocation3 + $0x80] sm:$0xff] %vm653_vm3, %v590_v9 }
  0xe6   : > { %920 = vrot.lane.b32.xlu1 %v4810_v17, %s4687_s24  ;;  %918 = vrot.lane.b32.xlu0 %v4813_v18, %s4687_s24 }
  0xe8   : > { %v596_v11 = vpop.permute.xlu1 %595  ;;  %v594_v12 = vpop.permute.xlu0 %593 }
  0xe9   : > { %673 = vst.msk [vmem:[#allocation3 + $0x98] sm:$0xff] %vm653_vm3, %v596_v11  ;;  %672 = vst.msk [vmem:[#allocation3 + $0x90] sm:$0xff] %vm653_vm3, %v594_v12  ;;  %v7386_v11 = vld [vmem:[#allocation9_spill] sm:$0xff]  ;;  %v7387_v12 = vld [vmem:[#allocation10_spill] sm:$0xff] }
  0xea   : > { %924 = vrot.lane.b32.xlu1 %v4823_v20, %s4687_s24  ;;  %922 = vrot.lane.b32.xlu0 %v4826_v21, %s4687_s24 }
  0xec   : > { %v600_v13 = vpop.permute.xlu1 %599  ;;  %v598_v14 = vpop.permute.xlu0 %597 }
  0xed   : > { %675 = vst.msk [vmem:[#allocation3 + $0xa8] sm:$0xff] %vm653_vm3, %v600_v13  ;;  %674 = vst.msk [vmem:[#allocation3 + $0xa0] sm:$0xff] %vm653_vm3, %v598_v14 }
  0xee   : > { %928 = vrot.lane.b32.xlu1 %v4833_v22, %s4687_s24  ;;  %926 = vrot.lane.b32.xlu0 %v4836_v23, %s4687_s24 }
  0xf0   : > { %v604_v17 = vpop.permute.xlu1 %603  ;;  %v602_v18 = vpop.permute.xlu0 %601 }
  0xf1   : > { %677 = vst.msk [vmem:[#allocation3 + $0xb8] sm:$0xff] %vm653_vm3, %v604_v17  ;;  %676 = vst.msk [vmem:[#allocation3 + $0xb0] sm:$0xff] %vm653_vm3, %v602_v18  ;;  %v7388_v17 = vld [vmem:[#allocation11_spill] sm:$0xff]  ;;  %v7389_v18 = vld [vmem:[#allocation12_spill] sm:$0xff] }
  0xf2   : > { %932 = vrot.lane.b32.xlu1 %v4843_v24, %s4687_s24  ;;  %930 = vrot.lane.b32.xlu0 %v4846_v25, %s4687_s24 }
  0xf4   : > { %v608_v20 = vpop.permute.xlu1 %607  ;;  %v606_v21 = vpop.permute.xlu0 %605 }
  0xf5   : > { %679 = vst.msk [vmem:[#allocation3 + $0xc8] sm:$0xff] %vm653_vm3, %v608_v20  ;;  %678 = vst.msk [vmem:[#allocation3 + $0xc0] sm:$0xff] %vm653_vm3, %v606_v21 }
  0xf6   : > { %936 = vrot.lane.b32.xlu1 %v4853_v26, %s4687_s24  ;;  %934 = vrot.lane.b32.xlu0 %v4856_v27, %s4687_s24 }
  0xf8   : > { %v612_v22 = vpop.permute.xlu1 %611  ;;  %v610_v23 = vpop.permute.xlu0 %609 }
  0xf9   : > { %681 = vst.msk [vmem:[#allocation3 + $0xd8] sm:$0xff] %vm653_vm3, %v612_v22  ;;  %680 = vst.msk [vmem:[#allocation3 + $0xd0] sm:$0xff] %vm653_vm3, %v610_v23  ;;  %v7390_v22 = vld [vmem:[#allocation13_spill] sm:$0xff]  ;;  %v7391_v23 = vld [vmem:[#allocation14_spill] sm:$0xff] }
  0xfa   : > { %940 = vrot.lane.b32.xlu1 %v4863_v28, %s4687_s24  ;;  %938 = vrot.lane.b32.xlu0 %v4866_v29, %s4687_s24 }
  0xfc   : > { %v616_v24 = vpop.permute.xlu1 %615  ;;  %v614_v25 = vpop.permute.xlu0 %613 }
  0xfd   : > { %683 = vst.msk [vmem:[#allocation3 + $0xe8] sm:$0xff] %vm653_vm3, %v616_v24  ;;  %682 = vst.msk [vmem:[#allocation3 + $0xe0] sm:$0xff] %vm653_vm3, %v614_v25 }
  0xfe   : > { %944 = vrot.lane.b32.xlu1 %v4873_v30, %s4687_s24  ;;  %942 = vrot.lane.b32.xlu0 %v4876_v31, %s4687_s24 }
 0x100   : > { %v620_v26 = vpop.permute.xlu1 %619  ;;  %v618_v27 = vpop.permute.xlu0 %617 }
 0x101   : > { %685 = vst.msk [vmem:[#allocation3 + $0xf8] sm:$0xff] %vm653_vm3, %v620_v26  ;;  %684 = vst.msk [vmem:[#allocation3 + $0xf0] sm:$0xff] %vm653_vm3, %v618_v27  ;;  %v7392_v26 = vld [vmem:[#allocation15_spill] sm:$0xff]  ;;  %v7393_v27 = vld [vmem:[#allocation16_spill] sm:$0xff]  ;;  %vm2453_vm3 = vcmask 130112  }
 0x102   : > { %948 = vrot.lane.b32.xlu1 %v4883_v32, %s4687_s24  ;;  %946 = vrot.lane.b32.xlu0 %v4886_v33, %s4687_s24  ;;  %v5486_v32 = vld [vmem:[%s4741_s20 + $0x188] sm:$0xff]  ;;  %v5489_v33 = vld [vmem:[%s4741_s20 + $0x180] sm:$0xff] }
 0x103   : > { %7380 = vst [vmem:[#allocation37_spill] sm:$0xff] %v5489_v33 }
 0x104   : > { %v770_v28 = vpop.permute.xlu1 %769  ;;  %v768_v29 = vpop.permute.xlu0 %767 }
 0x105   : > { %865 = vst.msk [vmem:[#allocation3 + $0x8] sm:$0xff] %vm863_vm4, %v770_v28  ;;  %864 = vst.msk [vmem:[#allocation3] sm:$0xff] %vm863_vm4, %v768_v29 }
 0x106   : > { %952 = vrot.lane.b32.xlu1 %v4893_v34, %s4687_s24  ;;  %950 = vrot.lane.b32.xlu0 %v4896_v35, %s4687_s24 }
 0x108   : > { %v774_v30 = vpop.permute.xlu1 %773  ;;  %v772_v31 = vpop.permute.xlu0 %771 }
 0x109   : > { %867 = vst.msk [vmem:[#allocation3 + $0x18] sm:$0xff] %vm863_vm4, %v774_v30  ;;  %866 = vst.msk [vmem:[#allocation3 + $0x10] sm:$0xff] %vm863_vm4, %v772_v31  ;;  %v7394_v30 = vld [vmem:[#allocation17_spill] sm:$0xff]  ;;  %v7395_v31 = vld [vmem:[#allocation18_spill] sm:$0xff] }
 0x10a   : > { %956 = vrot.lane.b32.xlu1 %v4905_v38, %s4687_s24  ;;  %954 = vrot.lane.b32.xlu0 %v4908_v39, %s4687_s24 }
 0x10c   : > { %v778_v34 = vpop.permute.xlu1 %777  ;;  %v776_v7 = vpop.permute.xlu0 %775 }
 0x10d   : > { %869 = vst.msk [vmem:[#allocation3 + $0x28] sm:$0xff] %vm863_vm4, %v778_v34  ;;  %868 = vst.msk [vmem:[#allocation3 + $0x20] sm:$0xff] %vm863_vm4, %v776_v7 }
 0x10e   : > { %960 = vrot.lane.b32.xlu1 %v5486_v32, %s4687_s24  ;;  %958 = vrot.lane.b32.xlu0 %v5489_v33, %s4687_s24 }
 0x110   : > { %v782_v35 = vpop.permute.xlu1 %781  ;;  %v780_v38 = vpop.permute.xlu0 %779 }
 0x111   : > { %871 = vst.msk [vmem:[#allocation3 + $0x38] sm:$0xff] %vm863_vm4, %v782_v35  ;;  %870 = vst.msk [vmem:[#allocation3 + $0x30] sm:$0xff] %vm863_vm4, %v780_v38  ;;  %v7396_v35 = vld [vmem:[#allocation19_spill] sm:$0xff]  ;;  %v7397_v38 = vld [vmem:[#allocation20_spill] sm:$0xff] }
 0x112   : > { %1035 = vrot.lane.b32.xlu1 %v4929_v49, %s4688_s25  ;;  %1033 = vrot.lane.b32.xlu0 %v4932_v50, %s4688_s25  ;;  %v7381_v49 = vld [vmem:[#allocation4_spill] sm:$0xff] }
 0x114   : > { %v786_v39 = vpop.permute.xlu1 %785  ;;  %v784_v53 = vpop.permute.xlu0 %783 }
 0x115   : > { %873 = vst.msk [vmem:[#allocation3 + $0x48] sm:$0xff] %vm863_vm4, %v786_v39  ;;  %872 = vst.msk [vmem:[#allocation3 + $0x40] sm:$0xff] %vm863_vm4, %v784_v53 }
 0x116   : > { %1039 = vrot.lane.b32.xlu1 %v4945_v55, %s4688_s25  ;;  %1037 = vrot.lane.b32.xlu0 %v4948_v56, %s4688_s25 }
 0x118   : > { %v790_v37 = vpop.permute.xlu1 %789  ;;  %v788_v47 = vpop.permute.xlu0 %787 }
 0x119   : > { %875 = vst.msk [vmem:[#allocation3 + $0x58] sm:$0xff] %vm863_vm4, %v790_v37  ;;  %874 = vst.msk [vmem:[#allocation3 + $0x50] sm:$0xff] %vm863_vm4, %v788_v47  ;;  %v7398_v37 = vld [vmem:[#allocation21_spill] sm:$0xff]  ;;  %v7399_v47 = vld [vmem:[#allocation22_spill] sm:$0xff] }
 0x11a   : > { %1043 = vrot.lane.b32.xlu1 %v4961_v61, %s4688_s25  ;;  %1041 = vrot.lane.b32.xlu0 %v7381_v49, %s4688_s25 }
 0x11c   : > { %v794_v50 = vpop.permute.xlu1 %793  ;;  %v792_v59 = vpop.permute.xlu0 %791 }
 0x11d   : > { %877 = vst.msk [vmem:[#allocation3 + $0x68] sm:$0xff] %vm863_vm4, %v794_v50  ;;  %876 = vst.msk [vmem:[#allocation3 + $0x60] sm:$0xff] %vm863_vm4, %v792_v59 }
 0x11e   : > { %1047 = vrot.lane.b32.xlu1 %v7382_v16, %s4688_s25  ;;  %1045 = vrot.lane.b32.xlu0 %v7383_v62, %s4688_s25 }
 0x120   : > { %v798_v0 = vpop.permute.xlu1 %797  ;;  %v796_v2 = vpop.permute.xlu0 %795 }
 0x121   : > { %879 = vst.msk [vmem:[#allocation3 + $0x78] sm:$0xff] %vm863_vm4, %v798_v0  ;;  %878 = vst.msk [vmem:[#allocation3 + $0x70] sm:$0xff] %vm863_vm4, %v796_v2  ;;  %v7400_v0 = vld [vmem:[#allocation23_spill] sm:$0xff] }
 0x122   : > { %1051 = vrot.lane.b32.xlu1 %v7384_v4, %s4688_s25  ;;  %1049 = vrot.lane.b32.xlu0 %v7385_v5, %s4688_s25 }
 0x124   : > { %v802_v8 = vpop.permute.xlu1 %801  ;;  %v800_v9 = vpop.permute.xlu0 %799 }
 0x125   : > { %881 = vst.msk [vmem:[#allocation3 + $0x88] sm:$0xff] %vm863_vm4, %v802_v8  ;;  %880 = vst.msk [vmem:[#allocation3 + $0x80] sm:$0xff] %vm863_vm4, %v800_v9  ;;  %v5576_v9 = vld [vmem:[%s4741_s20 + $0x190] sm:$0x3] }
 0x126   : > { %1055 = vrot.lane.b32.xlu1 %v7386_v11, %s4688_s25  ;;  %1053 = vrot.lane.b32.xlu0 %v7387_v12, %s4688_s25 }
 0x128   : > { %v806_v13 = vpop.permute.xlu1 %805  ;;  %v804_v14 = vpop.permute.xlu0 %803 }
 0x129   : > { %883 = vst.msk [vmem:[#allocation3 + $0x98] sm:$0xff] %vm863_vm4, %v806_v13  ;;  %882 = vst.msk [vmem:[#allocation3 + $0x90] sm:$0xff] %vm863_vm4, %v804_v14  ;;  %v1029_v13 = vrot.slane %v5486_v32, 1  ;;  %v1028_v14 = vrot.slane %v5489_v33, 1 }
 0x12a   : > { %1059 = vrot.lane.b32.xlu1 %v7388_v17, %s4688_s25  ;;  %1057 = vrot.lane.b32.xlu0 %v7389_v18, %s4688_s25 }
 0x12c   : > { %v810_v20 = vpop.permute.xlu1 %809  ;;  %v808_v21 = vpop.permute.xlu0 %807 }
 0x12d   : > { %885 = vst.msk [vmem:[#allocation3 + $0xa8] sm:$0xff] %vm863_vm4, %v810_v20  ;;  %884 = vst.msk [vmem:[#allocation3 + $0xa0] sm:$0xff] %vm863_vm4, %v808_v21  ;;  %v1031_v20 = vrot.slane %v5576_v9, 1 }
 0x12e   : > { %1063 = vrot.lane.b32.xlu1 %v7390_v22, %s4688_s25  ;;  %1061 = vrot.lane.b32.xlu0 %v7391_v23, %s4688_s25 }
 0x130   : > { %v814_v24 = vpop.permute.xlu1 %813  ;;  %v812_v25 = vpop.permute.xlu0 %811 }
 0x131   : > { %887 = vst.msk [vmem:[#allocation3 + $0xb8] sm:$0xff] %vm863_vm4, %v814_v24  ;;  %886 = vst.msk [vmem:[#allocation3 + $0xb0] sm:$0xff] %vm863_vm4, %v812_v25  ;;  %v7401_v25 = vld [vmem:[#allocation24_spill] sm:$0xff] }
 0x132   : > { %1067 = vrot.lane.b32.xlu1 %v7392_v26, %s4688_s25  ;;  %1065 = vrot.lane.b32.xlu0 %v7393_v27, %s4688_s25 }
 0x134   : > { %v818_v28 = vpop.permute.xlu1 %817  ;;  %v816_v29 = vpop.permute.xlu0 %815 }
 0x135   : > { %889 = vst.msk [vmem:[#allocation3 + $0xc8] sm:$0xff] %vm863_vm4, %v818_v28  ;;  %888 = vst.msk [vmem:[#allocation3 + $0xc0] sm:$0xff] %vm863_vm4, %v816_v29  ;;  %v7402_v28 = vld [vmem:[#allocation25_spill] sm:$0xff]  ;;  %v5594_v29 = vsel %vm476_vm1, %v1029_v13, %v1031_v20 }
 0x136   : > { %1071 = vrot.lane.b32.xlu1 %v7394_v30, %s4688_s25  ;;  %1069 = vrot.lane.b32.xlu0 %v7395_v31, %s4688_s25  ;;  %7403 = vst [vmem:[#allocation4_spill] sm:$0xff] %v5594_v29 }
 0x138   : > { %v822_v34 = vpop.permute.xlu1 %821  ;;  %v820_v7 = vpop.permute.xlu0 %819 }
 0x139   : > { %891 = vst.msk [vmem:[#allocation3 + $0xd8] sm:$0xff] %vm863_vm4, %v822_v34  ;;  %890 = vst.msk [vmem:[#allocation3 + $0xd0] sm:$0xff] %vm863_vm4, %v820_v7  ;;  %v5597_v34 = vsel %vm476_vm1, %v1028_v14, %v1029_v13 }
 0x13a   : > { %1075 = vrot.lane.b32.xlu1 %v7396_v35, %s4688_s25  ;;  %1073 = vrot.lane.b32.xlu0 %v7397_v38, %s4688_s25  ;;  %7404 = vst [vmem:[#allocation5_spill] sm:$0xff] %v5597_v34 }
 0x13c   : > { %v826_v39 = vpop.permute.xlu1 %825  ;;  %v824_v53 = vpop.permute.xlu0 %823 }
 0x13d   : > { %893 = vst.msk [vmem:[#allocation3 + $0xe8] sm:$0xff] %vm863_vm4, %v826_v39  ;;  %892 = vst.msk [vmem:[#allocation3 + $0xe0] sm:$0xff] %vm863_vm4, %v824_v53 }
 0x13e   : > { %1079 = vrot.lane.b32.xlu1 %v7398_v37, %s4688_s25  ;;  %1077 = vrot.lane.b32.xlu0 %v7399_v47, %s4688_s25 }
 0x140   : > { %v830_v50 = vpop.permute.xlu1 %829  ;;  %v828_v59 = vpop.permute.xlu0 %827 }
 0x141   : > { %895 = vst.msk [vmem:[#allocation3 + $0xf8] sm:$0xff] %vm863_vm4, %v830_v50  ;;  %894 = vst.msk [vmem:[#allocation3 + $0xf0] sm:$0xff] %vm863_vm4, %v828_v59 }
 0x142   : > { %1083 = vrot.lane.b32.xlu1 %v5122_v6, %s4688_s25  ;;  %1081 = vrot.lane.b32.xlu0 %v7400_v0, %s4688_s25 }
 0x144   : > { %v901_v2 = vpop.permute.xlu1 %900  ;;  %v899_v8 = vpop.permute.xlu0 %898 }
 0x145   : > { %996 = vst.msk [vmem:[#allocation3 + $0x8] sm:$0xff] %vm994_vm5, %v901_v2  ;;  %995 = vst.msk [vmem:[#allocation3] sm:$0xff] %vm994_vm5, %v899_v8  ;;  %v7405_v8 = vld [vmem:[#allocation26_spill] sm:$0xff] }
 0x146   : > { %1087 = vrot.lane.b32.xlu1 %v5141_v48, %s4688_s25  ;;  %1085 = vrot.lane.b32.xlu0 %v5138_v45, %s4688_s25 }
 0x148   : > { %v905_v21 = vpop.permute.xlu1 %904  ;;  %v903_v24 = vpop.permute.xlu0 %902 }
 0x149   : > { %998 = vst.msk [vmem:[#allocation3 + $0x18] sm:$0xff] %vm994_vm5, %v905_v21  ;;  %997 = vst.msk [vmem:[#allocation3 + $0x10] sm:$0xff] %vm994_vm5, %v903_v24  ;;  %v7407_v21 = vld [vmem:[#allocation28_spill] sm:$0xff] }
 0x14a   : > { %1091 = vrot.lane.b32.xlu1 %v7401_v25, %s4688_s25  ;;  %1089 = vrot.lane.b32.xlu0 %v7402_v28, %s4688_s25 }
 0x14c   : > { %v909_v7 = vpop.permute.xlu1 %908  ;;  %v907_v39 = vpop.permute.xlu0 %906 }
 0x14d   : > { %1000 = vst.msk [vmem:[#allocation3 + $0x28] sm:$0xff] %vm994_vm5, %v909_v7  ;;  %999 = vst.msk [vmem:[#allocation3 + $0x20] sm:$0xff] %vm994_vm5, %v907_v39  ;;  %v7408_v39 = vld [vmem:[#allocation29_spill] sm:$0xff] }
 0x14e   : > { %1095 = vrot.lane.b32.xlu1 %v5594_v29, %s4688_s25  ;;  %1093 = vrot.lane.b32.xlu0 %v5597_v34, %s4688_s25  ;;  %v7415_v34 = vld [vmem:[#allocation36_spill] sm:$0xff]  ;;  %v1165_v29 = vrot.slane %v5576_v9, 2 }
 0x150   : > { %v913_v53 = vpop.permute.xlu1 %912  ;;  %v911_v50 = vpop.permute.xlu0 %910 }
 0x151   : > { %1002 = vst.msk [vmem:[#allocation3 + $0x38] sm:$0xff] %vm994_vm5, %v913_v53  ;;  %1001 = vst.msk [vmem:[#allocation3 + $0x30] sm:$0xff] %vm994_vm5, %v911_v50 }
 0x152   : > { %1169 = vrot.lane.b32.xlu1 %v5175_v1, %s4689_s26  ;;  %1167 = vrot.lane.b32.xlu0 %v5178_v41, %s4689_s26  ;;  %v7406_v1 = vld [vmem:[#allocation27_spill] sm:$0xff] }
 0x154   : > { %v917_v59 = vpop.permute.xlu1 %916  ;;  %v915_v2 = vpop.permute.xlu0 %914 }
 0x155   : > { %1004 = vst.msk [vmem:[#allocation3 + $0x48] sm:$0xff] %vm994_vm5, %v917_v59  ;;  %1003 = vst.msk [vmem:[#allocation3 + $0x40] sm:$0xff] %vm994_vm5, %v915_v2  ;;  %v7409_v59 = vld [vmem:[#allocation30_spill] sm:$0xff] }
 0x156   : > { %1173 = vrot.lane.b32.xlu1 %v5190_v19, %s4689_s26  ;;  %1171 = vrot.lane.b32.xlu0 %v7405_v8, %s4689_s26 }
 0x158   : > { %v921_v13 = vpop.permute.xlu1 %920  ;;  %v919_v14 = vpop.permute.xlu0 %918 }
 0x159   : > { %1006 = vst.msk [vmem:[#allocation3 + $0x58] sm:$0xff] %vm994_vm5, %v921_v13  ;;  %1005 = vst.msk [vmem:[#allocation3 + $0x50] sm:$0xff] %vm994_vm5, %v919_v14  ;;  %v7410_v14 = vld [vmem:[#allocation31_spill] sm:$0xff] }
 0x15a   : > { %1177 = vrot.lane.b32.xlu1 %v5205_v60, %s4689_s26  ;;  %1175 = vrot.lane.b32.xlu0 %v7406_v1, %s4689_s26 }
 0x15c   : > { %v925_v41 = vpop.permute.xlu1 %924  ;;  %v923_v20 = vpop.permute.xlu0 %922 }
 0x15d   : > { %1008 = vst.msk [vmem:[#allocation3 + $0x68] sm:$0xff] %vm994_vm5, %v925_v41  ;;  %1007 = vst.msk [vmem:[#allocation3 + $0x60] sm:$0xff] %vm994_vm5, %v923_v20 }
 0x15e   : > { %1181 = vrot.lane.b32.xlu1 %v5220_v10, %s4689_s26  ;;  %1179 = vrot.lane.b32.xlu0 %v7407_v21, %s4689_s26 }
 0x160   : > { %v929_v24 = vpop.permute.xlu1 %928  ;;  %v927_v7 = vpop.permute.xlu0 %926 }
 0x161   : > { %1010 = vst.msk [vmem:[#allocation3 + $0x78] sm:$0xff] %vm994_vm5, %v929_v24  ;;  %1009 = vst.msk [vmem:[#allocation3 + $0x70] sm:$0xff] %vm994_vm5, %v927_v7  ;;  %v7411_v24 = vld [vmem:[#allocation32_spill] sm:$0xff] }
 0x162   : > { %1185 = vrot.lane.b32.xlu1 %v5235_v63, %s4689_s26  ;;  %1183 = vrot.lane.b32.xlu0 %v7408_v39, %s4689_s26 }
 0x164   : > { %v933_v53 = vpop.permute.xlu1 %932  ;;  %v931_v50 = vpop.permute.xlu0 %930 }
 0x165   : > { %1012 = vst.msk [vmem:[#allocation3 + $0x88] sm:$0xff] %vm994_vm5, %v933_v53  ;;  %1011 = vst.msk [vmem:[#allocation3 + $0x80] sm:$0xff] %vm994_vm5, %v931_v50  ;;  %v7412_v50 = vld [vmem:[#allocation33_spill] sm:$0xff] }
 0x166   : > { %1189 = vrot.lane.b32.xlu1 %v5250_v54, %s4689_s26  ;;  %1187 = vrot.lane.b32.xlu0 %v7409_v59, %s4689_s26 }
 0x168   : > { %v937_v2 = vpop.permute.xlu1 %936  ;;  %v935_v13 = vpop.permute.xlu0 %934 }
 0x169   : > { %1014 = vst.msk [vmem:[#allocation3 + $0x98] sm:$0xff] %vm994_vm5, %v937_v2  ;;  %1013 = vst.msk [vmem:[#allocation3 + $0x90] sm:$0xff] %vm994_vm5, %v935_v13 }
 0x16a   : > { %1193 = vrot.lane.b32.xlu1 %v5266_v46, %s4689_s26  ;;  %1191 = vrot.lane.b32.xlu0 %v7410_v14, %s4689_s26 }
 0x16c   : > { %v941_v41 = vpop.permute.xlu1 %940  ;;  %v939_v20 = vpop.permute.xlu0 %938 }
 0x16d   : > { %1016 = vst.msk [vmem:[#allocation3 + $0xa8] sm:$0xff] %vm994_vm5, %v941_v41  ;;  %1015 = vst.msk [vmem:[#allocation3 + $0xa0] sm:$0xff] %vm994_vm5, %v939_v20  ;;  %v7413_v41 = vld [vmem:[#allocation34_spill] sm:$0xff] }
 0x16e   : > { %1197 = vrot.lane.b32.xlu1 %v5279_v58, %s4689_s26  ;;  %1195 = vrot.lane.b32.xlu0 %v7411_v24, %s4689_s26 }
 0x170   : > { %v945_v7 = vpop.permute.xlu1 %944  ;;  %v943_v53 = vpop.permute.xlu0 %942 }
 0x171   : > { %1018 = vst.msk [vmem:[#allocation3 + $0xb8] sm:$0xff] %vm994_vm5, %v945_v7  ;;  %1017 = vst.msk [vmem:[#allocation3 + $0xb0] sm:$0xff] %vm994_vm5, %v943_v53  ;;  %v7414_v53 = vld [vmem:[#allocation35_spill] sm:$0xff] }
 0x172   : > { %1201 = vrot.lane.b32.xlu1 %v5296_v36, %s4689_s26  ;;  %1199 = vrot.lane.b32.xlu0 %v7412_v50, %s4689_s26 }
 0x174   : > { %v949_v2 = vpop.permute.xlu1 %948  ;;  %v947_v13 = vpop.permute.xlu0 %946 }
 0x175   : > { %1020 = vst.msk [vmem:[#allocation3 + $0xc8] sm:$0xff] %vm994_vm5, %v949_v2  ;;  %1019 = vst.msk [vmem:[#allocation3 + $0xc0] sm:$0xff] %vm994_vm5, %v947_v13 }
 0x176   : > { %1205 = vrot.lane.b32.xlu1 %v5309_v57, %s4689_s26  ;;  %1203 = vrot.lane.b32.xlu0 %v7413_v41, %s4689_s26 }
 0x178   : > { %v953_v20 = vpop.permute.xlu1 %952  ;;  %v951_v7 = vpop.permute.xlu0 %950 }
 0x179   : > { %1022 = vst.msk [vmem:[#allocation3 + $0xd8] sm:$0xff] %vm994_vm5, %v953_v20  ;;  %1021 = vst.msk [vmem:[#allocation3 + $0xd0] sm:$0xff] %vm994_vm5, %v951_v7 }
 0x17a   : > { %1209 = vrot.lane.b32.xlu1 %v5326_v52, %s4689_s26  ;;  %1207 = vrot.lane.b32.xlu0 %v7414_v53, %s4689_s26 }
 0x17c   : > { %v957_v2 = vpop.permute.xlu1 %956  ;;  %v955_v13 = vpop.permute.xlu0 %954 }
 0x17d   : > { %1024 = vst.msk [vmem:[#allocation3 + $0xe8] sm:$0xff] %vm994_vm5, %v957_v2  ;;  %1023 = vst.msk [vmem:[#allocation3 + $0xe0] sm:$0xff] %vm994_vm5, %v955_v13 }
 0x17e   : > { %1213 = vrot.lane.b32.xlu1 %v5339_v51, %s4689_s26  ;;  %1211 = vrot.lane.b32.xlu0 %v7415_v34, %s4689_s26 }
 0x180   : > { %v961_v20 = vpop.permute.xlu1 %960  ;;  %v959_v7 = vpop.permute.xlu0 %958 }
 0x181   : > { %1026 = vst.msk [vmem:[#allocation3 + $0xf8] sm:$0xff] %vm994_vm5, %v961_v20  ;;  %1025 = vst.msk [vmem:[#allocation3 + $0xf0] sm:$0xff] %vm994_vm5, %v959_v7  ;;  %v1163_v20 = vrot.slane %v5486_v32, 2  ;;  %v1162_v7 = vrot.slane %v5489_v33, 2 }
 0x182   : > { %1217 = vrot.lane.b32.xlu1 %v5356_v43, %s4689_s26  ;;  %1215 = vrot.lane.b32.xlu0 %v5359_v44, %s4689_s26 }
 0x184   : > { %v1036_v2 = vpop.permute.xlu1 %1035  ;;  %v1034_v13 = vpop.permute.xlu0 %1033 }
 0x185   : > { %1131 = vst.msk [vmem:[#allocation3 + $0x8] sm:$0xff] %vm1129_vm6, %v1036_v2  ;;  %1130 = vst.msk [vmem:[#allocation3] sm:$0xff] %vm1129_vm6, %v1034_v13  ;;  %v5699_v2 = vsel %vm686_vm0, %v1163_v20, %v1165_v29  ;;  %v5702_v13 = vsel %vm686_vm0, %v1162_v7, %v1163_v20  ;;  %v4648_v29 = vld [vmem:[%s4741_s20 + $0x38] sm:$0xff] }
 0x186   : > { %1221 = vrot.lane.b32.xlu1 %v5369_v42, %s4689_s26  ;;  %1219 = vrot.lane.b32.xlu0 %v5372_v3, %s4689_s26  ;;  %7416 = vst [vmem:[#allocation6_spill] sm:$0xff] %v5702_v13 }
 0x188   : > { %v1040_v28 = vpop.permute.xlu1 %1039  ;;  %v1038_v25 = vpop.permute.xlu0 %1037 }
 0x189   : > { %1133 = vst.msk [vmem:[#allocation3 + $0x18] sm:$0xff] %vm1129_vm6, %v1040_v28  ;;  %1132 = vst.msk [vmem:[#allocation3 + $0x10] sm:$0xff] %vm1129_vm6, %v1038_v25 }
 0x18a   : > { %1225 = vrot.lane.b32.xlu1 %v5384_v15, %s4689_s26  ;;  %1223 = vrot.lane.b32.xlu0 %v5387_v40, %s4689_s26 }
 0x18c   : > { %v1044_v9 = vpop.permute.xlu1 %1043  ;;  %v1042_v33 = vpop.permute.xlu0 %1041 }
 0x18d   : > { %1135 = vst.msk [vmem:[#allocation3 + $0x28] sm:$0xff] %vm1129_vm6, %v1044_v9  ;;  %1134 = vst.msk [vmem:[#allocation3 + $0x20] sm:$0xff] %vm1129_vm6, %v1042_v33  ;;  %v4649_v33 = vld [vmem:[%s4741_s20 + $0x30] sm:$0xff] }
 0x18e   : > { %1229 = vrot.lane.b32.xlu1 %v5699_v2, %s4689_s26  ;;  %1227 = vrot.lane.b32.xlu0 %v5702_v13, %s4689_s26  ;;  %v4650_v9 = vld [vmem:[%s4741_s20 + $0x50] sm:$0xff] }
 0x190   : > { %v1048_v25 = vpop.permute.xlu1 %1047  ;;  %v1046_v28 = vpop.permute.xlu0 %1045 }
 0x191   : > { %1137 = vst.msk [vmem:[#allocation3 + $0x38] sm:$0xff] %vm1129_vm6, %v1048_v25  ;;  %1136 = vst.msk [vmem:[#allocation3 + $0x30] sm:$0xff] %vm1129_vm6, %v1046_v28  ;;  %v4651_v25 = vld [vmem:[%s4741_s20 + $0x48] sm:$0xff] }
 0x192   : > { %1300 = vrot.lane.b32.xlu1 %v4648_v29, %s4690_s27  ;;  %1298 = vrot.lane.b32.xlu0 %v4649_v33, %s4690_s27  ;;  %v4652_v33 = vld [vmem:[%s4741_s20 + $0x68] sm:$0xff] }
 0x194   : > { %v1052_v20 = vpop.permute.xlu1 %1051  ;;  %v1050_v7 = vpop.permute.xlu0 %1049 }
 0x195   : > { %1139 = vst.msk [vmem:[#allocation3 + $0x48] sm:$0xff] %vm1129_vm6, %v1052_v20  ;;  %1138 = vst.msk [vmem:[#allocation3 + $0x40] sm:$0xff] %vm1129_vm6, %v1050_v7  ;;  %v4653_v20 = vld [vmem:[%s4741_s20 + $0x60] sm:$0xff] }
 0x196   : > { %1304 = vrot.lane.b32.xlu1 %v4650_v9, %s4690_s27  ;;  %1302 = vrot.lane.b32.xlu0 %v4651_v25, %s4690_s27  ;;  %v4654_v25 = vld [vmem:[%s4741_s20 + $0x80] sm:$0xff] }
 0x198   : > { %v1056_v28 = vpop.permute.xlu1 %1055  ;;  %v1054_v29 = vpop.permute.xlu0 %1053 }
 0x199   : > { %1141 = vst.msk [vmem:[#allocation3 + $0x58] sm:$0xff] %vm1129_vm6, %v1056_v28  ;;  %1140 = vst.msk [vmem:[#allocation3 + $0x50] sm:$0xff] %vm1129_vm6, %v1054_v29  ;;  %v4655_v28 = vld [vmem:[%s4741_s20 + $0x78] sm:$0xff] }
 0x19a   : > { %1308 = vrot.lane.b32.xlu1 %v4652_v33, %s4690_s27  ;;  %1306 = vrot.lane.b32.xlu0 %v4653_v20, %s4690_s27  ;;  %v4656_v20 = vld [vmem:[%s4741_s20 + $0x98] sm:$0xff] }
 0x19c   : > { %v1060_v7 = vpop.permute.xlu1 %1059  ;;  %v1058_v9 = vpop.permute.xlu0 %1057 }
 0x19d   : > { %1143 = vst.msk [vmem:[#allocation3 + $0x68] sm:$0xff] %vm1129_vm6, %v1060_v7  ;;  %1142 = vst.msk [vmem:[#allocation3 + $0x60] sm:$0xff] %vm1129_vm6, %v1058_v9  ;;  %v4657_v7 = vld [vmem:[%s4741_s20 + $0x90] sm:$0xff] }
 0x19e   : > { %1312 = vrot.lane.b32.xlu1 %v4654_v25, %s4690_s27  ;;  %1310 = vrot.lane.b32.xlu0 %v4655_v28, %s4690_s27  ;;  %v4658_v28 = vld [vmem:[%s4741_s20 + $0xb0] sm:$0xff] }
 0x1a0   : > { %v1064_v29 = vpop.permute.xlu1 %1063  ;;  %v1062_v33 = vpop.permute.xlu0 %1061 }
 0x1a1   : > { %1145 = vst.msk [vmem:[#allocation3 + $0x78] sm:$0xff] %vm1129_vm6, %v1064_v29  ;;  %1144 = vst.msk [vmem:[#allocation3 + $0x70] sm:$0xff] %vm1129_vm6, %v1062_v33  ;;  %v4659_v29 = vld [vmem:[%s4741_s20 + $0xa8] sm:$0xff] }
 0x1a2   : > { %1316 = vrot.lane.b32.xlu1 %v4656_v20, %s4690_s27  ;;  %1314 = vrot.lane.b32.xlu0 %v4657_v7, %s4690_s27  ;;  %v4660_v7 = vld [vmem:[%s4741_s20 + $0xc8] sm:$0xff] }
 0x1a4   : > { %v1068_v9 = vpop.permute.xlu1 %1067  ;;  %v1066_v25 = vpop.permute.xlu0 %1065 }
 0x1a5   : > { %1147 = vst.msk [vmem:[#allocation3 + $0x88] sm:$0xff] %vm1129_vm6, %v1068_v9  ;;  %1146 = vst.msk [vmem:[#allocation3 + $0x80] sm:$0xff] %vm1129_vm6, %v1066_v25  ;;  %v4661_v9 = vld [vmem:[%s4741_s20 + $0xc0] sm:$0xff] }
 0x1a6   : > { %1320 = vrot.lane.b32.xlu1 %v4658_v28, %s4690_s27  ;;  %1318 = vrot.lane.b32.xlu0 %v4659_v29, %s4690_s27  ;;  %v4662_v29 = vld [vmem:[%s4741_s20 + $0xe0] sm:$0xff] }
 0x1a8   : > { %v1072_v33 = vpop.permute.xlu1 %1071  ;;  %v1070_v20 = vpop.permute.xlu0 %1069 }
 0x1a9   : > { %1149 = vst.msk [vmem:[#allocation3 + $0x98] sm:$0xff] %vm1129_vm6, %v1072_v33  ;;  %1148 = vst.msk [vmem:[#allocation3 + $0x90] sm:$0xff] %vm1129_vm6, %v1070_v20  ;;  %v4663_v33 = vld [vmem:[%s4741_s20 + $0xd8] sm:$0xff] }
 0x1aa   : > { %1324 = vrot.lane.b32.xlu1 %v4660_v7, %s4690_s27  ;;  %1322 = vrot.lane.b32.xlu0 %v4661_v9, %s4690_s27  ;;  %v4664_v9 = vld [vmem:[%s4741_s20 + $0xf8] sm:$0xff] }
 0x1ac   : > { %v1076_v25 = vpop.permute.xlu1 %1075  ;;  %v1074_v28 = vpop.permute.xlu0 %1073 }
 0x1ad   : > { %1151 = vst.msk [vmem:[#allocation3 + $0xa8] sm:$0xff] %vm1129_vm6, %v1076_v25  ;;  %1150 = vst.msk [vmem:[#allocation3 + $0xa0] sm:$0xff] %vm1129_vm6, %v1074_v28  ;;  %v4665_v25 = vld [vmem:[%s4741_s20 + $0xf0] sm:$0xff] }
 0x1ae   : > { %1328 = vrot.lane.b32.xlu1 %v4662_v29, %s4690_s27  ;;  %1326 = vrot.lane.b32.xlu0 %v4663_v33, %s4690_s27  ;;  %v4666_v33 = vld [vmem:[%s4741_s20 + $0x110] sm:$0xff] }
 0x1b0   : > { %v1080_v20 = vpop.permute.xlu1 %1079  ;;  %v1078_v7 = vpop.permute.xlu0 %1077 }
 0x1b1   : > { %1153 = vst.msk [vmem:[#allocation3 + $0xb8] sm:$0xff] %vm1129_vm6, %v1080_v20  ;;  %1152 = vst.msk [vmem:[#allocation3 + $0xb0] sm:$0xff] %vm1129_vm6, %v1078_v7  ;;  %v4667_v20 = vld [vmem:[%s4741_s20 + $0x108] sm:$0xff] }
 0x1b2   : > { %1332 = vrot.lane.b32.xlu1 %v4664_v9, %s4690_s27  ;;  %1330 = vrot.lane.b32.xlu0 %v4665_v25, %s4690_s27  ;;  %v4668_v25 = vld [vmem:[%s4741_s20 + $0x128] sm:$0xff] }
 0x1b4   : > { %v1084_v28 = vpop.permute.xlu1 %1083  ;;  %v1082_v29 = vpop.permute.xlu0 %1081 }
 0x1b5   : > { %1155 = vst.msk [vmem:[#allocation3 + $0xc8] sm:$0xff] %vm1129_vm6, %v1084_v28  ;;  %1154 = vst.msk [vmem:[#allocation3 + $0xc0] sm:$0xff] %vm1129_vm6, %v1082_v29  ;;  %v4669_v28 = vld [vmem:[%s4741_s20 + $0x120] sm:$0xff] }
 0x1b6   : > { %1336 = vrot.lane.b32.xlu1 %v4666_v33, %s4690_s27  ;;  %1334 = vrot.lane.b32.xlu0 %v4667_v20, %s4690_s27  ;;  %v4670_v20 = vld [vmem:[%s4741_s20 + $0x140] sm:$0xff] }
 0x1b8   : > { %v1088_v7 = vpop.permute.xlu1 %1087  ;;  %v1086_v9 = vpop.permute.xlu0 %1085 }
 0x1b9   : > { %1157 = vst.msk [vmem:[#allocation3 + $0xd8] sm:$0xff] %vm1129_vm6, %v1088_v7  ;;  %1156 = vst.msk [vmem:[#allocation3 + $0xd0] sm:$0xff] %vm1129_vm6, %v1086_v9  ;;  %v4671_v7 = vld [vmem:[%s4741_s20 + $0x138] sm:$0xff] }
 0x1ba   : > { %1340 = vrot.lane.b32.xlu1 %v4668_v25, %s4690_s27  ;;  %1338 = vrot.lane.b32.xlu0 %v4669_v28, %s4690_s27  ;;  %v4672_v25 = vld [vmem:[%s4741_s20 + $0x158] sm:$0xff]  ;;  %v4673_v28 = vld [vmem:[%s4741_s20 + $0x150] sm:$0xff] }
 0x1bc   : > { %v1092_v29 = vpop.permute.xlu1 %1091  ;;  %v1090_v33 = vpop.permute.xlu0 %1089 }
 0x1bd   : > { %1159 = vst.msk [vmem:[#allocation3 + $0xe8] sm:$0xff] %vm1129_vm6, %v1092_v29  ;;  %1158 = vst.msk [vmem:[#allocation3 + $0xe0] sm:$0xff] %vm1129_vm6, %v1090_v33 }
 0x1be   : > { %1344 = vrot.lane.b32.xlu1 %v4670_v20, %s4690_s27  ;;  %1342 = vrot.lane.b32.xlu0 %v4671_v7, %s4690_s27  ;;  %v4674_v20 = vld [vmem:[%s4741_s20 + $0x168] sm:$0xff] }
 0x1c0   : > { %v1096_v9 = vpop.permute.xlu1 %1095  ;;  %v1094_v13 = vpop.permute.xlu0 %1093 }
 0x1c1   : > { %1161 = vst.msk [vmem:[#allocation3 + $0xf8] sm:$0xff] %vm1129_vm6, %v1096_v9  ;;  %1160 = vst.msk [vmem:[#allocation3 + $0xf0] sm:$0xff] %vm1129_vm6, %v1094_v13 }
 0x1c2   : > { %1348 = vrot.lane.b32.xlu1 %v4672_v25, %s4690_s27  ;;  %1346 = vrot.lane.b32.xlu0 %v4673_v28, %s4690_s27 }
 0x1c4   : > { %v1170_v29 = vpop.permute.xlu1 %1169  ;;  %v1168_v33 = vpop.permute.xlu0 %1167 }
 0x1c5   : > { %1265 = vst.msk [vmem:[#allocation3 + $0x8] sm:$0xff] %vm1263_vm7, %v1170_v29  ;;  %1264 = vst.msk [vmem:[#allocation3] sm:$0xff] %vm1263_vm7, %v1168_v33  ;;  %v7418_v33 = vld [vmem:[#allocation25_spill] sm:$0xff] }
 0x1c6   : > { %1433 = vrot.lane.b32.xlu1 %v4948_v56, %s4691_s28  ;;  %1350 = vrot.lane.b32.xlu0 %v4674_v20, %s4690_s27 }
 0x1c8   : > { %v1174_v13 = vpop.permute.xlu1 %1173  ;;  %v1172_v7 = vpop.permute.xlu0 %1171 }
 0x1c9   : > { %1267 = vst.msk [vmem:[#allocation3 + $0x18] sm:$0xff] %vm1263_vm7, %v1174_v13  ;;  %1266 = vst.msk [vmem:[#allocation3 + $0x10] sm:$0xff] %vm1263_vm7, %v1172_v7 }
 0x1ca   : > { %1437 = vrot.lane.b32.xlu1 %v7381_v49, %s4691_s28  ;;  %1435 = vrot.lane.b32.xlu0 %v4945_v55, %s4691_s28 }
 0x1cc   : > { %v1178_v9 = vpop.permute.xlu1 %1177  ;;  %v1176_v25 = vpop.permute.xlu0 %1175 }
 0x1cd   : > { %1269 = vst.msk [vmem:[#allocation3 + $0x28] sm:$0xff] %vm1263_vm7, %v1178_v9  ;;  %1268 = vst.msk [vmem:[#allocation3 + $0x20] sm:$0xff] %vm1263_vm7, %v1176_v25  ;;  %v297_v9 = vld [vmem:[%s4741_s20 + $0x1a0] sm:$0xff]  ;;  %v296_v25 = vld [vmem:[%s4741_s20 + $0x198] sm:$0xff] }
 0x1ce   : > { %1567 = vrot.lane.b32.xlu1 %v7405_v8, %s4692_s29  ;;  %1439 = vrot.lane.b32.xlu0 %v4961_v61, %s4691_s28 }
 0x1d0   : > { %v1182_v56 = vpop.permute.xlu1 %1181  ;;  %v1180_v28 = vpop.permute.xlu0 %1179 }
 0x1d1   : > { %1271 = vst.msk [vmem:[#allocation3 + $0x38] sm:$0xff] %vm1263_vm7, %v1182_v56  ;;  %1270 = vst.msk [vmem:[#allocation3 + $0x30] sm:$0xff] %vm1263_vm7, %v1180_v28 }
 0x1d2   : > { %1571 = vrot.lane.b32.xlu1 %v7406_v1, %s4692_s29  ;;  %1569 = vrot.lane.b32.xlu0 %v5190_v19, %s4692_s29 }
 0x1d4   : > { %v1186_v55 = vpop.permute.xlu1 %1185  ;;  %v1184_v49 = vpop.permute.xlu0 %1183 }
 0x1d5   : > { %1273 = vst.msk [vmem:[#allocation3 + $0x48] sm:$0xff] %vm1263_vm7, %v1186_v55  ;;  %1272 = vst.msk [vmem:[#allocation3 + $0x40] sm:$0xff] %vm1263_vm7, %v1184_v49  ;;  %v298_v55 = vld [vmem:[%s4741_s20 + $0x1a8] sm:$0x3] }
 0x1d6   : > { %1441 = vrot.lane.b32.xlu1 %v7383_v62, %s4691_s28  ;;  %1573 = vrot.lane.b32.xlu0 %v5205_v60, %s4692_s29  ;;  %v4639_v49 = vld [vmem:[%s7273_s1 + $0x8] sm:$0xff]  }
 0x1d8   : > { %v1190_v61 = vpop.permute.xlu1 %1189  ;;  %v1188_v8 = vpop.permute.xlu0 %1187 }
 0x1d9   : > { %1275 = vst.msk [vmem:[#allocation3 + $0x58] sm:$0xff] %vm1263_vm7, %v1190_v61  ;;  %1274 = vst.msk [vmem:[#allocation3 + $0x50] sm:$0xff] %vm1263_vm7, %v1188_v8  ;;  %v1428_v61 = vrot.slane %v296_v25, 1  ;;  %v1431_v8 = vrot.slane %v298_v55, 1 }
 0x1da   : > { %1445 = vrot.lane.b32.xlu1 %v7385_v5, %s4691_s28  ;;  %1443 = vrot.lane.b32.xlu0 %v7382_v16, %s4691_s28 }
 0x1dc   : > { %v1194_v19 = vpop.permute.xlu1 %1193  ;;  %v1192_v1 = vpop.permute.xlu0 %1191 }
 0x1dd   : > { %1277 = vst.msk [vmem:[#allocation3 + $0x68] sm:$0xff] %vm1263_vm7, %v1194_v19  ;;  %1276 = vst.msk [vmem:[#allocation3 + $0x60] sm:$0xff] %vm1263_vm7, %v1192_v1 }
 0x1de   : > { %1575 = vrot.lane.b32.xlu1 %v7407_v21, %s4692_s29  ;;  %1447 = vrot.lane.b32.xlu0 %v7384_v4, %s4691_s28 }
 0x1e0   : > { %v1198_v60 = vpop.permute.xlu1 %1197  ;;  %v1196_v62 = vpop.permute.xlu0 %1195 }
 0x1e1   : > { %1279 = vst.msk [vmem:[#allocation3 + $0x78] sm:$0xff] %vm1263_vm7, %v1198_v60  ;;  %1278 = vst.msk [vmem:[#allocation3 + $0x70] sm:$0xff] %vm1263_vm7, %v1196_v62  ;;  %v4640_v60 = vld [vmem:[%s7273_s1] sm:$0xff]   ;;  %v7420_v62 = vld [vmem:[#allocation4_spill] sm:$0xff] }
 0x1e2   : > { %1579 = vrot.lane.b32.xlu1 %v7408_v39, %s4692_s29  ;;  %1577 = vrot.lane.b32.xlu0 %v5220_v10, %s4692_s29 }
 0x1e4   : > { %v1202_v16 = vpop.permute.xlu1 %1201  ;;  %v1200_v5 = vpop.permute.xlu0 %1199 }
 0x1e5   : > { %1281 = vst.msk [vmem:[#allocation3 + $0x88] sm:$0xff] %vm1263_vm7, %v1202_v16  ;;  %1280 = vst.msk [vmem:[#allocation3 + $0x80] sm:$0xff] %vm1263_vm7, %v1200_v5  ;;  %v7421_v16 = vld [vmem:[#allocation5_spill] sm:$0xff] }
 0x1e6   : > { %1449 = vrot.lane.b32.xlu1 %v7387_v12, %s4691_s28  ;;  %1581 = vrot.lane.b32.xlu0 %v5235_v63, %s4692_s29 }
 0x1e8   : > { %v1206_v4 = vpop.permute.xlu1 %1205  ;;  %v1204_v21 = vpop.permute.xlu0 %1203 }
 0x1e9   : > { %1283 = vst.msk [vmem:[#allocation3 + $0x98] sm:$0xff] %vm1263_vm7, %v1206_v4  ;;  %1282 = vst.msk [vmem:[#allocation3 + $0x90] sm:$0xff] %vm1263_vm7, %v1204_v21 }
 0x1ea   : > { %1453 = vrot.lane.b32.xlu1 %v7389_v18, %s4691_s28  ;;  %1451 = vrot.lane.b32.xlu0 %v7386_v11, %s4691_s28 }
 0x1ec   : > { %v1210_v10 = vpop.permute.xlu1 %1209  ;;  %v1208_v39 = vpop.permute.xlu0 %1207 }
 0x1ed   : > { %1285 = vst.msk [vmem:[#allocation3 + $0xa8] sm:$0xff] %vm1263_vm7, %v1210_v10  ;;  %1284 = vst.msk [vmem:[#allocation3 + $0xa0] sm:$0xff] %vm1263_vm7, %v1208_v39  ;;  %v1563_v39 = vrot.slane %v297_v9, 2 }
 0x1ee   : > { %1583 = vrot.lane.b32.xlu1 %v7409_v59, %s4692_s29  ;;  %1455 = vrot.lane.b32.xlu0 %v7388_v17, %s4691_s28 }
 0x1f0   : > { %v1214_v63 = vpop.permute.xlu1 %1213  ;;  %v1212_v12 = vpop.permute.xlu0 %1211 }
 0x1f1   : > { %1287 = vst.msk [vmem:[#allocation3 + $0xb8] sm:$0xff] %vm1263_vm7, %v1214_v63  ;;  %1286 = vst.msk [vmem:[#allocation3 + $0xb0] sm:$0xff] %vm1263_vm7, %v1212_v12  ;;  %v1562_v63 = vrot.slane %v296_v25, 2  ;;  %v1565_v12 = vrot.slane %v298_v55, 2 }
 0x1f2   : > { %1587 = vrot.lane.b32.xlu1 %v7410_v14, %s4692_s29  ;;  %1585 = vrot.lane.b32.xlu0 %v5250_v54, %s4692_s29 }
 0x1f4   : > { %v1218_v11 = vpop.permute.xlu1 %1217  ;;  %v1216_v18 = vpop.permute.xlu0 %1215 }
 0x1f5   : > { %1289 = vst.msk [vmem:[#allocation3 + $0xc8] sm:$0xff] %vm1263_vm7, %v1218_v11  ;;  %1288 = vst.msk [vmem:[#allocation3 + $0xc0] sm:$0xff] %vm1263_vm7, %v1216_v18 }
 0x1f6   : > { %1457 = vrot.lane.b32.xlu1 %v7391_v23, %s4691_s28  ;;  %1589 = vrot.lane.b32.xlu0 %v5266_v46, %s4692_s29 }
 0x1f8   : > { %v1222_v17 = vpop.permute.xlu1 %1221  ;;  %v1220_v59 = vpop.permute.xlu0 %1219 }
 0x1f9   : > { %1291 = vst.msk [vmem:[#allocation3 + $0xd8] sm:$0xff] %vm1263_vm7, %v1222_v17  ;;  %1290 = vst.msk [vmem:[#allocation3 + $0xd0] sm:$0xff] %vm1263_vm7, %v1220_v59  ;;  %v7422_v17 = vld [vmem:[#allocation6_spill] sm:$0xff]  ;;  %v1566_v59 = vsel %vm686_vm0, %v1563_v39, %v1565_v12 }
 0x1fa   : > { %1461 = vrot.lane.b32.xlu1 %v7393_v27, %s4691_s28  ;;  %1459 = vrot.lane.b32.xlu0 %v7390_v22, %s4691_s28 }
 0x1fc   : > { %v1226_v54 = vpop.permute.xlu1 %1225  ;;  %v1224_v14 = vpop.permute.xlu0 %1223 }
 0x1fd   : > { %1293 = vst.msk [vmem:[#allocation3 + $0xe8] sm:$0xff] %vm1263_vm7, %v1226_v54  ;;  %1292 = vst.msk [vmem:[#allocation3 + $0xe0] sm:$0xff] %vm1263_vm7, %v1224_v14  ;;  %v1564_v54 = vsel %vm686_vm0, %v1562_v63, %v1563_v39 }
 0x1fe   : > { %1591 = vrot.lane.b32.xlu1 %v7411_v24, %s4692_s29  ;;  %1463 = vrot.lane.b32.xlu0 %v7392_v26, %s4691_s28 }
 0x200   : > { %v1230_v46 = vpop.permute.xlu1 %1229  ;;  %v1228_v23 = vpop.permute.xlu0 %1227 }
 0x201   : > { %1295 = vst.msk [vmem:[#allocation3 + $0xf8] sm:$0xff] %vm1263_vm7, %v1230_v46  ;;  %1294 = vst.msk [vmem:[#allocation3 + $0xf0] sm:$0xff] %vm1263_vm7, %v1228_v23 }
 0x202   : > { %1595 = vrot.lane.b32.xlu1 %v7412_v50, %s4692_s29  ;;  %1593 = vrot.lane.b32.xlu0 %v5279_v58, %s4692_s29 }
 0x204   : > { %v1301_v22 = vpop.permute.xlu1 %1300  ;;  %v1299_v27 = vpop.permute.xlu0 %1298 }
 0x205   : > { %1396 = vst.msk [vmem:[#allocation3 + $0x8] sm:$0xff] %vm1394_vm8, %v1301_v22  ;;  %1395 = vst.msk [vmem:[#allocation3] sm:$0xff] %vm1394_vm8, %v1299_v27 }
 0x206   : > { %1465 = vrot.lane.b32.xlu1 %v7395_v31, %s4691_s28  ;;  %1597 = vrot.lane.b32.xlu0 %v5296_v36, %s4692_s29 }
 0x208   : > { %v1305_v26 = vpop.permute.xlu1 %1304  ;;  %v1303_v24 = vpop.permute.xlu0 %1302 }
 0x209   : > { %1398 = vst.msk [vmem:[#allocation3 + $0x18] sm:$0xff] %vm1394_vm8, %v1305_v26  ;;  %1397 = vst.msk [vmem:[#allocation3 + $0x10] sm:$0xff] %vm1394_vm8, %v1303_v24 }
 0x20a   : > { %1469 = vrot.lane.b32.xlu1 %v7397_v38, %s4691_s28  ;;  %1467 = vrot.lane.b32.xlu0 %v7394_v30, %s4691_s28 }
 0x20c   : > { %v1309_v58 = vpop.permute.xlu1 %1308  ;;  %v1307_v50 = vpop.permute.xlu0 %1306 }
 0x20d   : > { %1400 = vst.msk [vmem:[#allocation3 + $0x28] sm:$0xff] %vm1394_vm8, %v1309_v58  ;;  %1399 = vst.msk [vmem:[#allocation3 + $0x20] sm:$0xff] %vm1394_vm8, %v1307_v50 }
 0x20e   : > { %1599 = vrot.lane.b32.xlu1 %v7413_v41, %s4692_s29  ;;  %1471 = vrot.lane.b32.xlu0 %v7396_v35, %s4691_s28 }
 0x210   : > { %v1313_v36 = vpop.permute.xlu1 %1312  ;;  %v1311_v31 = vpop.permute.xlu0 %1310 }
 0x211   : > { %1402 = vst.msk [vmem:[#allocation3 + $0x38] sm:$0xff] %vm1394_vm8, %v1313_v36  ;;  %1401 = vst.msk [vmem:[#allocation3 + $0x30] sm:$0xff] %vm1394_vm8, %v1311_v31 }
 0x212   : > { %1603 = vrot.lane.b32.xlu1 %v7414_v53, %s4692_s29  ;;  %1601 = vrot.lane.b32.xlu0 %v5309_v57, %s4692_s29 }
 0x214   : > { %v1317_v30 = vpop.permute.xlu1 %1316  ;;  %v1315_v38 = vpop.permute.xlu0 %1314 }
 0x215   : > { %1404 = vst.msk [vmem:[#allocation3 + $0x48] sm:$0xff] %vm1394_vm8, %v1317_v30  ;;  %1403 = vst.msk [vmem:[#allocation3 + $0x40] sm:$0xff] %vm1394_vm8, %v1315_v38 }
 0x216   : > { %1473 = vrot.lane.b32.xlu1 %v7399_v47, %s4691_s28  ;;  %1605 = vrot.lane.b32.xlu0 %v5326_v52, %s4692_s29 }
 0x218   : > { %v1321_v35 = vpop.permute.xlu1 %1320  ;;  %v1319_v41 = vpop.permute.xlu0 %1318 }
 0x219   : > { %1406 = vst.msk [vmem:[#allocation3 + $0x58] sm:$0xff] %vm1394_vm8, %v1321_v35  ;;  %1405 = vst.msk [vmem:[#allocation3 + $0x50] sm:$0xff] %vm1394_vm8, %v1319_v41 }
 0x21a   : > { %1477 = vrot.lane.b32.xlu1 %v7400_v0, %s4691_s28  ;;  %1475 = vrot.lane.b32.xlu0 %v7398_v37, %s4691_s28 }
 0x21c   : > { %v1325_v57 = vpop.permute.xlu1 %1324  ;;  %v1323_v53 = vpop.permute.xlu0 %1322 }
 0x21d   : > { %1408 = vst.msk [vmem:[#allocation3 + $0x68] sm:$0xff] %vm1394_vm8, %v1325_v57  ;;  %1407 = vst.msk [vmem:[#allocation3 + $0x60] sm:$0xff] %vm1394_vm8, %v1323_v53 }
 0x21e   : > { %1607 = vrot.lane.b32.xlu1 %v7415_v34, %s4692_s29  ;;  %1479 = vrot.lane.b32.xlu0 %v5122_v6, %s4691_s28  ;;  %v4675_v34 = vld [vmem:[%s4741_s20 + $0x170] sm:$0xff]  ;;  %s4698_s20 = smov 32  }
 0x220   : > { %v1329_v52 = vpop.permute.xlu1 %1328  ;;  %v1327_v47 = vpop.permute.xlu0 %1326 }
 0x221   : > { %1410 = vst.msk [vmem:[#allocation3 + $0x78] sm:$0xff] %vm1394_vm8, %v1329_v52  ;;  %1409 = vst.msk [vmem:[#allocation3 + $0x70] sm:$0xff] %vm1394_vm8, %v1327_v47 }
 0x222   : > { %1611 = vrot.lane.b32.xlu1 %v5359_v44, %s4692_s29  ;;  %1609 = vrot.lane.b32.xlu0 %v5339_v51, %s4692_s29 }
 0x224   : > { %v1333_v37 = vpop.permute.xlu1 %1332  ;;  %v1331_v0 = vpop.permute.xlu0 %1330 }
 0x225   : > { %1412 = vst.msk [vmem:[#allocation3 + $0x88] sm:$0xff] %vm1394_vm8, %v1333_v37  ;;  %1411 = vst.msk [vmem:[#allocation3 + $0x80] sm:$0xff] %vm1394_vm8, %v1331_v0 }
 0x226   : > { %1352 = vrot.lane.b32.xlu1 %v4675_v34, %s4690_s27  ;;  %1613 = vrot.lane.b32.xlu0 %v5356_v43, %s4692_s29  ;;  %v7417_v43 = vld [vmem:[#allocation24_spill] sm:$0xff] }
 0x228   : > { %v1337_v6 = vpop.permute.xlu1 %1336  ;;  %v1335_v29 = vpop.permute.xlu0 %1334 }
 0x229   : > { %1414 = vst.msk [vmem:[#allocation3 + $0x98] sm:$0xff] %vm1394_vm8, %v1337_v6  ;;  %1413 = vst.msk [vmem:[#allocation3 + $0x90] sm:$0xff] %vm1394_vm8, %v1335_v29 }
 0x22a   : > { %1483 = vrot.lane.b32.xlu1 %v5141_v48, %s4691_s28  ;;  %1481 = vrot.lane.b32.xlu0 %v5138_v45, %s4691_s28 }
 0x22c   : > { %v1341_v51 = vpop.permute.xlu1 %1340  ;;  %v1339_v44 = vpop.permute.xlu0 %1338 }
 0x22d   : > { %1416 = vst.msk [vmem:[#allocation3 + $0xa8] sm:$0xff] %vm1394_vm8, %v1341_v51  ;;  %1415 = vst.msk [vmem:[#allocation3 + $0xa0] sm:$0xff] %vm1394_vm8, %v1339_v44 }
 0x22e   : > { %1487 = vrot.lane.b32.xlu1 %v7417_v43, %s4691_s28  ;;  %1485 = vrot.lane.b32.xlu0 %v7418_v33, %s4691_s28 }
 0x230   : > { %v1345_v20 = vpop.permute.xlu1 %1344  ;;  %v1343_v13 = vpop.permute.xlu0 %1342 }
 0x231   : > { %1418 = vst.msk [vmem:[#allocation3 + $0xb8] sm:$0xff] %vm1394_vm8, %v1345_v20  ;;  %1417 = vst.msk [vmem:[#allocation3 + $0xb0] sm:$0xff] %vm1394_vm8, %v1343_v13 }
 0x232   : > { %1617 = vrot.lane.b32.xlu1 %v5369_v42, %s4692_s29  ;;  %1615 = vrot.lane.b32.xlu0 %v5372_v3, %s4692_s29  ;;  %v4638_v3 = vld [vmem:[%s7273_s1 + $0x10] ss:$0 sps:$4 sm:$0x33]  }
 0x233   : > { %4608 = vmatprep.subr.msk.bf16.mxu0 %vm1861_vm10, %v4638_v3 }
 0x234   : > { %v1349_v45 = vpop.permute.xlu1 %1348  ;;  %v1347_v48 = vpop.permute.xlu0 %1346 }
 0x235   : > { %1420 = vst.msk [vmem:[#allocation3 + $0xc8] sm:$0xff] %vm1394_vm8, %v1349_v45  ;;  %1419 = vst.msk [vmem:[#allocation3 + $0xc0] sm:$0xff] %vm1394_vm8, %v1347_v48 }
 0x236   : > { %1621 = vrot.lane.b32.xlu1 %v5384_v15, %s4692_s29  ;;  %1619 = vrot.lane.b32.xlu0 %v5387_v40, %s4692_s29  ;;  %v7419_v15 = vld [vmem:[#allocation37_spill] sm:$0xff]  ;;  %v1863_v40 = vsel %vm1861_vm10, %v4638_v3, 0 }
 0x237   : > { %4511 = vmatpush3.bf16.msra.mxu0 %v1863_v40 }
 0x238   : > { %v1434_v42 = vpop.permute.xlu1 %1433  ;;  %v1351_v7 = vpop.permute.xlu0 %1350  ;;  %4512 = vmatprep.subr.bf16.mxu0 %v4639_v49 }
 0x239   : > { %1530 = vst.msk [vmem:[#allocation3] sm:$0xff] %vm1529_vm9, %v1434_v42 }
 0x23a   : > { %1421 = vst.msk [vmem:[#allocation3 + $0xd0] sm:$0xff] %vm1394_vm8, %v1351_v7  ;;  %1356 = vrot.lane.b32.xlu1 %v5486_v32, %s4690_s27  ;;  %1354 = vrot.lane.b32.xlu0 %v7419_v15, %s4690_s27  ;;  %v1429_v32 = vrot.slane %v297_v9, 1 }
 0x23b   : > { %4513 = vmatpush3.bf16.msra.mxu0 %v4639_v49 }
 0x23c   : > { %v1438_v56 = vpop.permute.xlu1 %1437  ;;  %v1436_v28 = vpop.permute.xlu0 %1435  ;;  %v1432_v5 = vsel %vm476_vm1, %v1429_v32, %v1431_v8  ;;  %v1430_v4 = vsel %vm476_vm1, %v1428_v61, %v1429_v32  ;;  %4514 = vmatprep.subr.bf16.mxu0 %v4640_v60 }
 0x23d   : > { %1532 = vst.msk [vmem:[#allocation3 + $0x10] sm:$0xff] %vm1529_vm9, %v1438_v56  ;;  %1531 = vst.msk [vmem:[#allocation3 + $0x8] sm:$0xff] %vm1529_vm9, %v1436_v28 }
 0x23e   : > { %1360 = vrot.lane.b32.xlu1 %v297_v9, %s4690_s27  ;;  %1358 = vrot.lane.b32.xlu0 %v296_v25, %s4690_s27 }
 0x23f   : > { %4515 = vmatpush3.bf16.msra.mxu0 %v4640_v60 }
 0x240   : > { %v1568_v19 = vpop.permute.xlu1 %1567  ;;  %v1440_v1 = vpop.permute.xlu0 %1439 }
 0x241   : > { %1664 = vst.msk [vmem:[#allocation3] sm:$0xff] %vm1663_vm11, %v1568_v19 }
 0x242   : > { %1533 = vst.msk [vmem:[#allocation3 + $0x18] sm:$0xff] %vm1529_vm9, %v1440_v1  ;;  %1491 = vrot.lane.b32.xlu1 %v7420_v62, %s4691_s28  ;;  %1489 = vrot.lane.b32.xlu0 %v7421_v16, %s4691_s28 }
 0x244   : > { %v1572_v21 = vpop.permute.xlu1 %1571  ;;  %v1570_v10 = vpop.permute.xlu0 %1569 }
 0x245   : > { %1666 = vst.msk [vmem:[#allocation3 + $0x10] sm:$0xff] %vm1663_vm11, %v1572_v21  ;;  %1665 = vst.msk [vmem:[#allocation3 + $0x8] sm:$0xff] %vm1663_vm11, %v1570_v10 }
 0x246   : > { %1495 = vrot.lane.b32.xlu1 %v1432_v5, %s4691_s28  ;;  %1493 = vrot.lane.b32.xlu0 %v1430_v4, %s4691_s28  ;;  %s4700_s28 = smov 48  }
 0x248   : > { %v1442_v11 = vpop.permute.xlu1 %1441  ;;  %v1574_v18 = vpop.permute.xlu0 %1573  ;;  %v1696_v22 = vld [vmem:[#allocation3] sm:$0xff] }
 0x249   : > { %1534 = vst.msk [vmem:[#allocation3 + $0x20] sm:$0xff] %vm1529_vm9, %v1442_v11 }
 0x24a   : > { %1667 = vst.msk [vmem:[#allocation3 + $0x18] sm:$0xff] %vm1663_vm11, %v1574_v18  ;;  %1625 = vrot.lane.b32.xlu1 %v5699_v2, %s4692_s29  ;;  %1623 = vrot.lane.b32.xlu0 %v7422_v17, %s4692_s29 }
 0x24c   : > { %v1446_v14 = vpop.permute.xlu1 %1445  ;;  %v1444_v46 = vpop.permute.xlu0 %1443  ;;  %v1697_v23 = vld [vmem:[#allocation3 + $0x8] sm:$0xff]  ;;  %v1698_v24 = vld [vmem:[#allocation3 + $0x10] sm:$0xff] }
 0x24d   : > { %1536 = vst.msk [vmem:[#allocation3 + $0x30] sm:$0xff] %vm1529_vm9, %v1446_v14  ;;  %1535 = vst.msk [vmem:[#allocation3 + $0x28] sm:$0xff] %vm1529_vm9, %v1444_v46  ;;  %v1728_v26 = vpack.c.bf16 %v1697_v23, %v1696_v22 }
 0x24e   : > { %1629 = vrot.lane.b32.xlu1 %v1566_v59, %s4692_s29  ;;  %1627 = vrot.lane.b32.xlu0 %v1564_v54, %s4692_s29 }
 0x250   : > { %v1576_v2 = vpop.permute.xlu1 %1575  ;;  %v1448_v27 = vpop.permute.xlu0 %1447 }
 0x251   : > { %v1699_v58 = vld [vmem:[#allocation3 + $0x18] sm:$0xff]  ;;  %1668 = vst.msk [vmem:[#allocation3 + $0x20] sm:$0xff] %vm1663_vm11, %v1576_v2 }
 0x252   : > { %1537 = vst.msk [vmem:[#allocation3 + $0x38] sm:$0xff] %vm1529_vm9, %v1448_v27  ;;  %v1729_v50 = vpack.c.bf16 %v1699_v58, %v1698_v24  ;;  %1765 = vrot.lane.b32.xlu0 %v1728_v26, %s4693_s10 }
 0x254   : > { %1767 = vrot.lane.b32.xlu1 %v1729_v50, %s4693_s10  ;;  %v1580_v36 = vpop.permute.xlu1 %1579  ;;  %v1578_v31 = vpop.permute.xlu0 %1577 }
 0x255   : > { %1670 = vst.msk [vmem:[#allocation3 + $0x30] sm:$0xff] %vm1663_vm11, %v1580_v36  ;;  %1669 = vst.msk [vmem:[#allocation3 + $0x28] sm:$0xff] %vm1663_vm11, %v1578_v31 }
 0x258   : > { %v1450_v30 = vpop.permute.xlu1 %1449  ;;  %v1582_v38 = vpop.permute.xlu0 %1581  ;;  %v1700_v57 = vld [vmem:[#allocation3 + $0x20] sm:$0xff] }
 0x259   : > { %1538 = vst.msk [vmem:[#allocation3 + $0x40] sm:$0xff] %vm1529_vm9, %v1450_v30 }
 0x25a   : > { %1671 = vst.msk [vmem:[#allocation3 + $0x38] sm:$0xff] %vm1663_vm11, %v1582_v38 }
 0x25c   : > { %v1454_v35 = vpop.permute.xlu1 %1453  ;;  %v1452_v41 = vpop.permute.xlu0 %1451  ;;  %v1701_v53 = vld [vmem:[#allocation3 + $0x28] sm:$0xff]  ;;  %v1702_v0 = vld [vmem:[#allocation3 + $0x30] sm:$0xff] }
 0x25d   : > { %1540 = vst.msk [vmem:[#allocation3 + $0x50] sm:$0xff] %vm1529_vm9, %v1454_v35  ;;  %1539 = vst.msk [vmem:[#allocation3 + $0x48] sm:$0xff] %vm1529_vm9, %v1452_v41  ;;  %v1730_v52 = vpack.c.bf16 %v1701_v53, %v1700_v57 }
 0x25f   : > { %1769 = vrot.lane.b32.xlu0 %v1730_v52, %s4693_s10 }
 0x260   : > { %v1584_v47 = vpop.permute.xlu1 %1583  ;;  %v1456_v37 = vpop.permute.xlu0 %1455 }
 0x261   : > { %v1703_v34 = vld [vmem:[#allocation3 + $0x38] sm:$0xff]  ;;  %1672 = vst.msk [vmem:[#allocation3 + $0x40] sm:$0xff] %vm1663_vm11, %v1584_v47 }
 0x262   : > { %1541 = vst.msk [vmem:[#allocation3 + $0x58] sm:$0xff] %vm1529_vm9, %v1456_v37  ;;  %v1731_v6 = vpack.c.bf16 %v1703_v34, %v1702_v0 }
 0x264   : > { %1771 = vrot.lane.b32.xlu1 %v1731_v6, %s4693_s10  ;;  %v1588_v29 = vpop.permute.xlu1 %1587  ;;  %v1586_v51 = vpop.permute.xlu0 %1585 }
 0x265   : > { %1674 = vst.msk [vmem:[#allocation3 + $0x50] sm:$0xff] %vm1663_vm11, %v1588_v29  ;;  %1673 = vst.msk [vmem:[#allocation3 + $0x48] sm:$0xff] %vm1663_vm11, %v1586_v51 }
 0x268   : > { %v1458_v44 = vpop.permute.xlu1 %1457  ;;  %v1590_v43 = vpop.permute.xlu0 %1589  ;;  %v1704_v13 = vld [vmem:[#allocation3 + $0x40] sm:$0xff] }
 0x269   : > { %1542 = vst.msk [vmem:[#allocation3 + $0x60] sm:$0xff] %vm1529_vm9, %v1458_v44 }
 0x26a   : > { %1675 = vst.msk [vmem:[#allocation3 + $0x58] sm:$0xff] %vm1663_vm11, %v1590_v43 }
 0x26c   : > { %v1462_v33 = vpop.permute.xlu1 %1461  ;;  %v1460_v20 = vpop.permute.xlu0 %1459  ;;  %v1705_v45 = vld [vmem:[#allocation3 + $0x48] sm:$0xff]  ;;  %v1706_v3 = vld [vmem:[#allocation3 + $0x50] sm:$0xff] }
 0x26d   : > { %1544 = vst.msk [vmem:[#allocation3 + $0x70] sm:$0xff] %vm1529_vm9, %v1462_v33  ;;  %1543 = vst.msk [vmem:[#allocation3 + $0x68] sm:$0xff] %vm1529_vm9, %v1460_v20  ;;  %v1732_v48 = vpack.c.bf16 %v1705_v45, %v1704_v13 }
 0x26f   : > { %1773 = vrot.lane.b32.xlu0 %v1732_v48, %s4693_s10 }
 0x270   : > { %v1592_v42 = vpop.permute.xlu1 %1591  ;;  %v1464_v7 = vpop.permute.xlu0 %1463 }
 0x271   : > { %v1707_v15 = vld [vmem:[#allocation3 + $0x58] sm:$0xff]  ;;  %1676 = vst.msk [vmem:[#allocation3 + $0x60] sm:$0xff] %vm1663_vm11, %v1592_v42 }
 0x272   : > { %1545 = vst.msk [vmem:[#allocation3 + $0x78] sm:$0xff] %vm1529_vm9, %v1464_v7  ;;  %v1733_v40 = vpack.c.bf16 %v1707_v15, %v1706_v3 }
 0x274   : > { %1775 = vrot.lane.b32.xlu1 %v1733_v40, %s4693_s10  ;;  %v1596_v9 = vpop.permute.xlu1 %1595  ;;  %v1594_v25 = vpop.permute.xlu0 %1593 }
 0x275   : > { %1678 = vst.msk [vmem:[#allocation3 + $0x70] sm:$0xff] %vm1663_vm11, %v1596_v9  ;;  %1677 = vst.msk [vmem:[#allocation3 + $0x68] sm:$0xff] %vm1663_vm11, %v1594_v25 }
 0x278   : > { %v1466_v56 = vpop.permute.xlu1 %1465  ;;  %v1598_v28 = vpop.permute.xlu0 %1597  ;;  %v1708_v32 = vld [vmem:[#allocation3 + $0x60] sm:$0xff] }
 0x279   : > { %1546 = vst.msk [vmem:[#allocation3 + $0x80] sm:$0xff] %vm1529_vm9, %v1466_v56 }
 0x27a   : > { %1679 = vst.msk [vmem:[#allocation3 + $0x78] sm:$0xff] %vm1663_vm11, %v1598_v28 }
 0x27c   : > { %v1470_v55 = vpop.permute.xlu1 %1469  ;;  %v1468_v49 = vpop.permute.xlu0 %1467  ;;  %v1709_v61 = vld [vmem:[#allocation3 + $0x68] sm:$0xff]  ;;  %v1710_v60 = vld [vmem:[#allocation3 + $0x70] sm:$0xff] }
 0x27d   : > { %1548 = vst.msk [vmem:[#allocation3 + $0x90] sm:$0xff] %vm1529_vm9, %v1470_v55  ;;  %1547 = vst.msk [vmem:[#allocation3 + $0x88] sm:$0xff] %vm1529_vm9, %v1468_v49  ;;  %v1734_v8 = vpack.c.bf16 %v1709_v61, %v1708_v32 }
 0x27f   : > { %1777 = vrot.lane.b32.xlu0 %v1734_v8, %s4693_s10 }
 0x280   : > { %v1600_v19 = vpop.permute.xlu1 %1599  ;;  %v1472_v1 = vpop.permute.xlu0 %1471 }
 0x281   : > { %v1711_v62 = vld [vmem:[#allocation3 + $0x78] sm:$0xff]  ;;  %1680 = vst.msk [vmem:[#allocation3 + $0x80] sm:$0xff] %vm1663_vm11, %v1600_v19 }
 0x282   : > { %1549 = vst.msk [vmem:[#allocation3 + $0x98] sm:$0xff] %vm1529_vm9, %v1472_v1  ;;  %v1735_v16 = vpack.c.bf16 %v1711_v62, %v1710_v60 }
 0x284   : > { %1779 = vrot.lane.b32.xlu1 %v1735_v16, %s4693_s10  ;;  %v1604_v5 = vpop.permute.xlu1 %1603  ;;  %v1602_v4 = vpop.permute.xlu0 %1601 }
 0x285   : > { %1682 = vst.msk [vmem:[#allocation3 + $0x90] sm:$0xff] %vm1663_vm11, %v1604_v5  ;;  %1681 = vst.msk [vmem:[#allocation3 + $0x88] sm:$0xff] %vm1663_vm11, %v1602_v4 }
 0x288   : > { %v1474_v21 = vpop.permute.xlu1 %1473  ;;  %v1606_v10 = vpop.permute.xlu0 %1605  ;;  %v1712_v12 = vld [vmem:[#allocation3 + $0x80] sm:$0xff] }
 0x289   : > { %1550 = vst.msk [vmem:[#allocation3 + $0xa0] sm:$0xff] %vm1529_vm9, %v1474_v21  ;;  %v4694_v21 = vmov 0.0  }
 0x28a   : > { %1683 = vst.msk [vmem:[#allocation3 + $0x98] sm:$0xff] %vm1663_vm11, %v1606_v10 }
 0x28b   : > { %200 = vst.msk [vmem:[#allocation2] sm:$0xff] %vm199_vm13, %v4694_v21  ;;  %201 = vst.msk [vmem:[#allocation2 + $0x8] sm:$0xff] %vm199_vm13, %v4694_v21 }
 0x28c   : > { %v1478_v39 = vpop.permute.xlu1 %1477  ;;  %v1476_v63 = vpop.permute.xlu0 %1475  ;;  %v1713_v11 = vld [vmem:[#allocation3 + $0x88] sm:$0xff]  ;;  %v1714_v54 = vld [vmem:[#allocation3 + $0x90] sm:$0xff]  ;;  %205 = vst.msk [vmem:[#allocation2 + $0x198] sm:$0xff] %vm199_vm13, %v4694_v21  ;;  %206 = vst.msk [vmem:[#allocation2 + $0x1a0] sm:$0xff] %vm199_vm13, %v4694_v21 }
 0x28d   : > { %1552 = vst.msk [vmem:[#allocation3 + $0xb0] sm:$0xff] %vm1529_vm9, %v1478_v39  ;;  %1551 = vst.msk [vmem:[#allocation3 + $0xa8] sm:$0xff] %vm1529_vm9, %v1476_v63  ;;  %v1736_v18 = vpack.c.bf16 %v1713_v11, %v1712_v12 }
 0x28e   : > { %209 = vst.msk [vmem:[#allocation2] sm:$0x1] %vm208_vm14, %v4694_v21  ;;  %210 = vst.msk [vmem:[#allocation2 + $0x18] sm:$0x1] %vm208_vm14, %v4694_v21 }
 0x28f   : > { %1781 = vrot.lane.b32.xlu0 %v1736_v18, %s4693_s10  ;;  %211 = vst.msk [vmem:[#allocation2 + $0x30] sm:$0x1] %vm208_vm14, %v4694_v21  ;;  %212 = vst.msk [vmem:[#allocation2 + $0x48] sm:$0x1] %vm208_vm14, %v4694_v21 }
 0x290   : > { %v1608_v17 = vpop.permute.xlu1 %1607  ;;  %v1480_v59 = vpop.permute.xlu0 %1479  ;;  %213 = vst.msk [vmem:[#allocation2 + $0x60] sm:$0x1] %vm208_vm14, %v4694_v21  ;;  %214 = vst.msk [vmem:[#allocation2 + $0x78] sm:$0x1] %vm208_vm14, %v4694_v21 }
 0x291   : > { %v1715_v14 = vld [vmem:[#allocation3 + $0x98] sm:$0xff]  ;;  %1684 = vst.msk [vmem:[#allocation3 + $0xa0] sm:$0xff] %vm1663_vm11, %v1608_v17 }
 0x292   : > { %1553 = vst.msk [vmem:[#allocation3 + $0xb8] sm:$0xff] %vm1529_vm9, %v1480_v59  ;;  %v1737_v46 = vpack.c.bf16 %v1715_v14, %v1714_v54  ;;  %v2293_v39 = vld [vmem:[#allocation2 + $0x1] sm:$0xff]  ;;  %v6143_v54 = vld [vmem:[%s7275_s3] ss:$0 sm:$0xff] }
 0x293   : > { %215 = vst.msk [vmem:[#allocation2 + $0x90] sm:$0x1] %vm208_vm14, %v4694_v21  ;;  %216 = vst.msk [vmem:[#allocation2 + $0xa8] sm:$0x1] %vm208_vm14, %v4694_v21 }
 0x294   : > { %1783 = vrot.lane.b32.xlu1 %v1737_v46, %s4693_s10  ;;  %v1612_v23 = vpop.permute.xlu1 %1611  ;;  %v1610_v22 = vpop.permute.xlu0 %1609  ;;  %217 = vst.msk [vmem:[#allocation2 + $0xc0] sm:$0x1] %vm208_vm14, %v4694_v21  ;;  %218 = vst.msk [vmem:[#allocation2 + $0xd8] sm:$0x1] %vm208_vm14, %v4694_v21  ;;  %v6148_v46 = vld [vmem:[%s7275_s3 + $0x1] ss:$0 sm:$0xff] }
 0x295   : > { %1686 = vst.msk [vmem:[#allocation3 + $0xb0] sm:$0xff] %vm1663_vm11, %v1612_v23  ;;  %1685 = vst.msk [vmem:[#allocation3 + $0xa8] sm:$0xff] %vm1663_vm11, %v1610_v22 }
 0x296   : > { %219 = vst.msk [vmem:[#allocation2 + $0xf0] sm:$0x1] %vm208_vm14, %v4694_v21  ;;  %220 = vst.msk [vmem:[#allocation2 + $0x108] sm:$0x1] %vm208_vm14, %v4694_v21 }
 0x297   : > { %221 = vst.msk [vmem:[#allocation2 + $0x120] sm:$0x1] %vm208_vm14, %v4694_v21  ;;  %222 = vst.msk [vmem:[#allocation2 + $0x138] sm:$0x1] %vm208_vm14, %v4694_v21 }
 0x298   : > { %v1353_v2 = vpop.permute.xlu1 %1352  ;;  %v1614_v27 = vpop.permute.xlu0 %1613  ;;  %v1716_v58 = vld [vmem:[#allocation3 + $0xa0] sm:$0xff]  ;;  %223 = vst.msk [vmem:[#allocation2 + $0x150] sm:$0x1] %vm208_vm14, %v4694_v21  ;;  %224 = vst.msk [vmem:[#allocation2 + $0x168] sm:$0x1] %vm208_vm14, %v4694_v21 }
 0x299   : > { %1422 = vst.msk [vmem:[#allocation3 + $0xd8] sm:$0xff] %vm1394_vm8, %v1353_v2 }
 0x29a   : > { %1687 = vst.msk [vmem:[#allocation3 + $0xb8] sm:$0xff] %vm1663_vm11, %v1614_v27 }
 0x29b   : > { %225 = vst.msk [vmem:[#allocation2 + $0x180] sm:$0x1] %vm208_vm14, %v4694_v21  ;;  %228 = vst.msk [vmem:[#allocation2 + $0x29] sm:$0x1] %vm208_vm14, %v4694_v21 }
 0x29c   : > { %v1484_v26 = vpop.permute.xlu1 %1483  ;;  %v1482_v24 = vpop.permute.xlu0 %1481  ;;  %v1717_v50 = vld [vmem:[#allocation3 + $0xa8] sm:$0xff]  ;;  %v1718_v38 = vld [vmem:[#allocation3 + $0xb0] sm:$0xff]  ;;  %229 = vst.msk [vmem:[#allocation2 + $0x41] sm:$0x1] %vm208_vm14, %v4694_v21  ;;  %230 = vst.msk [vmem:[#allocation2 + $0x59] sm:$0x1] %vm208_vm14, %v4694_v21 }
 0x29d   : > { %1555 = vst.msk [vmem:[#allocation3 + $0xc8] sm:$0xff] %vm1529_vm9, %v1484_v26  ;;  %1554 = vst.msk [vmem:[#allocation3 + $0xc0] sm:$0xff] %vm1529_vm9, %v1482_v24  ;;  %v1738_v36 = vpack.c.bf16 %v1717_v50, %v1716_v58 }
 0x29e   : > { %231 = vst.msk [vmem:[#allocation2 + $0x71] sm:$0x1] %vm208_vm14, %v4694_v21  ;;  %232 = vst.msk [vmem:[#allocation2 + $0x89] sm:$0x1] %vm208_vm14, %v4694_v21 }
 0x29f   : > { %1785 = vrot.lane.b32.xlu0 %v1738_v36, %s4693_s10  ;;  %233 = vst.msk [vmem:[#allocation2 + $0xa1] sm:$0x1] %vm208_vm14, %v4694_v21  ;;  %234 = vst.msk [vmem:[#allocation2 + $0xb9] sm:$0x1] %vm208_vm14, %v4694_v21 }
 0x2a0   : > { %v1488_v31 = vpop.permute.xlu1 %1487  ;;  %v1486_v30 = vpop.permute.xlu0 %1485  ;;  %235 = vst.msk [vmem:[#allocation2 + $0xd1] sm:$0x1] %vm208_vm14, %v4694_v21  ;;  %236 = vst.msk [vmem:[#allocation2 + $0xe9] sm:$0x1] %vm208_vm14, %v4694_v21 }
 0x2a1   : > { %v1719_v35 = vld [vmem:[#allocation3 + $0xb8] sm:$0xff]  ;;  %1557 = vst.msk [vmem:[#allocation3 + $0xd8] sm:$0xff] %vm1529_vm9, %v1488_v31  ;;  %1556 = vst.msk [vmem:[#allocation3 + $0xd0] sm:$0xff] %vm1529_vm9, %v1486_v30 }
 0x2a2   : > { %v1739_v41 = vpack.c.bf16 %v1719_v35, %v1718_v38  ;;  %237 = vst.msk [vmem:[#allocation2 + $0x101] sm:$0x1] %vm208_vm14, %v4694_v21  ;;  %238 = vst.msk [vmem:[#allocation2 + $0x119] sm:$0x1] %vm208_vm14, %v4694_v21  ;;  %v2229_v35 = vld [vmem:[#allocation2] sm:$0xff] }
 0x2a3   : > { %239 = vst.msk [vmem:[#allocation2 + $0x131] sm:$0x1] %vm208_vm14, %v4694_v21  ;;  %240 = vst.msk [vmem:[#allocation2 + $0x149] sm:$0x1] %vm208_vm14, %v4694_v21 }
 0x2a4   : > { %1787 = vrot.lane.b32.xlu1 %v1739_v41, %s4693_s10  ;;  %v1618_v57 = vpop.permute.xlu1 %1617  ;;  %v1616_v53 = vpop.permute.xlu0 %1615  ;;  %241 = vst.msk [vmem:[#allocation2 + $0x161] sm:$0x1] %vm208_vm14, %v4694_v21  ;;  %242 = vst.msk [vmem:[#allocation2 + $0x179] sm:$0x1] %vm208_vm14, %v4694_v21  ;;  %v2230_v41 = vld [vmem:[#allocation2 + $0x8] sm:$0xff] }
 0x2a5   : > { %1689 = vst.msk [vmem:[#allocation3 + $0xc8] sm:$0xff] %vm1663_vm11, %v1618_v57  ;;  %1688 = vst.msk [vmem:[#allocation3 + $0xc0] sm:$0xff] %vm1663_vm11, %v1616_v53 }
 0x2a6   : > { %243 = vst.msk [vmem:[#allocation2 + $0x191] sm:$0x1] %vm208_vm14, %v4694_v21  ;;  %226 = vst.msk [vmem:[#allocation2 + $0x198] sm:$0x1] %vm208_vm14, %v4694_v21 }
 0x2a7   : > { %203 = vst.msk [vmem:[#allocation2 + $0x10] sm:$0x3] %vm202_vm15, %v4694_v21  ;;  %207 = vst.msk [vmem:[#allocation2 + $0x1a8] sm:$0x3] %vm202_vm15, %v4694_v21 }
 0x2a8   : > { %v1622_v52 = vpop.permute.xlu1 %1621  ;;  %v1620_v47 = vpop.permute.xlu0 %1619  ;;  %227 = vst.msk [vmem:[#allocation2 + $0x11] sm:$0x1] %vm208_vm14, %v4694_v21  ;;  %244 = vst.msk [vmem:[#allocation2 + $0x1a9] sm:$0x1] %vm208_vm14, %v4694_v21 }
 0x2a9   : > { %1691 = vst.msk [vmem:[#allocation3 + $0xd8] sm:$0xff] %vm1663_vm11, %v1622_v52  ;;  %1690 = vst.msk [vmem:[#allocation3 + $0xd0] sm:$0xff] %vm1663_vm11, %v1620_v47 }
 0x2aa   : > { %2261 = vst.msk [vmem:[#allocation3] sm:$0xff] %vm199_vm13, %v2229_v35  ;;  %2262 = vst.msk [vmem:[#allocation3 + $0x8] sm:$0xff] %vm199_vm13, %v2230_v41 }
 0x2ac   : > { %v1357_v37 = vpop.permute.xlu1 %1356  ;;  %v1355_v0 = vpop.permute.xlu0 %1354  ;;  %v1720_v34 = vld [vmem:[#allocation3 + $0xc0] sm:$0xff]  ;;  %v1721_v6 = vld [vmem:[#allocation3 + $0xc8] sm:$0xff] }
 0x2ad   : > { %1424 = vst.msk [vmem:[#allocation3 + $0xe8] sm:$0xff] %vm1394_vm8, %v1357_v37  ;;  %1423 = vst.msk [vmem:[#allocation3 + $0xe0] sm:$0xff] %vm1394_vm8, %v1355_v0  ;;  %v1740_v29 = vpack.c.bf16 %v1721_v6, %v1720_v34 }
 0x2ae   : > { %v2294_v12 = vld [vmem:[#allocation2 + $0x9] sm:$0xff] }
 0x2af   : > { %1789 = vrot.lane.b32.xlu0 %v1740_v29, %s4693_s10 }
 0x2b0   : > { %v1361_v51 = vpop.permute.xlu1 %1360  ;;  %v1359_v44 = vpop.permute.xlu0 %1358  ;;  %v1722_v43 = vld [vmem:[#allocation3 + $0xd0] sm:$0xff]  ;;  %v1723_v33 = vld [vmem:[#allocation3 + $0xd8] sm:$0xff] }
 0x2b1   : > { %1426 = vst.msk [vmem:[#allocation3 + $0xf8] sm:$0xff] %vm1394_vm8, %v1361_v51  ;;  %1425 = vst.msk [vmem:[#allocation3 + $0xf0] sm:$0xff] %vm1394_vm8, %v1359_v44  ;;  %v1741_v20 = vpack.c.bf16 %v1723_v33, %v1722_v43 }
 0x2b3   : > { %1791 = vrot.lane.b32.xlu1 %v1741_v20, %s4693_s10 }
 0x2b4   : > { %v1492_v13 = vpop.permute.xlu1 %1491  ;;  %v1490_v45 = vpop.permute.xlu0 %1489 }
 0x2b5   : > { %1559 = vst.msk [vmem:[#allocation3 + $0xe8] sm:$0xff] %vm1529_vm9, %v1492_v13  ;;  %1558 = vst.msk [vmem:[#allocation3 + $0xe0] sm:$0xff] %vm1529_vm9, %v1490_v45 }
 0x2b8   : > { %v1496_v48 = vpop.permute.xlu1 %1495  ;;  %v1494_v42 = vpop.permute.xlu0 %1493 }
 0x2b9   : > { %1561 = vst.msk [vmem:[#allocation3 + $0xf8] sm:$0xff] %vm1529_vm9, %v1496_v48  ;;  %1560 = vst.msk [vmem:[#allocation3 + $0xf0] sm:$0xff] %vm1529_vm9, %v1494_v42 }
 0x2bc   : > { %v1626_v7 = vpop.permute.xlu1 %1625  ;;  %v1624_v3 = vpop.permute.xlu0 %1623 }
 0x2bd   : > { %1693 = vst.msk [vmem:[#allocation3 + $0xe8] sm:$0xff] %vm1663_vm11, %v1626_v7  ;;  %1692 = vst.msk [vmem:[#allocation3 + $0xe0] sm:$0xff] %vm1663_vm11, %v1624_v3 }
 0x2c0   : > { %v1630_v15 = vpop.permute.xlu1 %1629  ;;  %v1628_v40 = vpop.permute.xlu0 %1627 }
 0x2c1   : > { %1695 = vst.msk [vmem:[#allocation3 + $0xf8] sm:$0xff] %vm1663_vm11, %v1630_v15  ;;  %1694 = vst.msk [vmem:[#allocation3 + $0xf0] sm:$0xff] %vm1663_vm11, %v1628_v40 }
 0x2c4   : > { %v1766_v9 = vpop.permute.xlu0 %1765  ;;  %v1724_v25 = vld [vmem:[#allocation3 + $0xe0] sm:$0xff]  ;;  %v1725_v56 = vld [vmem:[#allocation3 + $0xe8] sm:$0xff] }
 0x2c5   : > { %4516 = vmatprep.mubr.msk.bf16.mxu0 %vm1812_vm12, %v1766_v9  ;;  %v1742_v55 = vpack.c.bf16 %v1725_v56, %v1724_v25 }
 0x2c6   : > { %v1768_v28 = vpop.permute.xlu1 %1767 }
 0x2c7   : > { %4517 = vmatmul.mubr.msk.bf16.vlgmr.msra.gmra.mxu0 %vm1812_vm12, %v1768_v28  ;;  %1793 = vrot.lane.b32.xlu0 %v1742_v55, %s4693_s10 }
 0x2c8   : > { %v1726_v49 = vld [vmem:[#allocation3 + $0xf0] sm:$0xff]  ;;  %v1727_v32 = vld [vmem:[#allocation3 + $0xf8] sm:$0xff] }
 0x2c9   : > { %v1743_v61 = vpack.c.bf16 %v1727_v32, %v1726_v49 }
 0x2cb   : > { %1795 = vrot.lane.b32.xlu1 %v1743_v61, %s4693_s10  ;;  %2357 = vrot.lane.b32.xlu0 %v2293_v39, %s4695_s11 }
 0x2cf   : > { %2359 = vrot.lane.b32.xlu1 %v2294_v12, %s4695_s11 }
 0x2d1   : > { %v1770_v8 = vpop.permute.xlu0 %1769 }
 0x2d2   : > { %4520 = vmatprep.mubr.msk.bf16.mxu0 %vm1812_vm12, %v1770_v8 }
 0x2d6   : > { %v1772_v19 = vpop.permute.xlu1 %1771 }
 0x2d7   : > { %4521 = vmatmul.mubr.msk.bf16.gmra.mxu0 %vm1812_vm12, %v1772_v19 }
 0x2e1   : > { %v1774_v1 = vpop.permute.xlu0 %1773 }
 0x2e2   : > { %4524 = vmatprep.mubr.msk.bf16.mxu0 %vm1812_vm12, %v1774_v1 }
 0x2e6   : > { %v1776_v60 = vpop.permute.xlu1 %1775 }
 0x2e7   : > { %4525 = vmatmul.mubr.msk.bf16.gmra.mxu0 %vm1812_vm12, %v1776_v60 }
 0x2f1   : > { %v1778_v62 = vpop.permute.xlu0 %1777 }
 0x2f2   : > { %4528 = vmatprep.mubr.msk.bf16.mxu0 %vm1812_vm12, %v1778_v62 }
 0x2f6   : > { %v1780_v16 = vpop.permute.xlu1 %1779 }
 0x2f7   : > { %4529 = vmatmul.mubr.msk.bf16.gmra.mxu0 %vm1812_vm12, %v1780_v16 }
 0x301   : > { %v1782_v5 = vpop.permute.xlu0 %1781 }
 0x302   : > { %4532 = vmatprep.mubr.msk.bf16.mxu0 %vm1812_vm12, %v1782_v5 }
 0x306   : > { %v1784_v4 = vpop.permute.xlu1 %1783 }
 0x307   : > { %4533 = vmatmul.mubr.msk.bf16.gmra.mxu0 %vm1812_vm12, %v1784_v4 }
 0x311   : > { %v1786_v10 = vpop.permute.xlu0 %1785 }
 0x312   : > { %4536 = vmatprep.mubr.msk.bf16.mxu0 %vm1812_vm12, %v1786_v10 }
 0x316   : > { %v1788_v63 = vpop.permute.xlu1 %1787 }
 0x317   : > { %4537 = vmatmul.mubr.msk.bf16.gmra.mxu0 %vm1812_vm12, %v1788_v63 }
 0x321   : > { %v1790_v11 = vpop.permute.xlu0 %1789 }
 0x322   : > { %4540 = vmatprep.mubr.msk.bf16.mxu0 %vm1812_vm12, %v1790_v11 }
 0x325   : > { %v1792_v18 = vpop.permute.xlu1 %1791 }
 0x326   : > { %4541 = vmatmul.mubr.msk.bf16.gmra.mxu0 %vm1812_vm12, %v1792_v18 }
 0x339   : > { %v1794_v17 = vpop.permute.xlu0 %1793 }
 0x33a   : > { %4544 = vmatprep.mubr.msk.bf16.mxu0 %vm1812_vm12, %v1794_v17 }
 0x33d   : > { %v1796_v59 = vpop.permute.xlu1 %1795  ;;  %v2358_v53 = vpop.permute.xlu0 %2357 }
 0x33e   : > { %4545 = vmatmul.mubr.msk.bf16.gmra.mxu0 %vm1812_vm12, %v1796_v59  ;;  %2454 = vst.msk [vmem:[#allocation3] sm:$0xff] %vm2453_vm3, %v2358_v53 }
 0x341   : > { %v2360_v52 = vpop.permute.xlu1 %2359 }
 0x342   : > { %2455 = vst.msk [vmem:[#allocation3 + $0x8] sm:$0xff] %vm2453_vm3, %v2360_v52 }
 0x387   : > { %v4518_v14 = vpop.f32.mrf.mxu0 }
 0x388   : > { %v2033_v23 = vmul.f32 %v4518_v14, %v6143_v54 }
 0x389   : > { %v1899_v22 = vpop.f32.mrf.mxu0 }
 0x38a   : > { %v2070_v2 = vadd.f32 %v6148_v46, %v2033_v23  ;;  %v2031_v27 = vmul.f32 %v6143_v54, %v1899_v22 }
 0x38b   : > { %v4519_v26 = vpop.f32.mrf.mxu0 }
 0x38c   : > { %vm2102_vm1 = vcmp.gt.f32.partialorder %v2070_v2, 0.0  ;;  %v2134_v24 = vmul.f32 0.01, %v2070_v2  ;;  %v2068_v58 = vadd.f32 %v6148_v46, %v2031_v27  ;;  %v2034_v50 = vmul.f32 %v4519_v26, %v6143_v54 }
 0x38d   : > { %v1902_v36 = vpop.f32.mrf.mxu0 }
 0x38e   : > { %v2166_v31 = vsel %vm2102_vm1, %v2070_v2, %v2134_v24  ;;  %vm2100_vm2 = vcmp.gt.f32.partialorder %v2068_v58, 0.0  ;;  %v2132_v30 = vmul.f32 0.01, %v2068_v58  ;;  %v2071_v38 = vadd.f32 %v6148_v46, %v2034_v50 }
 0x38f   : > { %2199 = vst.msk [vmem:[#allocation2 + $0x31] sm:$0xff] %vm199_vm13, %v2166_v31  ;;  %v2032_v57 = vmul.f32 %v6143_v54, %v1902_v36 }
 0x390   : > { %v2164_v47 = vsel %vm2100_vm2, %v2068_v58, %v2132_v30  ;;  %vm2103_vm4 = vcmp.gt.f32.partialorder %v2071_v38, 0.0  ;;  %v2135_v37 = vmul.f32 0.01, %v2071_v38 }
 0x391   : > { %2197 = vst.msk [vmem:[#allocation2 + $0x19] sm:$0xff] %vm199_vm13, %v2164_v47  ;;  %v2069_v0 = vadd.f32 %v6148_v46, %v2032_v57 }
 0x392   : > { %v2167_v34 = vsel %vm2103_vm4, %v2071_v38, %v2135_v37 }
 0x393   : > { %2200 = vst.msk [vmem:[#allocation2 + $0x39] sm:$0xff] %vm199_vm13, %v2167_v34  ;;  %vm2101_vm5 = vcmp.gt.f32.partialorder %v2069_v0, 0.0  ;;  %v2133_v6 = vmul.f32 0.01, %v2069_v0 }
 0x395   : > { %v2165_v29 = vsel %vm2101_vm5, %v2069_v0, %v2133_v6 }
 0x396   : > { %2198 = vst.msk [vmem:[#allocation2 + $0x21] sm:$0xff] %vm199_vm13, %v2165_v29  ;;  %v6166_v51 = vld [vmem:[#allocation2 + $0x30] sm:$0xff] }
 0x397   : > { %v4522_v44 = vpop.f32.mrf.mxu0  ;;  %2265 = vst.msk [vmem:[#allocation3 + $0x20] sm:$0xff] %vm199_vm13, %v6166_v51  ;;  %v2297_v9 = vld [vmem:[#allocation2 + $0x31] sm:$0xff] }
 0x398   : > { %v2037_v43 = vmul.f32 %v4522_v44, %v6143_v54  ;;  %v2295_v33 = vld [vmem:[#allocation2 + $0x19] sm:$0xff] }
 0x399   : > { %v6171_v20 = vld [vmem:[#allocation2 + $0x18] sm:$0xff]  ;;  %2361 = vrot.lane.b32.xlu0 %v2295_v33, %s4695_s11  ;;  %v1915_v13 = vpop.f32.mrf.mxu0 }
 0x39a   : > { %2263 = vst.msk [vmem:[#allocation3 + $0x10] sm:$0xff] %vm199_vm13, %v6171_v20  ;;  %v2074_v45 = vadd.f32 %v6148_v46, %v2037_v43  ;;  %v2035_v48 = vmul.f32 %v6143_v54, %v1915_v13  ;;  %v6178_v42 = vld [vmem:[#allocation2 + $0x38] sm:$0xff] }
 0x39b   : > { %v4523_v7 = vpop.f32.mrf.mxu0  ;;  %2266 = vst.msk [vmem:[#allocation3 + $0x28] sm:$0xff] %vm199_vm13, %v6178_v42  ;;  %v2298_v60 = vld [vmem:[#allocation2 + $0x39] sm:$0xff] }
 0x39c   : > { %vm2106_vm6 = vcmp.gt.f32.partialorder %v2074_v45, 0.0  ;;  %v2138_v3 = vmul.f32 0.01, %v2074_v45  ;;  %v2072_v15 = vadd.f32 %v6148_v46, %v2035_v48  ;;  %v2038_v40 = vmul.f32 %v4523_v7, %v6143_v54 }
 0x39d   : > { %2365 = vrot.lane.b32.xlu0 %v2297_v9, %s4695_s11  ;;  %v2296_v25 = vld [vmem:[#allocation2 + $0x21] sm:$0xff]  ;;  %v1918_v56 = vpop.f32.mrf.mxu0 }
 0x39e   : > { %v6185_v28 = vld [vmem:[#allocation2 + $0x20] sm:$0xff]  ;;  %v2170_v55 = vsel %vm2106_vm6, %v2074_v45, %v2138_v3  ;;  %vm2104_vm7 = vcmp.gt.f32.partialorder %v2072_v15, 0.0  ;;  %v2136_v49 = vmul.f32 0.01, %v2072_v15  ;;  %v2075_v32 = vadd.f32 %v6148_v46, %v2038_v40  ;;  %2363 = vrot.lane.b32.xlu1 %v2296_v25, %s4695_s11 }
 0x39f   : > { %2264 = vst.msk [vmem:[#allocation3 + $0x18] sm:$0xff] %vm199_vm13, %v6185_v28  ;;  %2203 = vst.msk [vmem:[#allocation2 + $0x61] sm:$0xff] %vm199_vm13, %v2170_v55  ;;  %v2036_v61 = vmul.f32 %v6143_v54, %v1918_v56 }
 0x3a0   : > { %v2168_v8 = vsel %vm2104_vm7, %v2072_v15, %v2136_v49  ;;  %vm2107_vm8 = vcmp.gt.f32.partialorder %v2075_v32, 0.0  ;;  %v2139_v19 = vmul.f32 0.01, %v2075_v32 }
 0x3a1   : > { %2201 = vst.msk [vmem:[#allocation2 + $0x49] sm:$0xff] %vm199_vm13, %v2168_v8  ;;  %v2073_v1 = vadd.f32 %v6148_v46, %v2036_v61 }
 0x3a2   : > { %v2171_v62 = vsel %vm2107_vm8, %v2075_v32, %v2139_v19  ;;  %2367 = vrot.lane.b32.xlu1 %v2298_v60, %s4695_s11 }
 0x3a3   : > { %2204 = vst.msk [vmem:[#allocation2 + $0x69] sm:$0xff] %vm199_vm13, %v2171_v62  ;;  %vm2105_vm9 = vcmp.gt.f32.partialorder %v2073_v1, 0.0  ;;  %v2137_v16 = vmul.f32 0.01, %v2073_v1 }
 0x3a5   : > { %v2169_v5 = vsel %vm2105_vm9, %v2073_v1, %v2137_v16 }
 0x3a6   : > { %2202 = vst.msk [vmem:[#allocation2 + $0x51] sm:$0xff] %vm199_vm13, %v2169_v5  ;;  %v6198_v4 = vld [vmem:[#allocation2 + $0x60] sm:$0xff] }
 0x3a7   : > { %v4526_v21 = vpop.f32.mrf.mxu0  ;;  %2269 = vst.msk [vmem:[#allocation3 + $0x40] sm:$0xff] %vm199_vm13, %v6198_v4  ;;  %v6219_v2 = vld [vmem:[#allocation2 + $0x61] sm:$0xff] }
 0x3a8   : > { %v2041_v10 = vmul.f32 %v4526_v21, %v6143_v54  ;;  %v6203_v39 = vld [vmem:[#allocation2 + $0x49] sm:$0xff] }
 0x3a9   : > { %v6205_v63 = vld [vmem:[#allocation2 + $0x48] sm:$0xff]  ;;  %2369 = vrot.lane.b32.xlu0 %v6203_v39, %s4695_s11  ;;  %v1931_v12 = vpop.f32.mrf.mxu0 }
 0x3aa   : > { %2267 = vst.msk [vmem:[#allocation3 + $0x30] sm:$0xff] %vm199_vm13, %v6205_v63  ;;  %v2078_v11 = vadd.f32 %v6148_v46, %v2041_v10  ;;  %v2039_v18 = vmul.f32 %v6143_v54, %v1931_v12  ;;  %v6213_v17 = vld [vmem:[#allocation2 + $0x68] sm:$0xff] }
 0x3ab   : > { %v4527_v59 = vpop.f32.mrf.mxu0  ;;  %2270 = vst.msk [vmem:[#allocation3 + $0x48] sm:$0xff] %vm199_vm13, %v6213_v17  ;;  %v6236_v41 = vld [vmem:[#allocation2 + $0x69] sm:$0xff] }
 0x3ac   : > { %vm2110_vm10 = vcmp.gt.f32.partialorder %v2078_v11, 0.0  ;;  %v2142_v14 = vmul.f32 0.01, %v2078_v11  ;;  %v2076_v23 = vadd.f32 %v6148_v46, %v2039_v18  ;;  %v2042_v22 = vmul.f32 %v4527_v59, %v6143_v54 }
 0x3ad   : > { %2373 = vrot.lane.b32.xlu0 %v6219_v2, %s4695_s11  ;;  %v6223_v27 = vld [vmem:[#allocation2 + $0x51] sm:$0xff]  ;;  %v1934_v26 = vpop.f32.mrf.mxu0 }
 0x3ae   : > { %v6225_v24 = vld [vmem:[#allocation2 + $0x50] sm:$0xff]  ;;  %v2174_v58 = vsel %vm2110_vm10, %v2078_v11, %v2142_v14  ;;  %vm2108_vm11 = vcmp.gt.f32.partialorder %v2076_v23, 0.0  ;;  %v2140_v50 = vmul.f32 0.01, %v2076_v23  ;;  %v2079_v36 = vadd.f32 %v6148_v46, %v2042_v22  ;;  %2371 = vrot.lane.b32.xlu1 %v6223_v27, %s4695_s11 }
 0x3af   : > { %2268 = vst.msk [vmem:[#allocation3 + $0x38] sm:$0xff] %vm199_vm13, %v6225_v24  ;;  %2207 = vst.msk [vmem:[#allocation2 + $0x91] sm:$0xff] %vm199_vm13, %v2174_v58  ;;  %v2040_v31 = vmul.f32 %v6143_v54, %v1934_v26 }
 0x3b0   : > { %v2172_v30 = vsel %vm2108_vm11, %v2076_v23, %v2140_v50  ;;  %vm2111_vm12 = vcmp.gt.f32.partialorder %v2079_v36, 0.0  ;;  %v2143_v38 = vmul.f32 0.01, %v2079_v36 }
 0x3b1   : > { %2205 = vst.msk [vmem:[#allocation2 + $0x79] sm:$0xff] %vm199_vm13, %v2172_v30  ;;  %v2077_v35 = vadd.f32 %v6148_v46, %v2040_v31 }
 0x3b2   : > { %v2175_v57 = vsel %vm2111_vm12, %v2079_v36, %v2143_v38  ;;  %2375 = vrot.lane.b32.xlu1 %v6236_v41, %s4695_s11 }
 0x3b3   : > { %2208 = vst.msk [vmem:[#allocation2 + $0x99] sm:$0xff] %vm199_vm13, %v2175_v57  ;;  %vm2109_vm14 = vcmp.gt.f32.partialorder %v2077_v35, 0.0  ;;  %v2141_v53 = vmul.f32 0.01, %v2077_v35 }
 0x3b5   : > { %v2173_v52 = vsel %vm2109_vm14, %v2077_v35, %v2141_v53 }
 0x3b6   : > { %2206 = vst.msk [vmem:[#allocation2 + $0x81] sm:$0xff] %vm199_vm13, %v2173_v52  ;;  %v6242_v47 = vld [vmem:[#allocation2 + $0x90] sm:$0xff] }
 0x3b7   : > { %v4530_v37 = vpop.f32.mrf.mxu0  ;;  %2273 = vst.msk [vmem:[#allocation3 + $0x60] sm:$0xff] %vm199_vm13, %v6242_v47  ;;  %v2305_v3 = vld [vmem:[#allocation2 + $0x91] sm:$0xff] }
 0x3b8   : > { %v2045_v0 = vmul.f32 %v4530_v37, %v6143_v54  ;;  %v6247_v34 = vld [vmem:[#allocation2 + $0x79] sm:$0xff] }
 0x3b9   : > { %v6249_v6 = vld [vmem:[#allocation2 + $0x78] sm:$0xff]  ;;  %2377 = vrot.lane.b32.xlu0 %v6247_v34, %s4695_s11  ;;  %v1947_v29 = vpop.f32.mrf.mxu0 }
 0x3ba   : > { %2271 = vst.msk [vmem:[#allocation3 + $0x50] sm:$0xff] %vm199_vm13, %v6249_v6  ;;  %v2082_v44 = vadd.f32 %v6148_v46, %v2045_v0  ;;  %v2043_v43 = vmul.f32 %v6143_v54, %v1947_v29  ;;  %v6257_v13 = vld [vmem:[#allocation2 + $0x98] sm:$0xff] }
 0x3bb   : > { %v4531_v33 = vpop.f32.mrf.mxu0  ;;  %2274 = vst.msk [vmem:[#allocation3 + $0x68] sm:$0xff] %vm199_vm13, %v6257_v13  ;;  %v6277_v19 = vld [vmem:[#allocation2 + $0x99] sm:$0xff] }
 0x3bc   : > { %vm2114_vm15 = vcmp.gt.f32.partialorder %v2082_v44, 0.0  ;;  %v2146_v45 = vmul.f32 0.01, %v2082_v44  ;;  %v2080_v48 = vadd.f32 %v6148_v46, %v2043_v43  ;;  %v2046_v7 = vmul.f32 %v4531_v33, %v6143_v54 }
 0x3bd   : > { %2381 = vrot.lane.b32.xlu0 %v2305_v3, %s4695_s11  ;;  %v6264_v15 = vld [vmem:[#allocation2 + $0x81] sm:$0xff]  ;;  %v1950_v40 = vpop.f32.mrf.mxu0 }
 0x3be   : > { %v2178_v9 = vsel %vm2114_vm15, %v2082_v44, %v2146_v45  ;;  %vm2112_vm1 = vcmp.gt.f32.partialorder %v2080_v48, 0.0  ;;  %v2144_v25 = vmul.f32 0.01, %v2080_v48  ;;  %v2083_v56 = vadd.f32 %v6148_v46, %v2046_v7  ;;  %2379 = vrot.lane.b32.xlu1 %v6264_v15, %s4695_s11  ;;  %v6269_v55 = vld [vmem:[#allocation2 + $0x80] sm:$0xff] }
 0x3bf   : > { %2211 = vst.msk [vmem:[#allocation2 + $0xc1] sm:$0xff] %vm199_vm13, %v2178_v9  ;;  %v2044_v49 = vmul.f32 %v6143_v54, %v1950_v40  ;;  %2272 = vst.msk [vmem:[#allocation3 + $0x58] sm:$0xff] %vm199_vm13, %v6269_v55 }
 0x3c0   : > { %v2176_v32 = vsel %vm2112_vm1, %v2080_v48, %v2144_v25  ;;  %vm2115_vm2 = vcmp.gt.f32.partialorder %v2083_v56, 0.0  ;;  %v2147_v61 = vmul.f32 0.01, %v2083_v56 }
 0x3c1   : > { %2209 = vst.msk [vmem:[#allocation2 + $0xa9] sm:$0xff] %vm199_vm13, %v2176_v32  ;;  %v2081_v8 = vadd.f32 %v6148_v46, %v2044_v49 }
 0x3c2   : > { %v2179_v1 = vsel %vm2115_vm2, %v2083_v56, %v2147_v61  ;;  %2383 = vrot.lane.b32.xlu1 %v6277_v19, %s4695_s11 }
 0x3c3   : > { %2212 = vst.msk [vmem:[#allocation2 + $0xc9] sm:$0xff] %vm199_vm13, %v2179_v1  ;;  %vm2113_vm4 = vcmp.gt.f32.partialorder %v2081_v8, 0.0  ;;  %v2145_v60 = vmul.f32 0.01, %v2081_v8 }
 0x3c5   : > { %v2177_v62 = vsel %vm2113_vm4, %v2081_v8, %v2145_v60 }
 0x3c6   : > { %2210 = vst.msk [vmem:[#allocation2 + $0xb1] sm:$0xff] %vm199_vm13, %v2177_v62  ;;  %v6283_v16 = vld [vmem:[#allocation2 + $0xc0] sm:$0xff] }
 0x3c7   : > { %v4534_v5 = vpop.f32.mrf.mxu0  ;;  %2277 = vst.msk [vmem:[#allocation3 + $0x80] sm:$0xff] %vm199_vm13, %v6283_v16  ;;  %v2309_v50 = vld [vmem:[#allocation2 + $0xc1] sm:$0xff] }
 0x3c8   : > { %v2049_v21 = vmul.f32 %v4534_v5, %v6143_v54  ;;  %v2307_v10 = vld [vmem:[#allocation2 + $0xa9] sm:$0xff] }
 0x3c9   : > { %v6288_v12 = vld [vmem:[#allocation2 + $0xa8] sm:$0xff]  ;;  %2385 = vrot.lane.b32.xlu0 %v2307_v10, %s4695_s11  ;;  %v1963_v11 = vpop.f32.mrf.mxu0 }
 0x3ca   : > { %2275 = vst.msk [vmem:[#allocation3 + $0x70] sm:$0xff] %vm199_vm13, %v6288_v12  ;;  %v2086_v18 = vadd.f32 %v6148_v46, %v2049_v21  ;;  %v2047_v59 = vmul.f32 %v6143_v54, %v1963_v11  ;;  %v6295_v23 = vld [vmem:[#allocation2 + $0xc8] sm:$0xff] }
 0x3cb   : > { %v4535_v14 = vpop.f32.mrf.mxu0  ;;  %2278 = vst.msk [vmem:[#allocation3 + $0x88] sm:$0xff] %vm199_vm13, %v6295_v23  ;;  %v2310_v29 = vld [vmem:[#allocation2 + $0xc9] sm:$0xff] }
 0x3cc   : > { %vm2118_vm5 = vcmp.gt.f32.partialorder %v2086_v18, 0.0  ;;  %v2150_v22 = vmul.f32 0.01, %v2086_v18  ;;  %v2084_v26 = vadd.f32 %v6148_v46, %v2047_v59  ;;  %v2050_v58 = vmul.f32 %v4535_v14, %v6143_v54 }
 0x3cd   : > { %2389 = vrot.lane.b32.xlu0 %v2309_v50, %s4695_s11  ;;  %v2308_v36 = vld [vmem:[#allocation2 + $0xb1] sm:$0xff]  ;;  %v1966_v31 = vpop.f32.mrf.mxu0 }
 0x3ce   : > { %v2182_v30 = vsel %vm2118_vm5, %v2086_v18, %v2150_v22  ;;  %vm2116_vm6 = vcmp.gt.f32.partialorder %v2084_v26, 0.0  ;;  %v2148_v38 = vmul.f32 0.01, %v2084_v26  ;;  %v2087_v35 = vadd.f32 %v6148_v46, %v2050_v58  ;;  %2387 = vrot.lane.b32.xlu1 %v2308_v36, %s4695_s11  ;;  %v6304_v57 = vld [vmem:[#allocation2 + $0xb0] sm:$0xff] }
 0x3cf   : > { %2215 = vst.msk [vmem:[#allocation2 + $0xf1] sm:$0xff] %vm199_vm13, %v2182_v30  ;;  %v2048_v53 = vmul.f32 %v6143_v54, %v1966_v31  ;;  %2276 = vst.msk [vmem:[#allocation3 + $0x78] sm:$0xff] %vm199_vm13, %v6304_v57 }
 0x3d0   : > { %v2180_v52 = vsel %vm2116_vm6, %v2084_v26, %v2148_v38  ;;  %vm2119_vm7 = vcmp.gt.f32.partialorder %v2087_v35, 0.0  ;;  %v2151_v37 = vmul.f32 0.01, %v2087_v35 }
 0x3d1   : > { %2213 = vst.msk [vmem:[#allocation2 + $0xd9] sm:$0xff] %vm199_vm13, %v2180_v52  ;;  %v2085_v0 = vadd.f32 %v6148_v46, %v2048_v53 }
 0x3d2   : > { %v2183_v44 = vsel %vm2119_vm7, %v2087_v35, %v2151_v37  ;;  %2391 = vrot.lane.b32.xlu1 %v2310_v29, %s4695_s11 }
 0x3d3   : > { %2216 = vst.msk [vmem:[#allocation2 + $0xf9] sm:$0xff] %vm199_vm13, %v2183_v44  ;;  %vm2117_vm8 = vcmp.gt.f32.partialorder %v2085_v0, 0.0  ;;  %v2149_v43 = vmul.f32 0.01, %v2085_v0 }
 0x3d5   : > { %v2181_v33 = vsel %vm2117_vm8, %v2085_v0, %v2149_v43  ;;  %vm2646_vm8 = vcmask 195712  }
 0x3d6   : > { %2214 = vst.msk [vmem:[#allocation2 + $0xe1] sm:$0xff] %vm199_vm13, %v2181_v33  ;;  %v6315_v45 = vld [vmem:[#allocation2 + $0xf0] sm:$0xff] }
 0x3d7   : > { %v4538_v48 = vpop.f32.mrf.mxu0  ;;  %2281 = vst.msk [vmem:[#allocation3 + $0xa0] sm:$0xff] %vm199_vm13, %v6315_v45  ;;  %v2313_v60 = vld [vmem:[#allocation2 + $0xf1] sm:$0xff] }
 0x3d8   : > { %v2053_v7 = vmul.f32 %v4538_v48, %v6143_v54  ;;  %v2311_v3 = vld [vmem:[#allocation2 + $0xd9] sm:$0xff] }
 0x3d9   : > { %v6320_v40 = vld [vmem:[#allocation2 + $0xd8] sm:$0xff]  ;;  %2393 = vrot.lane.b32.xlu0 %v2311_v3, %s4695_s11  ;;  %v1979_v9 = vpop.f32.mrf.mxu0 }
 0x3da   : > { %2279 = vst.msk [vmem:[#allocation3 + $0x90] sm:$0xff] %vm199_vm13, %v6320_v40  ;;  %v2090_v25 = vadd.f32 %v6148_v46, %v2053_v7  ;;  %v2051_v56 = vmul.f32 %v6143_v54, %v1979_v9  ;;  %v6327_v32 = vld [vmem:[#allocation2 + $0xf8] sm:$0xff] }
 0x3db   : > { %v4539_v49 = vpop.f32.mrf.mxu0  ;;  %2282 = vst.msk [vmem:[#allocation3 + $0xa8] sm:$0xff] %vm199_vm13, %v6327_v32  ;;  %v2314_v58 = vld [vmem:[#allocation2 + $0xf9] sm:$0xff] }
 0x3dc   : > { %vm2122_vm9 = vcmp.gt.f32.partialorder %v2090_v25, 0.0  ;;  %v2154_v61 = vmul.f32 0.01, %v2090_v25  ;;  %v2088_v8 = vadd.f32 %v6148_v46, %v2051_v56  ;;  %v2054_v1 = vmul.f32 %v4539_v49, %v6143_v54 }
 0x3dd   : > { %2397 = vrot.lane.b32.xlu0 %v2313_v60, %s4695_s11  ;;  %v2312_v62 = vld [vmem:[#allocation2 + $0xe1] sm:$0xff]  ;;  %v1982_v5 = vpop.f32.mrf.mxu0 }
 0x3de   : > { %v2186_v21 = vsel %vm2122_vm9, %v2090_v25, %v2154_v61  ;;  %vm2120_vm10 = vcmp.gt.f32.partialorder %v2088_v8, 0.0  ;;  %v2152_v10 = vmul.f32 0.01, %v2088_v8  ;;  %v2091_v11 = vadd.f32 %v6148_v46, %v2054_v1  ;;  %2395 = vrot.lane.b32.xlu1 %v2312_v62, %s4695_s11  ;;  %v6336_v18 = vld [vmem:[#allocation2 + $0xe0] sm:$0xff] }
 0x3df   : > { %2219 = vst.msk [vmem:[#allocation2 + $0x121] sm:$0xff] %vm199_vm13, %v2186_v21  ;;  %v2052_v59 = vmul.f32 %v6143_v54, %v1982_v5  ;;  %2280 = vst.msk [vmem:[#allocation3 + $0x98] sm:$0xff] %vm199_vm13, %v6336_v18  ;;  %vm3225_vm9 = vcmask 392512  }
 0x3e0   : > { %v2184_v14 = vsel %vm2120_vm10, %v2088_v8, %v2152_v10  ;;  %vm2123_vm11 = vcmp.gt.f32.partialorder %v2091_v11, 0.0  ;;  %v2155_v22 = vmul.f32 0.01, %v2091_v11  ;;  %vm3419_vm10 = vcmask 458112  }
 0x3e1   : > { %2217 = vst.msk [vmem:[#allocation2 + $0x109] sm:$0xff] %vm199_vm13, %v2184_v14  ;;  %v2089_v26 = vadd.f32 %v6148_v46, %v2052_v59 }
 0x3e2   : > { %v2187_v50 = vsel %vm2123_vm11, %v2091_v11, %v2155_v22  ;;  %2399 = vrot.lane.b32.xlu1 %v2314_v58, %s4695_s11  ;;  %vm3612_vm11 = vcmask 523712  }
 0x3e3   : > { %2220 = vst.msk [vmem:[#allocation2 + $0x129] sm:$0xff] %vm199_vm13, %v2187_v50  ;;  %vm2121_vm12 = vcmp.gt.f32.partialorder %v2089_v26, 0.0  ;;  %v2153_v36 = vmul.f32 0.01, %v2089_v26 }
 0x3e5   : > { %v2185_v31 = vsel %vm2121_vm12, %v2089_v26, %v2153_v36  ;;  %vm3805_vm12 = vcmask 589312  }
 0x3e6   : > { %2218 = vst.msk [vmem:[#allocation2 + $0x111] sm:$0xff] %vm199_vm13, %v2185_v31  ;;  %v6347_v30 = vld [vmem:[#allocation2 + $0x120] sm:$0xff]  ;;  %v4542_v38 = vpop.f32.mrf.mxu0 }
 0x3e7   : > { %2285 = vst.msk [vmem:[#allocation3 + $0xc0] sm:$0xff] %vm199_vm13, %v6347_v30  ;;  %v2057_v35 = vmul.f32 %v4542_v38, %v6143_v54  ;;  %v2317_v3 = vld [vmem:[#allocation2 + $0x121] sm:$0xff] }
 0x3e8   : > { %v2315_v53 = vld [vmem:[#allocation2 + $0x109] sm:$0xff]  ;;  %v1995_v37 = vpop.f32.mrf.mxu0 }
 0x3e9   : > { %v6352_v52 = vld [vmem:[#allocation2 + $0x108] sm:$0xff]  ;;  %2401 = vrot.lane.b32.xlu0 %v2315_v53, %s4695_s11  ;;  %v2094_v0 = vadd.f32 %v6148_v46, %v2057_v35  ;;  %v2055_v29 = vmul.f32 %v6143_v54, %v1995_v37 }
 0x3ea   : > { %2283 = vst.msk [vmem:[#allocation3 + $0xb0] sm:$0xff] %vm199_vm13, %v6352_v52  ;;  %v4543_v44 = vpop.f32.mrf.mxu0  ;;  %v6359_v43 = vld [vmem:[#allocation2 + $0x128] sm:$0xff] }
 0x3eb   : > { %vm2126_vm14 = vcmp.gt.f32.partialorder %v2094_v0, 0.0  ;;  %v2158_v33 = vmul.f32 0.01, %v2094_v0  ;;  %v2092_v48 = vadd.f32 %v6148_v46, %v2055_v29  ;;  %v2058_v7 = vmul.f32 %v4543_v44, %v6143_v54  ;;  %2286 = vst.msk [vmem:[#allocation3 + $0xc8] sm:$0xff] %vm199_vm13, %v6359_v43  ;;  %v2318_v21 = vld [vmem:[#allocation2 + $0x129] sm:$0xff] }
 0x3ec   : > { %v1998_v25 = vpop.f32.mrf.mxu0 }
 0x3ed   : > { %2405 = vrot.lane.b32.xlu0 %v2317_v3, %s4695_s11  ;;  %v2316_v9 = vld [vmem:[#allocation2 + $0x111] sm:$0xff]  ;;  %v2190_v56 = vsel %vm2126_vm14, %v2094_v0, %v2158_v33  ;;  %vm2124_vm15 = vcmp.gt.f32.partialorder %v2092_v48, 0.0  ;;  %v2156_v49 = vmul.f32 0.01, %v2092_v48  ;;  %v2095_v61 = vadd.f32 %v6148_v46, %v2058_v7 }
 0x3ee   : > { %2403 = vrot.lane.b32.xlu1 %v2316_v9, %s4695_s11  ;;  %v6368_v8 = vld [vmem:[#allocation2 + $0x110] sm:$0xff]  ;;  %2223 = vst.msk [vmem:[#allocation2 + $0x151] sm:$0xff] %vm199_vm13, %v2190_v56  ;;  %v2056_v1 = vmul.f32 %v6143_v54, %v1998_v25  ;;  %vm3941_vm14 = vcmask 883712  }
 0x3ef   : > { %2284 = vst.msk [vmem:[#allocation3 + $0xb8] sm:$0xff] %vm199_vm13, %v6368_v8  ;;  %v2188_v60 = vsel %vm2124_vm15, %v2092_v48, %v2156_v49  ;;  %vm2127_vm1 = vcmp.gt.f32.partialorder %v2095_v61, 0.0  ;;  %v2159_v62 = vmul.f32 0.01, %v2095_v61 }
 0x3f0   : > { %2221 = vst.msk [vmem:[#allocation2 + $0x139] sm:$0xff] %vm199_vm13, %v2188_v60  ;;  %v2093_v5 = vadd.f32 %v6148_v46, %v2056_v1 }
 0x3f1   : > { %v2191_v10 = vsel %vm2127_vm1, %v2095_v61, %v2159_v62 }
 0x3f2   : > { %2407 = vrot.lane.b32.xlu1 %v2318_v21, %s4695_s11  ;;  %2224 = vst.msk [vmem:[#allocation2 + $0x159] sm:$0xff] %vm199_vm13, %v2191_v10  ;;  %vm2125_vm2 = vcmp.gt.f32.partialorder %v2093_v5, 0.0  ;;  %v2157_v11 = vmul.f32 0.01, %v2093_v5 }
 0x3f4   : > { %v2189_v59 = vsel %vm2125_vm2, %v2093_v5, %v2157_v11 }
 0x3f5   : > { %2222 = vst.msk [vmem:[#allocation2 + $0x141] sm:$0xff] %vm199_vm13, %v2189_v59  ;;  %v6379_v14 = vld [vmem:[#allocation2 + $0x150] sm:$0xff] }
 0x3f6   : > { %2289 = vst.msk [vmem:[#allocation3 + $0xe0] sm:$0xff] %vm199_vm13, %v6379_v14  ;;  %v2321_v50 = vld [vmem:[#allocation2 + $0x151] sm:$0xff] }
 0x3f7   : > { %v2319_v22 = vld [vmem:[#allocation2 + $0x139] sm:$0xff] }
 0x3f8   : > { %v6383_v26 = vld [vmem:[#allocation2 + $0x138] sm:$0xff]  ;;  %2409 = vrot.lane.b32.xlu0 %v2319_v22, %s4695_s11 }
 0x3f9   : > { %2287 = vst.msk [vmem:[#allocation3 + $0xd0] sm:$0xff] %vm199_vm13, %v6383_v26  ;;  %v6388_v58 = vld [vmem:[#allocation2 + $0x158] sm:$0xff] }
 0x3fa   : > { %2290 = vst.msk [vmem:[#allocation3 + $0xe8] sm:$0xff] %vm199_vm13, %v6388_v58  ;;  %v2322_v53 = vld [vmem:[#allocation2 + $0x159] sm:$0xff] }
 0x3fc   : > { %2413 = vrot.lane.b32.xlu0 %v2321_v50, %s4695_s11  ;;  %v2320_v36 = vld [vmem:[#allocation2 + $0x141] sm:$0xff] }
 0x3fd   : > { %2411 = vrot.lane.b32.xlu1 %v2320_v36, %s4695_s11  ;;  %v6394_v31 = vld [vmem:[#allocation2 + $0x140] sm:$0xff] }
 0x3fe   : > { %v4546_v38 = vpop.f32.mrf.mxu0  ;;  %2288 = vst.msk [vmem:[#allocation3 + $0xd8] sm:$0xff] %vm199_vm13, %v6394_v31 }
 0x3ff   : > { %v2061_v35 = vmul.f32 %v4546_v38, %v6143_v54 }
 0x400   : > { %v2011_v37 = vpop.f32.mrf.mxu0 }
 0x401   : > { %v2098_v0 = vadd.f32 %v6148_v46, %v2061_v35  ;;  %2415 = vrot.lane.b32.xlu1 %v2322_v53, %s4695_s11  ;;  %v2059_v29 = vmul.f32 %v6143_v54, %v2011_v37  ;;  %v2487_v35 = vld [vmem:[#allocation2 + $0xa] sm:$0xff]  ;;  %v2488_v53 = vld [vmem:[#allocation2 + $0x1a] sm:$0xff] }
 0x402   : > { %v4547_v44 = vpop.f32.mrf.mxu0 }
 0x403   : > { %vm2130_vm4 = vcmp.gt.f32.partialorder %v2098_v0, 0.0  ;;  %v2162_v33 = vmul.f32 0.01, %v2098_v0  ;;  %v2096_v48 = vadd.f32 %v6148_v46, %v2059_v29  ;;  %v2062_v7 = vmul.f32 %v4547_v44, %v6143_v54  ;;  %v2489_v29 = vld [vmem:[#allocation2 + $0x22] sm:$0xff] }
 0x404   : > { %v2014_v3 = vpop.f32.mrf.mxu0 }
 0x405   : > { %v2194_v9 = vsel %vm2130_vm4, %v2098_v0, %v2162_v33  ;;  %vm2128_vm5 = vcmp.gt.f32.partialorder %v2096_v48, 0.0  ;;  %v2160_v25 = vmul.f32 0.01, %v2096_v48  ;;  %v2099_v56 = vadd.f32 %v6148_v46, %v2062_v7  ;;  %v2490_v0 = vld [vmem:[#allocation2 + $0x32] sm:$0xff]  ;;  %v2491_v7 = vld [vmem:[#allocation2 + $0x3a] sm:$0xff] }
 0x406   : > { %2227 = vst.msk [vmem:[#allocation2 + $0x181] sm:$0xff] %vm199_vm13, %v2194_v9  ;;  %v2060_v49 = vmul.f32 %v6143_v54, %v2014_v3  ;;  %v6435_v9 = vld [vmem:[#allocation2 + $0x62] sm:$0xff] }
 0x407   : > { %v2192_v61 = vsel %vm2128_vm5, %v2096_v48, %v2160_v25  ;;  %vm2131_vm6 = vcmp.gt.f32.partialorder %v2099_v56, 0.0  ;;  %v2163_v1 = vmul.f32 0.01, %v2099_v56  ;;  %v6429_v48 = vld [vmem:[#allocation2 + $0x4a] sm:$0xff]  ;;  %v6440_v25 = vld [vmem:[#allocation2 + $0x52] sm:$0xff] }
 0x408   : > { %2225 = vst.msk [vmem:[#allocation2 + $0x169] sm:$0xff] %vm199_vm13, %v2192_v61  ;;  %v2097_v60 = vadd.f32 %v6148_v46, %v2060_v49  ;;  %v2486_v46 = vld [vmem:[#allocation2 + $0x2] sm:$0xff]  ;;  %v6448_v49 = vld [vmem:[#allocation2 + $0x6a] sm:$0xff] }
 0x409   : > { %v2195_v62 = vsel %vm2131_vm6, %v2099_v56, %v2163_v1  ;;  %v6444_v56 = vld [vmem:[#allocation2 + $0x7a] sm:$0xff]  ;;  %v6453_v1 = vld [vmem:[#allocation2 + $0x92] sm:$0xff] }
 0x40a   : > { %2228 = vst.msk [vmem:[#allocation2 + $0x189] sm:$0xff] %vm199_vm13, %v2195_v62  ;;  %vm2129_vm7 = vcmp.gt.f32.partialorder %v2097_v60, 0.0  ;;  %v2161_v5 = vmul.f32 0.01, %v2097_v60 }
 0x40b   : > { %v2362_v21 = vpop.permute.xlu0 %2361 }
 0x40c   : > { %2456 = vst.msk [vmem:[#allocation3 + $0x10] sm:$0xff] %vm2453_vm3, %v2362_v21  ;;  %v2193_v10 = vsel %vm2129_vm7, %v2097_v60, %v2161_v5  ;;  %v6457_v60 = vld [vmem:[#allocation2 + $0x82] sm:$0xff]  ;;  %v6462_v21 = vld [vmem:[#allocation2 + $0xaa] sm:$0xff] }
 0x40d   : > { %2226 = vst.msk [vmem:[#allocation2 + $0x171] sm:$0xff] %vm199_vm13, %v2193_v10  ;;  %v6467_v10 = vld [vmem:[#allocation2 + $0x9a] sm:$0xff] }
 0x40f   : > { %v2366_v11 = vpop.permute.xlu0 %2365  ;;  %v2323_v59 = vld [vmem:[#allocation2 + $0x169] sm:$0xff] }
 0x410   : > { %v2364_v54 = vpop.permute.xlu1 %2363  ;;  %2458 = vst.msk [vmem:[#allocation3 + $0x20] sm:$0xff] %vm2453_vm3, %v2366_v11  ;;  %v6413_v22 = vld [vmem:[#allocation2 + $0x168] sm:$0xff]  ;;  %2417 = vrot.lane.b32.xlu0 %v2323_v59, %s4695_s11  ;;  %v6476_v59 = vld [vmem:[#allocation2 + $0xb2] sm:$0xff] }
 0x411   : > { %2457 = vst.msk [vmem:[#allocation3 + $0x18] sm:$0xff] %vm2453_vm3, %v2364_v54  ;;  %v6471_v54 = vld [vmem:[#allocation2 + $0xc2] sm:$0xff] }
 0x412   : > { %2291 = vst.msk [vmem:[#allocation3 + $0xf0] sm:$0xff] %vm199_vm13, %v6413_v22 }
 0x414   : > { %v2368_v50 = vpop.permute.xlu1 %2367  ;;  %2550 = vrot.lane.b32.xlu0 %v2486_v46, %s4696_s18  ;;  %v2324_v36 = vld [vmem:[#allocation2 + $0x171] sm:$0xff]  ;;  %v6480_v46 = vld [vmem:[#allocation2 + $0xda] sm:$0xff] }
 0x415   : > { %2459 = vst.msk [vmem:[#allocation3 + $0x28] sm:$0xff] %vm2453_vm3, %v2368_v50  ;;  %2419 = vrot.lane.b32.xlu1 %v2324_v36, %s4695_s11  ;;  %v2260_v38 = vld [vmem:[#allocation2 + $0x170] sm:$0xff] }
 0x416   : > { %2292 = vst.msk [vmem:[#allocation3 + $0xf8] sm:$0xff] %vm199_vm13, %v2260_v38  ;;  %v6484_v50 = vld [vmem:[#allocation2 + $0xca] sm:$0xff]  ;;  %v6489_v38 = vld [vmem:[#allocation2 + $0xf2] sm:$0xff] }
 0x418   : > { %2554 = vrot.lane.b32.xlu0 %v2488_v53, %s4696_s18 }
 0x419   : > { %2552 = vrot.lane.b32.xlu1 %v2487_v35, %s4696_s18  ;;  %v6493_v35 = vld [vmem:[#allocation2 + $0xe2] sm:$0xff] }
 0x41b   : > { %v2370_v37 = vpop.permute.xlu0 %2369 }
 0x41c   : > { %2460 = vst.msk [vmem:[#allocation3 + $0x30] sm:$0xff] %vm2453_vm3, %v2370_v37  ;;  %2558 = vrot.lane.b32.xlu0 %v2490_v0, %s4696_s18  ;;  %v6498_v0 = vld [vmem:[#allocation2 + $0x10a] sm:$0xff] }
 0x41d   : > { %2556 = vrot.lane.b32.xlu1 %v2489_v29, %s4696_s18  ;;  %v6503_v29 = vld [vmem:[#allocation2 + $0xfa] sm:$0xff] }
 0x41f   : > { %v2374_v44 = vpop.permute.xlu0 %2373 }
 0x420   : > { %v2372_v33 = vpop.permute.xlu1 %2371  ;;  %2462 = vst.msk [vmem:[#allocation3 + $0x40] sm:$0xff] %vm2453_vm3, %v2374_v44  ;;  %2562 = vrot.lane.b32.xlu0 %v6429_v48, %s4696_s18 }
 0x421   : > { %2461 = vst.msk [vmem:[#allocation3 + $0x38] sm:$0xff] %vm2453_vm3, %v2372_v33  ;;  %2560 = vrot.lane.b32.xlu1 %v2491_v7, %s4696_s18  ;;  %v2510_v33 = vld [vmem:[#allocation2 + $0x122] sm:$0xff]  ;;  %v6509_v7 = vld [vmem:[#allocation2 + $0x112] sm:$0xff] }
 0x424   : > { %v2376_v3 = vpop.permute.xlu1 %2375  ;;  %2566 = vrot.lane.b32.xlu0 %v6435_v9, %s4696_s18 }
 0x425   : > { %2463 = vst.msk [vmem:[#allocation3 + $0x48] sm:$0xff] %vm2453_vm3, %v2376_v3  ;;  %2564 = vrot.lane.b32.xlu1 %v6440_v25, %s4696_s18  ;;  %v2512_v3 = vld [vmem:[#allocation2 + $0x13a] sm:$0xff] }
 0x428   : > { %2570 = vrot.lane.b32.xlu0 %v6444_v56, %s4696_s18 }
 0x429   : > { %2568 = vrot.lane.b32.xlu1 %v6448_v49, %s4696_s18 }
 0x42b   : > { %v2378_v61 = vpop.permute.xlu0 %2377 }
 0x42c   : > { %2464 = vst.msk [vmem:[#allocation3 + $0x50] sm:$0xff] %vm2453_vm3, %v2378_v61  ;;  %2574 = vrot.lane.b32.xlu0 %v6453_v1, %s4696_s18  ;;  %v2511_v61 = vld [vmem:[#allocation2 + $0x12a] sm:$0xff] }
 0x42d   : > { %2572 = vrot.lane.b32.xlu1 %v6457_v60, %s4696_s18 }
 0x42f   : > { %v2382_v62 = vpop.permute.xlu0 %2381 }
 0x430   : > { %v2380_v5 = vpop.permute.xlu1 %2379  ;;  %2466 = vst.msk [vmem:[#allocation3 + $0x60] sm:$0xff] %vm2453_vm3, %v2382_v62  ;;  %2578 = vrot.lane.b32.xlu0 %v6462_v21, %s4696_s18 }
 0x431   : > { %2465 = vst.msk [vmem:[#allocation3 + $0x58] sm:$0xff] %vm2453_vm3, %v2380_v5  ;;  %2576 = vrot.lane.b32.xlu1 %v6467_v10, %s4696_s18  ;;  %v2514_v5 = vld [vmem:[#allocation2 + $0x152] sm:$0xff] }
 0x434   : > { %v2384_v11 = vpop.permute.xlu1 %2383  ;;  %2582 = vrot.lane.b32.xlu0 %v6471_v54, %s4696_s18 }
 0x435   : > { %2467 = vst.msk [vmem:[#allocation3 + $0x68] sm:$0xff] %vm2453_vm3, %v2384_v11  ;;  %2580 = vrot.lane.b32.xlu1 %v6476_v59, %s4696_s18  ;;  %v2513_v11 = vld [vmem:[#allocation2 + $0x142] sm:$0xff] }
 0x438   : > { %2586 = vrot.lane.b32.xlu0 %v6480_v46, %s4696_s18 }
 0x439   : > { %2584 = vrot.lane.b32.xlu1 %v6484_v50, %s4696_s18 }
 0x43b   : > { %v2386_v36 = vpop.permute.xlu0 %2385 }
 0x43c   : > { %2468 = vst.msk [vmem:[#allocation3 + $0x70] sm:$0xff] %vm2453_vm3, %v2386_v36  ;;  %2590 = vrot.lane.b32.xlu0 %v6489_v38, %s4696_s18 }
 0x43d   : > { %2588 = vrot.lane.b32.xlu1 %v6493_v35, %s4696_s18 }
 0x43f   : > { %v2390_v53 = vpop.permute.xlu0 %2389 }
 0x440   : > { %v2388_v37 = vpop.permute.xlu1 %2387  ;;  %2470 = vst.msk [vmem:[#allocation3 + $0x80] sm:$0xff] %vm2453_vm3, %v2390_v53  ;;  %2594 = vrot.lane.b32.xlu0 %v6498_v0, %s4696_s18 }
 0x441   : > { %2469 = vst.msk [vmem:[#allocation3 + $0x78] sm:$0xff] %vm2453_vm3, %v2388_v37  ;;  %2592 = vrot.lane.b32.xlu1 %v6503_v29, %s4696_s18  ;;  %v2516_v37 = vld [vmem:[#allocation2 + $0x16a] sm:$0xff] }
 0x444   : > { %v2392_v44 = vpop.permute.xlu1 %2391  ;;  %2598 = vrot.lane.b32.xlu0 %v2510_v33, %s4696_s18 }
 0x445   : > { %2471 = vst.msk [vmem:[#allocation3 + $0x88] sm:$0xff] %vm2453_vm3, %v2392_v44  ;;  %2596 = vrot.lane.b32.xlu1 %v6509_v7, %s4696_s18  ;;  %v2515_v44 = vld [vmem:[#allocation2 + $0x15a] sm:$0xff] }
 0x448   : > { %2602 = vrot.lane.b32.xlu0 %v2512_v3, %s4696_s18  ;;  %v2517_v3 = vld [vmem:[#allocation2 + $0x172] sm:$0xff] }
 0x449   : > { %2600 = vrot.lane.b32.xlu1 %v2511_v61, %s4696_s18 }
 0x44b   : > { %v2394_v62 = vpop.permute.xlu0 %2393 }
 0x44c   : > { %2472 = vst.msk [vmem:[#allocation3 + $0x90] sm:$0xff] %vm2453_vm3, %v2394_v62  ;;  %2606 = vrot.lane.b32.xlu0 %v2514_v5, %s4696_s18 }
 0x44d   : > { %2604 = vrot.lane.b32.xlu1 %v2513_v11, %s4696_s18 }
 0x44f   : > { %v2398_v36 = vpop.permute.xlu0 %2397 }
 0x450   : > { %v2396_v53 = vpop.permute.xlu1 %2395  ;;  %2474 = vst.msk [vmem:[#allocation3 + $0xa0] sm:$0xff] %vm2453_vm3, %v2398_v36  ;;  %2610 = vrot.lane.b32.xlu0 %v2516_v37, %s4696_s18 }
 0x451   : > { %2473 = vst.msk [vmem:[#allocation3 + $0x98] sm:$0xff] %vm2453_vm3, %v2396_v53  ;;  %2608 = vrot.lane.b32.xlu1 %v2515_v44, %s4696_s18 }
 0x454   : > { %v2400_v33 = vpop.permute.xlu1 %2399  ;;  %2743 = vrot.lane.b32.xlu0 %v6171_v20, %s4697_s19 }
 0x455   : > { %2475 = vst.msk [vmem:[#allocation3 + $0xa8] sm:$0xff] %vm2453_vm3, %v2400_v33  ;;  %2612 = vrot.lane.b32.xlu1 %v2517_v3, %s4696_s18  ;;  %s4467_s18 = sshll.u32 %s7424_s16, 8 }
 0x456   : > { %s7096_s21 = scalar_lea.vmem %s7276_s4, %s4467_s18 }
 0x458   : > { %2747 = vrot.lane.b32.xlu0 %v6166_v51, %s4697_s19 }
 0x459   : > { %2745 = vrot.lane.b32.xlu1 %v6185_v28, %s4697_s19 }
 0x45b   : > { %v2402_v61 = vpop.permute.xlu0 %2401 }
 0x45c   : > { %2476 = vst.msk [vmem:[#allocation3 + $0xb0] sm:$0xff] %vm2453_vm3, %v2402_v61  ;;  %2751 = vrot.lane.b32.xlu0 %v6205_v63, %s4697_s19  ;;  %v4642_v61 = vld [vmem:[%s7274_s2 + $0x28] sm:$0xff]  }
 0x45d   : > { %2749 = vrot.lane.b32.xlu1 %v6178_v42, %s4697_s19 }
 0x45f   : > { %v2406_v62 = vpop.permute.xlu0 %2405 }
 0x460   : > { %v2404_v20 = vpop.permute.xlu1 %2403  ;;  %2478 = vst.msk [vmem:[#allocation3 + $0xc0] sm:$0xff] %vm2453_vm3, %v2406_v62  ;;  %2755 = vrot.lane.b32.xlu0 %v6198_v4, %s4697_s19 }
 0x461   : > { %2477 = vst.msk [vmem:[#allocation3 + $0xb8] sm:$0xff] %vm2453_vm3, %v2404_v20  ;;  %2753 = vrot.lane.b32.xlu1 %v6225_v24, %s4697_s19 }
 0x464   : > { %v2408_v51 = vpop.permute.xlu1 %2407  ;;  %2759 = vrot.lane.b32.xlu0 %v6249_v6, %s4697_s19 }
 0x465   : > { %2479 = vst.msk [vmem:[#allocation3 + $0xc8] sm:$0xff] %vm2453_vm3, %v2408_v51  ;;  %2757 = vrot.lane.b32.xlu1 %v6213_v17, %s4697_s19 }
 0x468   : > { %2763 = vrot.lane.b32.xlu0 %v6242_v47, %s4697_s19 }
 0x469   : > { %2761 = vrot.lane.b32.xlu1 %v6269_v55, %s4697_s19 }
 0x46a   : > { %v2410_v42 = vpop.permute.xlu0 %2409 }
 0x46b   : > { %2480 = vst.msk [vmem:[#allocation3 + $0xd0] sm:$0xff] %vm2453_vm3, %v2410_v42  ;;  %v4644_v42 = vld [vmem:[%s7274_s2 + $0x18] sm:$0xff]  }
 0x46c   : > { %2767 = vrot.lane.b32.xlu0 %v6288_v12, %s4697_s19 }
 0x46d   : > { %2765 = vrot.lane.b32.xlu1 %v6257_v13, %s4697_s19 }
 0x46e   : > { %v2414_v28 = vpop.permute.xlu0 %2413 }
 0x46f   : > { %v2412_v63 = vpop.permute.xlu1 %2411  ;;  %2482 = vst.msk [vmem:[#allocation3 + $0xe0] sm:$0xff] %vm2453_vm3, %v2414_v28 }
 0x470   : > { %2481 = vst.msk [vmem:[#allocation3 + $0xd8] sm:$0xff] %vm2453_vm3, %v2412_v63  ;;  %2771 = vrot.lane.b32.xlu0 %v6283_v16, %s4697_s19 }
 0x471   : > { %2769 = vrot.lane.b32.xlu1 %v6304_v57, %s4697_s19 }
 0x473   : > { %v2416_v24 = vpop.permute.xlu1 %2415 }
 0x474   : > { %2483 = vst.msk [vmem:[#allocation3 + $0xe8] sm:$0xff] %vm2453_vm3, %v2416_v24  ;;  %2775 = vrot.lane.b32.xlu0 %v6320_v40, %s4697_s19 }
 0x475   : > { %2773 = vrot.lane.b32.xlu1 %v6295_v23, %s4697_s19 }
 0x478   : > { %2779 = vrot.lane.b32.xlu0 %v6315_v45, %s4697_s19 }
 0x479   : > { %2777 = vrot.lane.b32.xlu1 %v6336_v18, %s4697_s19 }
 0x47c   : > { %2783 = vrot.lane.b32.xlu0 %v6352_v52, %s4697_s19 }
 0x47d   : > { %2781 = vrot.lane.b32.xlu1 %v6327_v32, %s4697_s19 }
 0x480   : > { %2787 = vrot.lane.b32.xlu0 %v6347_v30, %s4697_s19 }
 0x481   : > { %2785 = vrot.lane.b32.xlu1 %v6368_v8, %s4697_s19 }
 0x482   : > { %v2418_v5 = vpop.permute.xlu0 %2417 }
 0x483   : > { %2484 = vst.msk [vmem:[#allocation3 + $0xf0] sm:$0xff] %vm2453_vm3, %v2418_v5 }
 0x484   : > { %2791 = vrot.lane.b32.xlu0 %v6383_v26, %s4697_s19 }
 0x485   : > { %2789 = vrot.lane.b32.xlu1 %v6359_v43, %s4697_s19 }
 0x486   : > { %v2551_v11 = vpop.permute.xlu0 %2550 }
 0x487   : > { %v2420_v36 = vpop.permute.xlu1 %2419  ;;  %2647 = vst.msk [vmem:[#allocation3] sm:$0xff] %vm2646_vm8, %v2551_v11 }
 0x488   : > { %2485 = vst.msk [vmem:[#allocation3 + $0xf8] sm:$0xff] %vm2453_vm3, %v2420_v36  ;;  %2795 = vrot.lane.b32.xlu0 %v6379_v14, %s4697_s19  ;;  %vm3032_vm3 = vcmask 326912  }
 0x489   : > { %2793 = vrot.lane.b32.xlu1 %v6394_v31, %s4697_s19 }
 0x48a   : > { %v2555_v53 = vpop.permute.xlu0 %2554 }
 0x48b   : > { %v2553_v37 = vpop.permute.xlu1 %2552  ;;  %2649 = vst.msk [vmem:[#allocation3 + $0x10] sm:$0xff] %vm2646_vm8, %v2555_v53 }
 0x48c   : > { %2648 = vst.msk [vmem:[#allocation3 + $0x8] sm:$0xff] %vm2646_vm8, %v2553_v37  ;;  %2799 = vrot.lane.b32.xlu0 %v6413_v22, %s4697_s19 }
 0x48d   : > { %2797 = vrot.lane.b32.xlu1 %v6388_v58, %s4697_s19  ;;  %v4641_v58 = vld [vmem:[%s7274_s2 + $0x30] sm:$0x3f]  }
 0x48e   : > { %v2559_v44 = vpop.permute.xlu0 %2558  ;;  %4610 = vmatprep.subr.msk.bf16.mxu1 %vm686_vm0, %v4641_v58  ;;  %4609 = vmatprep.subr.msk.bf16.mxu0 %vm686_vm0, %v4641_v58 }
 0x48f   : > { %v2557_v33 = vpop.permute.xlu1 %2556  ;;  %2651 = vst.msk [vmem:[#allocation3 + $0x20] sm:$0xff] %vm2646_vm8, %v2559_v44 }
 0x490   : > { %2650 = vst.msk [vmem:[#allocation3 + $0x18] sm:$0xff] %vm2646_vm8, %v2557_v33  ;;  %2946 = vrot.lane.b32.xlu0 %v6223_v27, %s4698_s20  ;;  %v2882_v33 = vld [vmem:[#allocation2 + $0x91] sm:$0xff] }
 0x491   : > { %2944 = vrot.lane.b32.xlu1 %v6203_v39, %s4698_s20  ;;  %v3991_v39 = vsel %vm686_vm0, %v4641_v58, 0  ;;  %vm2839_vm0 = vcmask 261312  }
 0x492   : > { %v2563_v14 = vpop.permute.xlu0 %2562  ;;  %4601 = vmatpush3.bf16.msra.mxu1 %v3991_v39  ;;  %4549 = vmatpush3.bf16.msra.mxu0 %v3991_v39 }
 0x493   : > { %v2561_v3 = vpop.permute.xlu1 %2560  ;;  %2653 = vst.msk [vmem:[#allocation3 + $0x30] sm:$0xff] %vm2646_vm8, %v2563_v14  ;;  %4595 = vmatprep.subr.bf16.mxu1 %v4642_v61  ;;  %4550 = vmatprep.subr.bf16.mxu0 %v4642_v61 }
 0x494   : > { %2652 = vst.msk [vmem:[#allocation3 + $0x28] sm:$0xff] %vm2646_vm8, %v2561_v3  ;;  %2950 = vrot.lane.b32.xlu0 %v6236_v41, %s4698_s20 }
 0x495   : > { %2948 = vrot.lane.b32.xlu1 %v6219_v2, %s4698_s20 }
 0x496   : > { %v2567_v27 = vpop.permute.xlu0 %2566  ;;  %4602 = vmatpush3.bf16.msra.mxu1 %v4642_v61  ;;  %4551 = vmatpush3.bf16.msra.mxu0 %v4642_v61 }
 0x497   : > { %v2565_v22 = vpop.permute.xlu1 %2564  ;;  %2655 = vst.msk [vmem:[#allocation3 + $0x40] sm:$0xff] %vm2646_vm8, %v2567_v27 }
 0x498   : > { %2654 = vst.msk [vmem:[#allocation3 + $0x38] sm:$0xff] %vm2646_vm8, %v2565_v22  ;;  %3139 = vrot.lane.b32.xlu0 %v6440_v25, %s4699_s23 }
 0x499   : > { %3137 = vrot.lane.b32.xlu1 %v6429_v48, %s4699_s23  ;;  %v4643_v48 = vld [vmem:[%s7274_s2 + $0x20] sm:$0xff]  }
 0x49a   : > { %v2571_v62 = vpop.permute.xlu0 %2570  ;;  %4596 = vmatprep.subr.bf16.mxu1 %v4643_v48  ;;  %4552 = vmatprep.subr.bf16.mxu0 %v4643_v48 }
 0x49b   : > { %v2569_v20 = vpop.permute.xlu1 %2568  ;;  %2657 = vst.msk [vmem:[#allocation3 + $0x50] sm:$0xff] %vm2646_vm8, %v2571_v62  ;;  %4603 = vmatpush3.bf16.msra.mxu1 %v4643_v48  ;;  %4553 = vmatpush3.bf16.msra.mxu0 %v4643_v48  ;;  %v3463_v62 = vld [vmem:[#allocation2 + $0xb1] sm:$0xff] }
 0x49c   : > { %2656 = vst.msk [vmem:[#allocation3 + $0x48] sm:$0xff] %vm2646_vm8, %v2569_v20  ;;  %3143 = vrot.lane.b32.xlu0 %v6448_v49, %s4699_s23  ;;  %4597 = vmatprep.subr.bf16.mxu1 %v4644_v42 }
 0x49d   : > { %3141 = vrot.lane.b32.xlu1 %v6435_v9, %s4699_s23  ;;  %4554 = vmatprep.subr.bf16.mxu0 %v4644_v42 }
 0x49e   : > { %v2575_v25 = vpop.permute.xlu0 %2574 }
 0x49f   : > { %v2573_v51 = vpop.permute.xlu1 %2572  ;;  %2659 = vst.msk [vmem:[#allocation3 + $0x60] sm:$0xff] %vm2646_vm8, %v2575_v25  ;;  %4604 = vmatpush3.bf16.msra.mxu1 %v4644_v42  ;;  %4555 = vmatpush3.bf16.msra.mxu0 %v4644_v42 }
 0x4a0   : > { %2658 = vst.msk [vmem:[#allocation3 + $0x58] sm:$0xff] %vm2646_vm8, %v2573_v51  ;;  %3333 = vrot.lane.b32.xlu0 %v6213_v17, %s4700_s28 }
 0x4a1   : > { %3331 = vrot.lane.b32.xlu1 %v6198_v4, %s4700_s28  ;;  %v4645_v4 = vld [vmem:[%s7274_s2 + $0x10] sm:$0xff]  }
 0x4a2   : > { %v2579_v28 = vpop.permute.xlu0 %2578  ;;  %4598 = vmatprep.subr.bf16.mxu1 %v4645_v4  ;;  %4556 = vmatprep.subr.bf16.mxu0 %v4645_v4 }
 0x4a3   : > { %v2577_v63 = vpop.permute.xlu1 %2576  ;;  %2661 = vst.msk [vmem:[#allocation3 + $0x70] sm:$0xff] %vm2646_vm8, %v2579_v28  ;;  %4605 = vmatpush3.bf16.msra.mxu1 %v4645_v4  ;;  %4557 = vmatpush3.bf16.msra.mxu0 %v4645_v4  ;;  %v2887_v28 = vld [vmem:[#allocation2 + $0xc9] sm:$0xff] }
 0x4a4   : > { %2660 = vst.msk [vmem:[#allocation3 + $0x68] sm:$0xff] %vm2646_vm8, %v2577_v63  ;;  %3337 = vrot.lane.b32.xlu0 %v6269_v55, %s4700_s28  ;;  %v2886_v63 = vld [vmem:[#allocation2 + $0xc1] sm:$0xff] }
 0x4a5   : > { %3335 = vrot.lane.b32.xlu1 %v6249_v6, %s4700_s28  ;;  %v4646_v6 = vld [vmem:[%s7274_s2 + $0x8] sm:$0xff]  }
 0x4a6   : > { %v2583_v17 = vpop.permute.xlu0 %2582  ;;  %4599 = vmatprep.subr.bf16.mxu1 %v4646_v6  ;;  %4558 = vmatprep.subr.bf16.mxu0 %v4646_v6 }
 0x4a7   : > { %v2581_v24 = vpop.permute.xlu1 %2580  ;;  %2663 = vst.msk [vmem:[#allocation3 + $0x80] sm:$0xff] %vm2646_vm8, %v2583_v17  ;;  %4606 = vmatpush3.bf16.msra.mxu1 %v4646_v6  ;;  %4559 = vmatpush3.bf16.msra.mxu0 %v4646_v6 }
 0x4a8   : > { %2662 = vst.msk [vmem:[#allocation3 + $0x78] sm:$0xff] %vm2646_vm8, %v2581_v24  ;;  %3526 = vrot.lane.b32.xlu0 %v6236_v41, %s4693_s10 }
 0x4a9   : > { %3524 = vrot.lane.b32.xlu1 %v6219_v2, %s4693_s10  ;;  %v4647_v2 = vld [vmem:[%s7274_s2] sm:$0xff]  }
 0x4aa   : > { %v2587_v55 = vpop.permute.xlu0 %2586  ;;  %4600 = vmatprep.subr.bf16.mxu1 %v4647_v2  ;;  %4560 = vmatprep.subr.bf16.mxu0 %v4647_v2 }
 0x4ab   : > { %v2585_v5 = vpop.permute.xlu1 %2584  ;;  %2665 = vst.msk [vmem:[#allocation3 + $0x90] sm:$0xff] %vm2646_vm8, %v2587_v55  ;;  %4607 = vmatpush3.bf16.msra.mxu1 %v4647_v2  ;;  %4561 = vmatpush3.bf16.msra.mxu0 %v4647_v2 }
 0x4ac   : > { %2664 = vst.msk [vmem:[#allocation3 + $0x88] sm:$0xff] %vm2646_vm8, %v2585_v5  ;;  %3530 = vrot.lane.b32.xlu0 %v6264_v15, %s4693_s10 }
 0x4ad   : > { %3528 = vrot.lane.b32.xlu1 %v6247_v34, %s4693_s10 }
 0x4ae   : > { %v2591_v41 = vpop.permute.xlu0 %2590 }
 0x4af   : > { %v2589_v11 = vpop.permute.xlu1 %2588  ;;  %2667 = vst.msk [vmem:[#allocation3 + $0xa0] sm:$0xff] %vm2646_vm8, %v2591_v41 }
 0x4b0   : > { %2666 = vst.msk [vmem:[#allocation3 + $0x98] sm:$0xff] %vm2646_vm8, %v2589_v11  ;;  %3719 = vrot.lane.b32.xlu0 %v6448_v49, %s4701_s12  ;;  %v3467_v11 = vld [vmem:[#allocation2 + $0xe1] sm:$0xff] }
 0x4b1   : > { %3717 = vrot.lane.b32.xlu1 %v6435_v9, %s4701_s12  ;;  %v2880_v9 = vld [vmem:[#allocation2 + $0x79] sm:$0xff] }
 0x4b2   : > { %v2595_v34 = vpop.permute.xlu0 %2594 }
 0x4b3   : > { %v2593_v36 = vpop.permute.xlu1 %2592  ;;  %2669 = vst.msk [vmem:[#allocation3 + $0xb0] sm:$0xff] %vm2646_vm8, %v2595_v34 }
 0x4b4   : > { %2668 = vst.msk [vmem:[#allocation3 + $0xa8] sm:$0xff] %vm2646_vm8, %v2593_v36  ;;  %3723 = vrot.lane.b32.xlu0 %v6457_v60, %s4701_s12 }
 0x4b5   : > { %3721 = vrot.lane.b32.xlu1 %v6444_v56, %s4701_s12 }
 0x4b6   : > { %v2599_v53 = vpop.permute.xlu0 %2598 }
 0x4b7   : > { %v2597_v37 = vpop.permute.xlu1 %2596  ;;  %2671 = vst.msk [vmem:[#allocation3 + $0xc0] sm:$0xff] %vm2646_vm8, %v2599_v53 }
 0x4b8   : > { %2670 = vst.msk [vmem:[#allocation3 + $0xb8] sm:$0xff] %vm2646_vm8, %v2597_v37  ;;  %2954 = vrot.lane.b32.xlu0 %v6264_v15, %s4698_s20 }
 0x4b9   : > { %2952 = vrot.lane.b32.xlu1 %v2880_v9, %s4698_s20 }
 0x4ba   : > { %v2603_v49 = vpop.permute.xlu0 %2602 }
 0x4bb   : > { %v2601_v44 = vpop.permute.xlu1 %2600  ;;  %2673 = vst.msk [vmem:[#allocation3 + $0xd0] sm:$0xff] %vm2646_vm8, %v2603_v49  ;;  %v2891_v49 = vld [vmem:[#allocation2 + $0xf9] sm:$0xff] }
 0x4bc   : > { %2672 = vst.msk [vmem:[#allocation3 + $0xc8] sm:$0xff] %vm2646_vm8, %v2601_v44  ;;  %2958 = vrot.lane.b32.xlu0 %v6277_v19, %s4698_s20  ;;  %v2890_v44 = vld [vmem:[#allocation2 + $0xf1] sm:$0xff] }
 0x4bd   : > { %2956 = vrot.lane.b32.xlu1 %v2882_v33, %s4698_s20 }
 0x4be   : > { %v2607_v14 = vpop.permute.xlu0 %2606 }
 0x4bf   : > { %v2605_v3 = vpop.permute.xlu1 %2604  ;;  %2675 = vst.msk [vmem:[#allocation3 + $0xe0] sm:$0xff] %vm2646_vm8, %v2607_v14 }
 0x4c0   : > { %2674 = vst.msk [vmem:[#allocation3 + $0xd8] sm:$0xff] %vm2646_vm8, %v2605_v3  ;;  %3147 = vrot.lane.b32.xlu0 %v6457_v60, %s4699_s23 }
 0x4c1   : > { %3145 = vrot.lane.b32.xlu1 %v6444_v56, %s4699_s23 }
 0x4c2   : > { %v2611_v15 = vpop.permute.xlu0 %2610 }
 0x4c3   : > { %v2609_v58 = vpop.permute.xlu1 %2608  ;;  %2677 = vst.msk [vmem:[#allocation3 + $0xf0] sm:$0xff] %vm2646_vm8, %v2611_v15 }
 0x4c4   : > { %2676 = vst.msk [vmem:[#allocation3 + $0xe8] sm:$0xff] %vm2646_vm8, %v2609_v58  ;;  %3151 = vrot.lane.b32.xlu0 %v6467_v10, %s4699_s23 }
 0x4c5   : > { %3149 = vrot.lane.b32.xlu1 %v6453_v1, %s4699_s23 }
 0x4c6   : > { %v2744_v19 = vpop.permute.xlu0 %2743 }
 0x4c7   : > { %v2613_v27 = vpop.permute.xlu1 %2612  ;;  %2840 = vst.msk [vmem:[#allocation3] sm:$0xff] %vm2839_vm0, %v2744_v19 }
 0x4c8   : > { %2678 = vst.msk [vmem:[#allocation3 + $0xf8] sm:$0xff] %vm2646_vm8, %v2613_v27  ;;  %3341 = vrot.lane.b32.xlu0 %v6257_v13, %s4700_s28  ;;  %v3461_v13 = vld [vmem:[#allocation2 + $0x99] sm:$0xff] }
 0x4c9   : > { %3339 = vrot.lane.b32.xlu1 %v6242_v47, %s4700_s28 }
 0x4ca   : > { %v2748_v56 = vpop.permute.xlu0 %2747 }
 0x4cb   : > { %v2746_v60 = vpop.permute.xlu1 %2745  ;;  %2842 = vst.msk [vmem:[#allocation3 + $0x10] sm:$0xff] %vm2839_vm0, %v2748_v56 }
 0x4cc   : > { %2841 = vst.msk [vmem:[#allocation3 + $0x8] sm:$0xff] %vm2839_vm0, %v2746_v60  ;;  %3345 = vrot.lane.b32.xlu0 %v6304_v57, %s4700_s28  ;;  %v3462_v57 = vld [vmem:[#allocation2 + $0xa9] sm:$0xff]  ;;  %v3471_v60 = vld [vmem:[#allocation2 + $0x111] sm:$0xff] }
 0x4cd   : > { %3343 = vrot.lane.b32.xlu1 %v6288_v12, %s4700_s28 }
 0x4ce   : > { %v2752_v22 = vpop.permute.xlu0 %2751 }
 0x4cf   : > { %v2750_v39 = vpop.permute.xlu1 %2749  ;;  %2844 = vst.msk [vmem:[#allocation3 + $0x20] sm:$0xff] %vm2839_vm0, %v2752_v22 }
 0x4d0   : > { %2843 = vst.msk [vmem:[#allocation3 + $0x18] sm:$0xff] %vm2839_vm0, %v2750_v39  ;;  %3534 = vrot.lane.b32.xlu0 %v3461_v13, %s4693_s10 }
 0x4d1   : > { %3532 = vrot.lane.b32.xlu1 %v2882_v33, %s4693_s10 }
 0x4d2   : > { %v2756_v47 = vpop.permute.xlu0 %2755 }
 0x4d3   : > { %v2754_v61 = vpop.permute.xlu1 %2753  ;;  %2846 = vst.msk [vmem:[#allocation3 + $0x30] sm:$0xff] %vm2839_vm0, %v2756_v47 }
 0x4d4   : > { %2845 = vst.msk [vmem:[#allocation3 + $0x28] sm:$0xff] %vm2839_vm0, %v2754_v61  ;;  %3538 = vrot.lane.b32.xlu0 %v3463_v62, %s4693_s10 }
 0x4d5   : > { %3536 = vrot.lane.b32.xlu1 %v3462_v57, %s4693_s10 }
 0x4d6   : > { %v2760_v12 = vpop.permute.xlu0 %2759 }
 0x4d7   : > { %v2758_v20 = vpop.permute.xlu1 %2757  ;;  %2848 = vst.msk [vmem:[#allocation3 + $0x40] sm:$0xff] %vm2839_vm0, %v2760_v12 }
 0x4d8   : > { %2847 = vst.msk [vmem:[#allocation3 + $0x38] sm:$0xff] %vm2839_vm0, %v2758_v20  ;;  %3727 = vrot.lane.b32.xlu0 %v6467_v10, %s4701_s12 }
 0x4d9   : > { %3725 = vrot.lane.b32.xlu1 %v6453_v1, %s4701_s12 }
 0x4da   : > { %v2764_v48 = vpop.permute.xlu0 %2763 }
 0x4db   : > { %v2762_v25 = vpop.permute.xlu1 %2761  ;;  %2850 = vst.msk [vmem:[#allocation3 + $0x50] sm:$0xff] %vm2839_vm0, %v2764_v48 }
 0x4dc   : > { %2849 = vst.msk [vmem:[#allocation3 + $0x48] sm:$0xff] %vm2839_vm0, %v2762_v25  ;;  %3731 = vrot.lane.b32.xlu0 %v6476_v59, %s4701_s12  ;;  %v2894_v25 = vld [vmem:[#allocation2 + $0x121] sm:$0xff] }
 0x4dd   : > { %3729 = vrot.lane.b32.xlu1 %v6462_v21, %s4701_s12 }
 0x4de   : > { %v2768_v51 = vpop.permute.xlu0 %2767 }
 0x4df   : > { %v2766_v42 = vpop.permute.xlu1 %2765  ;;  %2852 = vst.msk [vmem:[#allocation3 + $0x60] sm:$0xff] %vm2839_vm0, %v2768_v51 }
 0x4e0   : > { %2851 = vst.msk [vmem:[#allocation3 + $0x58] sm:$0xff] %vm2839_vm0, %v2766_v42  ;;  %2962 = vrot.lane.b32.xlu0 %v3463_v62, %s4698_s20 }
 0x4e1   : > { %2960 = vrot.lane.b32.xlu1 %v3462_v57, %s4698_s20 }
 0x4e2   : > { %v2772_v1 = vpop.permute.xlu0 %2771 }
 0x4e3   : > { %v2770_v10 = vpop.permute.xlu1 %2769  ;;  %2854 = vst.msk [vmem:[#allocation3 + $0x70] sm:$0xff] %vm2839_vm0, %v2772_v1  ;;  %v3086_v1 = vld [vmem:[#allocation2 + $0x112] sm:$0xff] }
 0x4e4   : > { %2853 = vst.msk [vmem:[#allocation3 + $0x68] sm:$0xff] %vm2839_vm0, %v2770_v10  ;;  %2966 = vrot.lane.b32.xlu0 %v2887_v28, %s4698_s20  ;;  %v3085_v10 = vld [vmem:[#allocation2 + $0x10a] sm:$0xff] }
 0x4e5   : > { %2964 = vrot.lane.b32.xlu1 %v2886_v63, %s4698_s20 }
 0x4e6   : > { %v2776_v4 = vpop.permute.xlu0 %2775 }
 0x4e7   : > { %v2774_v17 = vpop.permute.xlu1 %2773  ;;  %2856 = vst.msk [vmem:[#allocation3 + $0x80] sm:$0xff] %vm2839_vm0, %v2776_v4  ;;  %v3088_v4 = vld [vmem:[#allocation2 + $0x12a] sm:$0xff] }
 0x4e8   : > { %2855 = vst.msk [vmem:[#allocation3 + $0x78] sm:$0xff] %vm2839_vm0, %v2774_v17  ;;  %3155 = vrot.lane.b32.xlu0 %v6476_v59, %s4699_s23  ;;  %v3087_v17 = vld [vmem:[#allocation2 + $0x122] sm:$0xff] }
 0x4e9   : > { %3153 = vrot.lane.b32.xlu1 %v6462_v21, %s4699_s23 }
 0x4ea   : > { %v2780_v24 = vpop.permute.xlu0 %2779 }
 0x4eb   : > { %v2778_v6 = vpop.permute.xlu1 %2777  ;;  %2858 = vst.msk [vmem:[#allocation3 + $0x90] sm:$0xff] %vm2839_vm0, %v2780_v24 }
 0x4ec   : > { %2857 = vst.msk [vmem:[#allocation3 + $0x88] sm:$0xff] %vm2839_vm0, %v2778_v6  ;;  %3159 = vrot.lane.b32.xlu0 %v6484_v50, %s4699_s23 }
 0x4ed   : > { %3157 = vrot.lane.b32.xlu1 %v6471_v54, %s4699_s23 }
 0x4ee   : > { %v2784_v55 = vpop.permute.xlu0 %2783 }
 0x4ef   : > { %v2782_v5 = vpop.permute.xlu1 %2781  ;;  %2860 = vst.msk [vmem:[#allocation3 + $0xa0] sm:$0xff] %vm2839_vm0, %v2784_v55 }
 0x4f0   : > { %2859 = vst.msk [vmem:[#allocation3 + $0x98] sm:$0xff] %vm2839_vm0, %v2782_v5  ;;  %3349 = vrot.lane.b32.xlu0 %v6295_v23, %s4700_s28 }
 0x4f1   : > { %3347 = vrot.lane.b32.xlu1 %v6283_v16, %s4700_s28 }
 0x4f2   : > { %v2788_v21 = vpop.permute.xlu0 %2787 }
 0x4f3   : > { %v2786_v59 = vpop.permute.xlu1 %2785  ;;  %2862 = vst.msk [vmem:[#allocation3 + $0xb0] sm:$0xff] %vm2839_vm0, %v2788_v21 }
 0x4f4   : > { %2861 = vst.msk [vmem:[#allocation3 + $0xa8] sm:$0xff] %vm2839_vm0, %v2786_v59  ;;  %3353 = vrot.lane.b32.xlu0 %v6336_v18, %s4700_s28  ;;  %v3466_v18 = vld [vmem:[#allocation2 + $0xd9] sm:$0xff] }
 0x4f5   : > { %3351 = vrot.lane.b32.xlu1 %v6320_v40, %s4700_s28 }
 0x4f6   : > { %v2792_v2 = vpop.permute.xlu0 %2791 }
 0x4f7   : > { %v2790_v41 = vpop.permute.xlu1 %2789  ;;  %2864 = vst.msk [vmem:[#allocation3 + $0xc0] sm:$0xff] %vm2839_vm0, %v2792_v2  ;;  %v3475_v2 = vld [vmem:[#allocation2 + $0x141] sm:$0xff] }
 0x4f8   : > { %2863 = vst.msk [vmem:[#allocation3 + $0xb8] sm:$0xff] %vm2839_vm0, %v2790_v41  ;;  %3542 = vrot.lane.b32.xlu0 %v2887_v28, %s4693_s10 }
 0x4f9   : > { %3540 = vrot.lane.b32.xlu1 %v2886_v63, %s4693_s10 }
 0x4fa   : > { %v2796_v16 = vpop.permute.xlu0 %2795 }
 0x4fb   : > { %v2794_v23 = vpop.permute.xlu1 %2793  ;;  %2866 = vst.msk [vmem:[#allocation3 + $0xd0] sm:$0xff] %vm2839_vm0, %v2796_v16 }
 0x4fc   : > { %2865 = vst.msk [vmem:[#allocation3 + $0xc8] sm:$0xff] %vm2839_vm0, %v2794_v23  ;;  %3546 = vrot.lane.b32.xlu0 %v3467_v11, %s4693_s10 }
 0x4fd   : > { %3544 = vrot.lane.b32.xlu1 %v3466_v18, %s4693_s10 }
 0x4fe   : > { %v2800_v40 = vpop.permute.xlu0 %2799 }
 0x4ff   : > { %v2798_v34 = vpop.permute.xlu1 %2797  ;;  %2868 = vst.msk [vmem:[#allocation3 + $0xe0] sm:$0xff] %vm2839_vm0, %v2800_v40 }
 0x500   : > { %2867 = vst.msk [vmem:[#allocation3 + $0xd8] sm:$0xff] %vm2839_vm0, %v2798_v34  ;;  %3735 = vrot.lane.b32.xlu0 %v6484_v50, %s4701_s12  ;;  %v3667_v34 = vld [vmem:[#allocation2 + $0x13a] sm:$0xff] }
 0x501   : > { %3733 = vrot.lane.b32.xlu1 %v6471_v54, %s4701_s12 }
 0x502   : > { %v2947_v36 = vpop.permute.xlu0 %2946 }
 0x503   : > { %v2945_v53 = vpop.permute.xlu1 %2944  ;;  %3038 = vst.msk [vmem:[#allocation3 + $0x28] sm:$0xff] %vm3032_vm3, %v2947_v36 }
 0x504   : > { %3037 = vst.msk [vmem:[#allocation3 + $0x20] sm:$0xff] %vm3032_vm3, %v2945_v53  ;;  %3739 = vrot.lane.b32.xlu0 %v6493_v35, %s4701_s12 }
 0x505   : > { %3737 = vrot.lane.b32.xlu1 %v6480_v46, %s4701_s12 }
 0x506   : > { %v2951_v37 = vpop.permute.xlu0 %2950 }
 0x507   : > { %v2949_v9 = vpop.permute.xlu1 %2948  ;;  %3040 = vst.msk [vmem:[#allocation3 + $0x38] sm:$0xff] %vm3032_vm3, %v2951_v37 }
 0x508   : > { %3039 = vst.msk [vmem:[#allocation3 + $0x30] sm:$0xff] %vm3032_vm3, %v2949_v9  ;;  %2970 = vrot.lane.b32.xlu0 %v3467_v11, %s4698_s20 }
 0x509   : > { %2968 = vrot.lane.b32.xlu1 %v3466_v18, %s4698_s20  ;;  %v3668_v18 = vld [vmem:[#allocation2 + $0x142] sm:$0xff] }
 0x50a   : > { %v3140_v54 = vpop.permute.xlu0 %3139 }
 0x50b   : > { %v3138_v50 = vpop.permute.xlu1 %3137  ;;  %3231 = vst.msk [vmem:[#allocation3 + $0x28] sm:$0xff] %vm3225_vm9, %v3140_v54 }
 0x50c   : > { %3230 = vst.msk [vmem:[#allocation3 + $0x20] sm:$0xff] %vm3225_vm9, %v3138_v50  ;;  %2974 = vrot.lane.b32.xlu0 %v2891_v49, %s4698_s20 }
 0x50d   : > { %2972 = vrot.lane.b32.xlu1 %v2890_v44, %s4698_s20 }
 0x50e   : > { %v3144_v33 = vpop.permute.xlu0 %3143 }
 0x50f   : > { %v3142_v14 = vpop.permute.xlu1 %3141  ;;  %3233 = vst.msk [vmem:[#allocation3 + $0x38] sm:$0xff] %vm3225_vm9, %v3144_v33  ;;  %v2899_v33 = vld [vmem:[#allocation2 + $0x159] sm:$0xff] }
 0x510   : > { %3232 = vst.msk [vmem:[#allocation3 + $0x30] sm:$0xff] %vm3225_vm9, %v3142_v14  ;;  %3163 = vrot.lane.b32.xlu0 %v6493_v35, %s4699_s23  ;;  %v2898_v14 = vld [vmem:[#allocation2 + $0x151] sm:$0xff] }
 0x511   : > { %3161 = vrot.lane.b32.xlu1 %v6480_v46, %s4699_s23 }
 0x512   : > { %v3334_v3 = vpop.permute.xlu0 %3333 }
 0x513   : > { %v3332_v15 = vpop.permute.xlu1 %3331  ;;  %3425 = vst.msk [vmem:[#allocation3 + $0x28] sm:$0xff] %vm3419_vm10, %v3334_v3 }
 0x514   : > { %3424 = vst.msk [vmem:[#allocation3 + $0x20] sm:$0xff] %vm3419_vm10, %v3332_v15  ;;  %3167 = vrot.lane.b32.xlu0 %v6503_v29, %s4699_s23 }
 0x515   : > { %3165 = vrot.lane.b32.xlu1 %v6489_v38, %s4699_s23 }
 0x516   : > { %v3338_v58 = vpop.permute.xlu0 %3337 }
 0x517   : > { %v3336_v19 = vpop.permute.xlu1 %3335  ;;  %3427 = vst.msk [vmem:[#allocation3 + $0x38] sm:$0xff] %vm3419_vm10, %v3338_v58 }
 0x518   : > { %3426 = vst.msk [vmem:[#allocation3 + $0x30] sm:$0xff] %vm3419_vm10, %v3336_v19  ;;  %3357 = vrot.lane.b32.xlu0 %v6327_v32, %s4700_s28 }
 0x519   : > { %3355 = vrot.lane.b32.xlu1 %v6315_v45, %s4700_s28 }
 0x51a   : > { %v3527_v46 = vpop.permute.xlu0 %3526 }
 0x51b   : > { %v3525_v35 = vpop.permute.xlu1 %3524  ;;  %3618 = vst.msk [vmem:[#allocation3 + $0x28] sm:$0xff] %vm3612_vm11, %v3527_v46  ;;  %v3092_v46 = vld [vmem:[#allocation2 + $0x15a] sm:$0xff] }
 0x51c   : > { %3617 = vst.msk [vmem:[#allocation3 + $0x20] sm:$0xff] %vm3612_vm11, %v3525_v35  ;;  %3361 = vrot.lane.b32.xlu0 %v6368_v8, %s4700_s28  ;;  %v3470_v8 = vld [vmem:[#allocation2 + $0x109] sm:$0xff]  ;;  %v3091_v35 = vld [vmem:[#allocation2 + $0x152] sm:$0xff] }
 0x51d   : > { %3359 = vrot.lane.b32.xlu1 %v6352_v52, %s4700_s28 }
 0x51e   : > { %v3531_v27 = vpop.permute.xlu0 %3530 }
 0x51f   : > { %v3529_v56 = vpop.permute.xlu1 %3528  ;;  %3620 = vst.msk [vmem:[#allocation3 + $0x38] sm:$0xff] %vm3612_vm11, %v3531_v27 }
 0x520   : > { %3619 = vst.msk [vmem:[#allocation3 + $0x30] sm:$0xff] %vm3612_vm11, %v3529_v56  ;;  %3550 = vrot.lane.b32.xlu0 %v2891_v49, %s4693_s10 }
 0x521   : > { %3548 = vrot.lane.b32.xlu1 %v2890_v44, %s4693_s10 }
 0x522   : > { %v3720_v45 = vpop.permute.xlu0 %3719 }
 0x523   : > { %v3718_v32 = vpop.permute.xlu1 %3717  ;;  %3811 = vst.msk [vmem:[#allocation3 + $0x28] sm:$0xff] %vm3805_vm12, %v3720_v45  ;;  %v3284_v45 = vld [vmem:[#allocation2 + $0x158] sm:$0xff] }
 0x524   : > { %3810 = vst.msk [vmem:[#allocation3 + $0x20] sm:$0xff] %vm3805_vm12, %v3718_v32  ;;  %3554 = vrot.lane.b32.xlu0 %v3471_v60, %s4693_s10  ;;  %v3283_v32 = vld [vmem:[#allocation2 + $0x150] sm:$0xff] }
 0x525   : > { %3552 = vrot.lane.b32.xlu1 %v3470_v8, %s4693_s10 }
 0x526   : > { %v3724_v52 = vpop.permute.xlu0 %3723 }
 0x527   : > { %v3722_v22 = vpop.permute.xlu1 %3721  ;;  %3813 = vst.msk [vmem:[#allocation3 + $0x38] sm:$0xff] %vm3805_vm12, %v3724_v52  ;;  %v3286_v52 = vld [vmem:[#allocation2 + $0x170] sm:$0xff] }
 0x528   : > { %3812 = vst.msk [vmem:[#allocation3 + $0x30] sm:$0xff] %vm3805_vm12, %v3722_v22  ;;  %3743 = vrot.lane.b32.xlu0 %v6503_v29, %s4701_s12  ;;  %v3285_v22 = vld [vmem:[#allocation2 + $0x168] sm:$0xff] }
 0x529   : > { %3741 = vrot.lane.b32.xlu1 %v6489_v38, %s4701_s12 }
 0x52a   : > { %v2955_v39 = vpop.permute.xlu0 %2954  ;;  %v3843_v13 = vld [vmem:[#allocation3 + $0x28] sm:$0xff] }
 0x52b   : > { %v2953_v47 = vpop.permute.xlu1 %2952  ;;  %3042 = vst.msk [vmem:[#allocation3 + $0x48] sm:$0xff] %vm3032_vm3, %v2955_v39  ;;  %v3842_v61 = vld [vmem:[#allocation3 + $0x20] sm:$0xff] }
 0x52c   : > { %3041 = vst.msk [vmem:[#allocation3 + $0x40] sm:$0xff] %vm3032_vm3, %v2953_v47  ;;  %3747 = vrot.lane.b32.xlu0 %v6509_v7, %s4701_s12  ;;  %v3872_v62 = vpack.c.bf16 %v3843_v13, %v3842_v61 }
 0x52d   : > { %3745 = vrot.lane.b32.xlu1 %v6498_v0, %s4701_s12  ;;  %v2895_v0 = vld [vmem:[#allocation2 + $0x129] sm:$0xff] }
 0x52e   : > { %4566 = vmatprep.mubr.msk.bf16.mxu1 %vm3941_vm14, %v3872_v62  ;;  %v2959_v29 = vpop.permute.xlu0 %2958  ;;  %v3845_v38 = vld [vmem:[#allocation3 + $0x38] sm:$0xff]  ;;  %v3479_v62 = vld [vmem:[#allocation2 + $0x171] sm:$0xff] }
 0x52f   : > { %v2957_v57 = vpop.permute.xlu1 %2956  ;;  %3044 = vst.msk [vmem:[#allocation3 + $0x58] sm:$0xff] %vm3032_vm3, %v2959_v29  ;;  %v3844_v12 = vld [vmem:[#allocation3 + $0x30] sm:$0xff]  ;;  %v3478_v29 = vld [vmem:[#allocation2 + $0x169] sm:$0xff] }
 0x530   : > { %3043 = vst.msk [vmem:[#allocation3 + $0x50] sm:$0xff] %vm3032_vm3, %v2957_v57  ;;  %2978 = vrot.lane.b32.xlu0 %v3471_v60, %s4698_s20  ;;  %v3873_v20 = vpack.c.bf16 %v3845_v38, %v3844_v12 }
 0x531   : > { %2976 = vrot.lane.b32.xlu1 %v3470_v8, %s4698_s20 }
 0x532   : > { %4567 = vmatmul.mubr.msk.bf16.vlgmr.msra.gmra.mxu1 %vm3941_vm14, %v3873_v20  ;;  %v3148_v7 = vpop.permute.xlu0 %3147 }
 0x533   : > { %v3146_v48 = vpop.permute.xlu1 %3145  ;;  %3235 = vst.msk [vmem:[#allocation3 + $0x48] sm:$0xff] %vm3225_vm9, %v3148_v7 }
 0x534   : > { %3234 = vst.msk [vmem:[#allocation3 + $0x40] sm:$0xff] %vm3225_vm9, %v3146_v48  ;;  %2982 = vrot.lane.b32.xlu0 %v2895_v0, %s4698_s20  ;;  %v6922_v48 = vld [vmem:[#allocation2 + $0x172] sm:$0xff] }
 0x535   : > { %2980 = vrot.lane.b32.xlu1 %v2894_v25, %s4698_s20 }
 0x536   : > { %v3152_v51 = vpop.permute.xlu0 %3151 }
 0x537   : > { %v3150_v42 = vpop.permute.xlu1 %3149  ;;  %3237 = vst.msk [vmem:[#allocation3 + $0x58] sm:$0xff] %vm3225_vm9, %v3152_v51 }
 0x538   : > { %3236 = vst.msk [vmem:[#allocation3 + $0x50] sm:$0xff] %vm3225_vm9, %v3150_v42  ;;  %3171 = vrot.lane.b32.xlu0 %v3086_v1, %s4699_s23 }
 0x539   : > { %3169 = vrot.lane.b32.xlu1 %v3085_v10, %s4699_s23 }
 0x53a   : > { %v3342_v28 = vpop.permute.xlu0 %3341 }
 0x53b   : > { %v3340_v63 = vpop.permute.xlu1 %3339  ;;  %3429 = vst.msk [vmem:[#allocation3 + $0x48] sm:$0xff] %vm3419_vm10, %v3342_v28  ;;  %v6930_v28 = vld [vmem:[#allocation2 + $0x180] sm:$0xff] }
 0x53c   : > { %3428 = vst.msk [vmem:[#allocation3 + $0x40] sm:$0xff] %vm3419_vm10, %v3340_v63  ;;  %3175 = vrot.lane.b32.xlu0 %v3088_v4, %s4699_s23 }
 0x53d   : > { %3173 = vrot.lane.b32.xlu1 %v3087_v17, %s4699_s23 }
 0x53e   : > { %v3346_v24 = vpop.permute.xlu0 %3345 }
 0x53f   : > { %v3344_v6 = vpop.permute.xlu1 %3343  ;;  %3431 = vst.msk [vmem:[#allocation3 + $0x58] sm:$0xff] %vm3419_vm10, %v3346_v24 }
 0x540   : > { %3430 = vst.msk [vmem:[#allocation3 + $0x50] sm:$0xff] %vm3419_vm10, %v3344_v6  ;;  %3365 = vrot.lane.b32.xlu0 %v6359_v43, %s4700_s28  ;;  %v2872_v6 = vld [vmem:[#allocation2 + $0x19] sm:$0xff] }
 0x541   : > { %3363 = vrot.lane.b32.xlu1 %v6347_v30, %s4700_s28 }
 0x542   : > { %v3535_v55 = vpop.permute.xlu0 %3534 }
 0x543   : > { %v3533_v5 = vpop.permute.xlu1 %3532  ;;  %3622 = vst.msk [vmem:[#allocation3 + $0x48] sm:$0xff] %vm3612_vm11, %v3535_v55  ;;  %v6939_v55 = vld [vmem:[#allocation2 + $0x188] sm:$0xff] }
 0x544   : > { %3621 = vst.msk [vmem:[#allocation3 + $0x40] sm:$0xff] %vm3612_vm11, %v3533_v5  ;;  %3369 = vrot.lane.b32.xlu0 %v6394_v31, %s4700_s28  ;;  %v3474_v31 = vld [vmem:[#allocation2 + $0x139] sm:$0xff] }
 0x545   : > { %3367 = vrot.lane.b32.xlu1 %v6383_v26, %s4700_s28 }
 0x546   : > { %v3539_v21 = vpop.permute.xlu0 %3538 }
 0x547   : > { %v3537_v59 = vpop.permute.xlu1 %3536  ;;  %3624 = vst.msk [vmem:[#allocation3 + $0x58] sm:$0xff] %vm3612_vm11, %v3539_v21 }
 0x548   : > { %3623 = vst.msk [vmem:[#allocation3 + $0x50] sm:$0xff] %vm3612_vm11, %v3537_v59  ;;  %3558 = vrot.lane.b32.xlu0 %v2895_v0, %s4693_s10  ;;  %v2873_v59 = vld [vmem:[#allocation2 + $0x21] sm:$0xff] }
 0x549   : > { %3556 = vrot.lane.b32.xlu1 %v2894_v25, %s4693_s10  ;;  %v3671_v25 = vld [vmem:[#allocation2 + $0x16a] sm:$0xff] }
 0x54a   : > { %v3728_v30 = vpop.permute.xlu0 %3727 }
 0x54b   : > { %v3726_v43 = vpop.permute.xlu1 %3725  ;;  %3815 = vst.msk [vmem:[#allocation3 + $0x48] sm:$0xff] %vm3805_vm12, %v3728_v30 }
 0x54c   : > { %3814 = vst.msk [vmem:[#allocation3 + $0x40] sm:$0xff] %vm3805_vm12, %v3726_v43  ;;  %3562 = vrot.lane.b32.xlu0 %v3475_v2, %s4693_s10 }
 0x54d   : > { %3560 = vrot.lane.b32.xlu1 %v3474_v31, %s4693_s10 }
 0x54e   : > { %v3732_v26 = vpop.permute.xlu0 %3731 }
 0x54f   : > { %v3730_v41 = vpop.permute.xlu1 %3729  ;;  %3817 = vst.msk [vmem:[#allocation3 + $0x58] sm:$0xff] %vm3805_vm12, %v3732_v26 }
 0x550   : > { %3816 = vst.msk [vmem:[#allocation3 + $0x50] sm:$0xff] %vm3805_vm12, %v3730_v41  ;;  %3751 = vrot.lane.b32.xlu0 %v3088_v4, %s4701_s12  ;;  %v6956_v41 = vld [vmem:[#allocation2 + $0x181] sm:$0xff] }
 0x551   : > { %3749 = vrot.lane.b32.xlu1 %v3087_v17, %s4701_s12 }
 0x552   : > { %v2963_v16 = vpop.permute.xlu0 %2962  ;;  %v3847_v23 = vld [vmem:[#allocation3 + $0x48] sm:$0xff] }
 0x553   : > { %v2961_v11 = vpop.permute.xlu1 %2960  ;;  %3046 = vst.msk [vmem:[#allocation3 + $0x68] sm:$0xff] %vm3032_vm3, %v2963_v16  ;;  %v3846_v40 = vld [vmem:[#allocation3 + $0x40] sm:$0xff]  ;;  %v6959_v16 = vld [vmem:[#allocation2 + $0x39] sm:$0xff] }
 0x554   : > { %3045 = vst.msk [vmem:[#allocation3 + $0x60] sm:$0xff] %vm3032_vm3, %v2961_v11  ;;  %3755 = vrot.lane.b32.xlu0 %v3668_v18, %s4701_s12  ;;  %v3874_v36 = vpack.c.bf16 %v3847_v23, %v3846_v40  ;;  %v6967_v40 = vld [vmem:[#allocation2 + $0x189] sm:$0xff] }
 0x555   : > { %3753 = vrot.lane.b32.xlu1 %v3667_v34, %s4701_s12 }
 0x556   : > { %4570 = vmatprep.mubr.msk.bf16.mxu1 %vm3941_vm14, %v3874_v36  ;;  %v2967_v53 = vpop.permute.xlu0 %2966  ;;  %v3849_v37 = vld [vmem:[#allocation3 + $0x58] sm:$0xff] }
 0x557   : > { %v2965_v9 = vpop.permute.xlu1 %2964  ;;  %3048 = vst.msk [vmem:[#allocation3 + $0x78] sm:$0xff] %vm3032_vm3, %v2967_v53  ;;  %v3848_v54 = vld [vmem:[#allocation3 + $0x50] sm:$0xff] }
 0x558   : > { %3047 = vst.msk [vmem:[#allocation3 + $0x70] sm:$0xff] %vm3032_vm3, %v2965_v9  ;;  %2986 = vrot.lane.b32.xlu0 %v3475_v2, %s4698_s20  ;;  %v3875_v50 = vpack.c.bf16 %v3849_v37, %v3848_v54  ;;  %v6949_v2 = vld [vmem:[#allocation2 + $0x31] sm:$0xff]  ;;  %v3066_v53 = vld [vmem:[#allocation2 + $0x22] sm:$0xff] }
 0x559   : > { %2984 = vrot.lane.b32.xlu1 %v3474_v31, %s4698_s20  ;;  %v6977_v54 = vld [vmem:[#allocation2 + $0x32] sm:$0xff] }
 0x55a   : > { %4571 = vmatmul.mubr.msk.bf16.gmra.mxu1 %vm3941_vm14, %v3875_v50  ;;  %v3156_v49 = vpop.permute.xlu0 %3155 }
 0x55b   : > { %v3154_v44 = vpop.permute.xlu1 %3153  ;;  %3239 = vst.msk [vmem:[#allocation3 + $0x68] sm:$0xff] %vm3225_vm9, %v3156_v49 }
 0x55c   : > { %3238 = vst.msk [vmem:[#allocation3 + $0x60] sm:$0xff] %vm3225_vm9, %v3154_v44  ;;  %2990 = vrot.lane.b32.xlu0 %v2899_v33, %s4698_s20  ;;  %v6985_v44 = vld [vmem:[#allocation2 + $0x182] sm:$0xff] }
 0x55d   : > { %2988 = vrot.lane.b32.xlu1 %v2898_v14, %s4698_s20 }
 0x55e   : > { %v3160_v3 = vpop.permute.xlu0 %3159 }
 0x55f   : > { %v3158_v15 = vpop.permute.xlu1 %3157  ;;  %3241 = vst.msk [vmem:[#allocation3 + $0x78] sm:$0xff] %vm3225_vm9, %v3160_v3 }
 0x560   : > { %3240 = vst.msk [vmem:[#allocation3 + $0x70] sm:$0xff] %vm3225_vm9, %v3158_v15  ;;  %3179 = vrot.lane.b32.xlu0 %v3668_v18, %s4699_s23  ;;  %v3065_v18 = vld [vmem:[#allocation2 + $0x1a] sm:$0xff] }
 0x561   : > { %3177 = vrot.lane.b32.xlu1 %v3667_v34, %s4699_s23 }
 0x562   : > { %v3350_v58 = vpop.permute.xlu0 %3349 }
 0x563   : > { %v3348_v19 = vpop.permute.xlu1 %3347  ;;  %3433 = vst.msk [vmem:[#allocation3 + $0x68] sm:$0xff] %vm3419_vm10, %v3350_v58  ;;  %v3259_v58 = vld [vmem:[#allocation2 + $0x30] sm:$0xff] }
 0x564   : > { %3432 = vst.msk [vmem:[#allocation3 + $0x60] sm:$0xff] %vm3419_vm10, %v3348_v19  ;;  %3183 = vrot.lane.b32.xlu0 %v3092_v46, %s4699_s23 }
 0x565   : > { %3181 = vrot.lane.b32.xlu1 %v3091_v35, %s4699_s23 }
 0x566   : > { %v3354_v27 = vpop.permute.xlu0 %3353 }
 0x567   : > { %v3352_v56 = vpop.permute.xlu1 %3351  ;;  %3435 = vst.msk [vmem:[#allocation3 + $0x78] sm:$0xff] %vm3419_vm10, %v3354_v27 }
 0x568   : > { %3434 = vst.msk [vmem:[#allocation3 + $0x70] sm:$0xff] %vm3419_vm10, %v3352_v56  ;;  %3373 = vrot.lane.b32.xlu0 %v3284_v45, %s4700_s28 }
 0x569   : > { %3371 = vrot.lane.b32.xlu1 %v3283_v32, %s4700_s28 }
 0x56a   : > { %v3543_v60 = vpop.permute.xlu0 %3542 }
 0x56b   : > { %v3541_v8 = vpop.permute.xlu1 %3540  ;;  %3626 = vst.msk [vmem:[#allocation3 + $0x68] sm:$0xff] %vm3612_vm11, %v3543_v60  ;;  %v3260_v60 = vld [vmem:[#allocation2 + $0x38] sm:$0xff] }
 0x56c   : > { %3625 = vst.msk [vmem:[#allocation3 + $0x60] sm:$0xff] %vm3612_vm11, %v3541_v8  ;;  %3377 = vrot.lane.b32.xlu0 %v3286_v52, %s4700_s28 }
 0x56d   : > { %3375 = vrot.lane.b32.xlu1 %v3285_v22, %s4700_s28 }
 0x56e   : > { %v3547_v39 = vpop.permute.xlu0 %3546 }
 0x56f   : > { %v3545_v13 = vpop.permute.xlu1 %3544  ;;  %3628 = vst.msk [vmem:[#allocation3 + $0x78] sm:$0xff] %vm3612_vm11, %v3547_v39  ;;  %v3261_v39 = vld [vmem:[#allocation2 + $0x48] sm:$0xff] }
 0x570   : > { %3627 = vst.msk [vmem:[#allocation3 + $0x70] sm:$0xff] %vm3612_vm11, %v3545_v13  ;;  %3566 = vrot.lane.b32.xlu0 %v2899_v33, %s4693_s10  ;;  %v6988_v33 = vld [vmem:[#allocation2 + $0x3a] sm:$0xff] }
 0x571   : > { %3564 = vrot.lane.b32.xlu1 %v2898_v14, %s4693_s10  ;;  %v3289_v13 = vld [vmem:[#allocation2 + $0x198] sm:$0xff] }
 0x572   : > { %v3736_v47 = vpop.permute.xlu0 %3735 }
 0x573   : > { %v3734_v61 = vpop.permute.xlu1 %3733  ;;  %3819 = vst.msk [vmem:[#allocation3 + $0x68] sm:$0xff] %vm3805_vm12, %v3736_v47 }
 0x574   : > { %3818 = vst.msk [vmem:[#allocation3 + $0x60] sm:$0xff] %vm3805_vm12, %v3734_v61  ;;  %3570 = vrot.lane.b32.xlu0 %v3479_v62, %s4693_s10 }
 0x575   : > { %3568 = vrot.lane.b32.xlu1 %v3478_v29, %s4693_s10 }
 0x576   : > { %v3740_v38 = vpop.permute.xlu0 %3739 }
 0x577   : > { %v3738_v57 = vpop.permute.xlu1 %3737  ;;  %3821 = vst.msk [vmem:[#allocation3 + $0x78] sm:$0xff] %vm3805_vm12, %v3740_v38  ;;  %v3290_v38 = vld [vmem:[#allocation2 + $0x1a0] sm:$0xff] }
 0x578   : > { %3820 = vst.msk [vmem:[#allocation3 + $0x70] sm:$0xff] %vm3805_vm12, %v3738_v57  ;;  %3759 = vrot.lane.b32.xlu0 %v3092_v46, %s4701_s12  ;;  %v6996_v46 = vld [vmem:[#allocation2 + $0x18a] sm:$0xff] }
 0x579   : > { %3757 = vrot.lane.b32.xlu1 %v3091_v35, %s4701_s12 }
 0x57a   : > { %v2971_v12 = vpop.permute.xlu0 %2970  ;;  %v3851_v20 = vld [vmem:[#allocation3 + $0x68] sm:$0xff] }
 0x57b   : > { %v2969_v7 = vpop.permute.xlu1 %2968  ;;  %3050 = vst.msk [vmem:[#allocation3 + $0x88] sm:$0xff] %vm3032_vm3, %v2971_v12  ;;  %v3850_v0 = vld [vmem:[#allocation3 + $0x60] sm:$0xff] }
 0x57c   : > { %3049 = vst.msk [vmem:[#allocation3 + $0x80] sm:$0xff] %vm3032_vm3, %v2969_v7  ;;  %3763 = vrot.lane.b32.xlu0 %v6922_v48, %s4701_s12  ;;  %v3876_v51 = vpack.c.bf16 %v3851_v20, %v3850_v0  ;;  %v3454_v0 = vld [vmem:[#allocation2 + $0x49] sm:$0xff] }
 0x57d   : > { %3761 = vrot.lane.b32.xlu1 %v3671_v25, %s4701_s12 }
 0x57e   : > { %4574 = vmatprep.mubr.msk.bf16.mxu1 %vm3941_vm14, %v3876_v51  ;;  %v2975_v42 = vpop.permute.xlu0 %2974  ;;  %v3853_v1 = vld [vmem:[#allocation3 + $0x78] sm:$0xff] }
 0x57f   : > { %v2973_v10 = vpop.permute.xlu1 %2972  ;;  %3052 = vst.msk [vmem:[#allocation3 + $0x98] sm:$0xff] %vm3032_vm3, %v2975_v42  ;;  %v3852_v63 = vld [vmem:[#allocation3 + $0x70] sm:$0xff] }
 0x580   : > { %3051 = vst.msk [vmem:[#allocation3 + $0x90] sm:$0xff] %vm3032_vm3, %v2973_v10  ;;  %2803 = vrot.lane.b32.xlu0 %v6930_v28, %s4697_s19  ;;  %v3877_v4 = vpack.c.bf16 %v3853_v1, %v3852_v63  ;;  %v3455_v1 = vld [vmem:[#allocation2 + $0x51] sm:$0xff] }
 0x581   : > { %2801 = vrot.lane.b32.xlu1 %v3286_v52, %s4697_s19 }
 0x582   : > { %4575 = vmatmul.mubr.msk.bf16.gmra.mxu1 %vm3941_vm14, %v3877_v4  ;;  %v3164_v17 = vpop.permute.xlu0 %3163 }
 0x583   : > { %v3162_v24 = vpop.permute.xlu1 %3161  ;;  %3243 = vst.msk [vmem:[#allocation3 + $0x88] sm:$0xff] %vm3225_vm9, %v3164_v17 }
 0x584   : > { %3242 = vst.msk [vmem:[#allocation3 + $0x80] sm:$0xff] %vm3225_vm9, %v3162_v24  ;;  %2936 = vrot.lane.b32.xlu0 %v2872_v6, %s4698_s20 }
 0x585   : > { %2805 = vrot.lane.b32.xlu1 %v6939_v55, %s4697_s19 }
 0x586   : > { %v3168_v5 = vpop.permute.xlu0 %3167 }
 0x587   : > { %v3166_v21 = vpop.permute.xlu1 %3165  ;;  %3245 = vst.msk [vmem:[#allocation3 + $0x98] sm:$0xff] %vm3225_vm9, %v3168_v5  ;;  %v3647_v5 = vld [vmem:[#allocation2 + $0x4a] sm:$0xff] }
 0x588   : > { %3244 = vst.msk [vmem:[#allocation3 + $0x90] sm:$0xff] %vm3225_vm9, %v3166_v21  ;;  %2992 = vrot.lane.b32.xlu0 %v3478_v29, %s4698_s20 }
 0x589   : > { %2938 = vrot.lane.b32.xlu1 %v2873_v59, %s4698_s20 }
 0x58a   : > { %v3358_v30 = vpop.permute.xlu0 %3357 }
 0x58b   : > { %v3356_v43 = vpop.permute.xlu1 %3355  ;;  %3437 = vst.msk [vmem:[#allocation3 + $0x88] sm:$0xff] %vm3419_vm10, %v3358_v30  ;;  %v3675_v30 = vld [vmem:[#allocation2 + $0x19a] sm:$0xff] }
 0x58c   : > { %3436 = vst.msk [vmem:[#allocation3 + $0x80] sm:$0xff] %vm3419_vm10, %v3356_v43  ;;  %2940 = vrot.lane.b32.xlu0 %v6949_v2, %s4698_s20 }
 0x58d   : > { %2994 = vrot.lane.b32.xlu1 %v3479_v62, %s4698_s20  ;;  %v3262_v62 = vld [vmem:[#allocation2 + $0x50] sm:$0xff] }
 0x58e   : > { %v3362_v31 = vpop.permute.xlu0 %3361 }
 0x58f   : > { %v3360_v26 = vpop.permute.xlu1 %3359  ;;  %3439 = vst.msk [vmem:[#allocation3 + $0x98] sm:$0xff] %vm3419_vm10, %v3362_v31 }
 0x590   : > { %3438 = vst.msk [vmem:[#allocation3 + $0x90] sm:$0xff] %vm3419_vm10, %v3360_v26  ;;  %2996 = vrot.lane.b32.xlu0 %v6956_v41, %s4698_s20 }
 0x591   : > { %2942 = vrot.lane.b32.xlu1 %v6959_v16, %s4698_s20 }
 0x592   : > { %v3551_v23 = vpop.permute.xlu0 %3550 }
 0x593   : > { %v3549_v11 = vpop.permute.xlu1 %3548  ;;  %3630 = vst.msk [vmem:[#allocation3 + $0x88] sm:$0xff] %vm3612_vm11, %v3551_v23 }
 0x594   : > { %3629 = vst.msk [vmem:[#allocation3 + $0x80] sm:$0xff] %vm3612_vm11, %v3549_v11  ;;  %3129 = vrot.lane.b32.xlu0 %v3065_v18, %s4699_s23  ;;  %v3676_v11 = vld [vmem:[#allocation2 + $0x1a2] sm:$0xff] }
 0x595   : > { %2998 = vrot.lane.b32.xlu1 %v6967_v40, %s4698_s20 }
 0x596   : > { %v3555_v34 = vpop.permute.xlu0 %3554 }
 0x597   : > { %v3553_v36 = vpop.permute.xlu1 %3552  ;;  %3632 = vst.msk [vmem:[#allocation3 + $0x98] sm:$0xff] %vm3612_vm11, %v3555_v34 }
 0x598   : > { %3631 = vst.msk [vmem:[#allocation3 + $0x90] sm:$0xff] %vm3612_vm11, %v3553_v36  ;;  %3185 = vrot.lane.b32.xlu0 %v3671_v25, %s4699_s23  ;;  %v3482_v25 = vld [vmem:[#allocation2 + $0x199] sm:$0xff] }
 0x599   : > { %3131 = vrot.lane.b32.xlu1 %v3066_v53, %s4699_s23 }
 0x59a   : > { %v3744_v37 = vpop.permute.xlu0 %3743 }
 0x59b   : > { %v3742_v9 = vpop.permute.xlu1 %3741  ;;  %3823 = vst.msk [vmem:[#allocation3 + $0x88] sm:$0xff] %vm3805_vm12, %v3744_v37 }
 0x59c   : > { %3822 = vst.msk [vmem:[#allocation3 + $0x80] sm:$0xff] %vm3805_vm12, %v3742_v9  ;;  %3133 = vrot.lane.b32.xlu0 %v6977_v54, %s4699_s23 }
 0x59d   : > { %3187 = vrot.lane.b32.xlu1 %v6922_v48, %s4699_s23 }
 0x59e   : > { %v3748_v50 = vpop.permute.xlu0 %3747 }
 0x59f   : > { %v3746_v49 = vpop.permute.xlu1 %3745  ;;  %3825 = vst.msk [vmem:[#allocation3 + $0x98] sm:$0xff] %vm3805_vm12, %v3748_v50 }
 0x5a0   : > { %3824 = vst.msk [vmem:[#allocation3 + $0x90] sm:$0xff] %vm3805_vm12, %v3746_v49  ;;  %3189 = vrot.lane.b32.xlu0 %v6985_v44, %s4699_s23 }
 0x5a1   : > { %3135 = vrot.lane.b32.xlu1 %v6988_v33, %s4699_s23 }
 0x5a2   : > { %v2979_v14 = vpop.permute.xlu0 %2978  ;;  %v3855_v3 = vld [vmem:[#allocation3 + $0x88] sm:$0xff] }
 0x5a3   : > { %v2977_v15 = vpop.permute.xlu1 %2976  ;;  %3054 = vst.msk [vmem:[#allocation3 + $0xa8] sm:$0xff] %vm3032_vm3, %v2979_v14  ;;  %v3854_v19 = vld [vmem:[#allocation3 + $0x80] sm:$0xff] }
 0x5a4   : > { %3053 = vst.msk [vmem:[#allocation3 + $0xa0] sm:$0xff] %vm3032_vm3, %v2977_v15  ;;  %3323 = vrot.lane.b32.xlu0 %v3259_v58, %s4700_s28  ;;  %v3878_v35 = vpack.c.bf16 %v3855_v3, %v3854_v19  ;;  %v7079_v58 = vld [vmem:[%s7275_s3 + $0x2] ss:$0 sm:$0xff] }
 0x5a5   : > { %3191 = vrot.lane.b32.xlu1 %v6996_v46, %s4699_s23 }
 0x5a6   : > { %4578 = vmatprep.mubr.msk.bf16.mxu1 %vm3941_vm14, %v3878_v35  ;;  %v2983_v27 = vpop.permute.xlu0 %2982  ;;  %v3857_v56 = vld [vmem:[#allocation3 + $0x98] sm:$0xff] }
 0x5a7   : > { %v2981_v45 = vpop.permute.xlu1 %2980  ;;  %3056 = vst.msk [vmem:[#allocation3 + $0xb8] sm:$0xff] %vm3032_vm3, %v2983_v27  ;;  %v3856_v32 = vld [vmem:[#allocation3 + $0x90] sm:$0xff] }
 0x5a8   : > { %3055 = vst.msk [vmem:[#allocation3 + $0xb0] sm:$0xff] %vm3032_vm3, %v2981_v45  ;;  %3379 = vrot.lane.b32.xlu0 %v6930_v28, %s4700_s28  ;;  %v3879_v8 = vpack.c.bf16 %v3857_v56, %v3856_v32  ;;  %v3483_v28 = vld [vmem:[#allocation2 + $0x1a1] sm:$0xff] }
 0x5a9   : > { %3325 = vrot.lane.b32.xlu1 %v3260_v60, %s4700_s28 }
 0x5aa   : > { %4579 = vmatmul.mubr.msk.bf16.gmra.mxu1 %vm3941_vm14, %v3879_v8  ;;  %v3172_v52 = vpop.permute.xlu0 %3171 }
 0x5ab   : > { %v3170_v22 = vpop.permute.xlu1 %3169  ;;  %3247 = vst.msk [vmem:[#allocation3 + $0xa8] sm:$0xff] %vm3225_vm9, %v3172_v52 }
 0x5ac   : > { %3246 = vst.msk [vmem:[#allocation3 + $0xa0] sm:$0xff] %vm3225_vm9, %v3170_v22  ;;  %3327 = vrot.lane.b32.xlu0 %v3261_v39, %s4700_s28 }
 0x5ad   : > { %3381 = vrot.lane.b32.xlu1 %v6939_v55, %s4700_s28 }
 0x5ae   : > { %v3176_v47 = vpop.permute.xlu0 %3175 }
 0x5af   : > { %v3174_v61 = vpop.permute.xlu1 %3173  ;;  %3249 = vst.msk [vmem:[#allocation3 + $0xb8] sm:$0xff] %vm3225_vm9, %v3176_v47 }
 0x5b0   : > { %3248 = vst.msk [vmem:[#allocation3 + $0xb0] sm:$0xff] %vm3225_vm9, %v3174_v61  ;;  %3383 = vrot.lane.b32.xlu0 %v3289_v13, %s4700_s28 }
 0x5b1   : > { %3329 = vrot.lane.b32.xlu1 %v3262_v62, %s4700_s28 }
 0x5b2   : > { %v3366_v29 = vpop.permute.xlu0 %3365 }
 0x5b3   : > { %v3364_v57 = vpop.permute.xlu1 %3363  ;;  %3441 = vst.msk [vmem:[#allocation3 + $0xa8] sm:$0xff] %vm3419_vm10, %v3366_v29 }
 0x5b4   : > { %3440 = vst.msk [vmem:[#allocation3 + $0xa0] sm:$0xff] %vm3419_vm10, %v3364_v57  ;;  %3516 = vrot.lane.b32.xlu0 %v6949_v2, %s4693_s10 }
 0x5b5   : > { %3385 = vrot.lane.b32.xlu1 %v3290_v38, %s4700_s28 }
 0x5b6   : > { %v3370_v12 = vpop.permute.xlu0 %3369 }
 0x5b7   : > { %v3368_v20 = vpop.permute.xlu1 %3367  ;;  %3443 = vst.msk [vmem:[#allocation3 + $0xb8] sm:$0xff] %vm3419_vm10, %v3370_v12 }
 0x5b8   : > { %3442 = vst.msk [vmem:[#allocation3 + $0xb0] sm:$0xff] %vm3419_vm10, %v3368_v20  ;;  %3572 = vrot.lane.b32.xlu0 %v6956_v41, %s4693_s10  ;;  %v3648_v41 = vld [vmem:[#allocation2 + $0x52] sm:$0xff] }
 0x5b9   : > { %3518 = vrot.lane.b32.xlu1 %v6959_v16, %s4693_s10 }
 0x5ba   : > { %v3559_v7 = vpop.permute.xlu0 %3558 }
 0x5bb   : > { %v3557_v48 = vpop.permute.xlu1 %3556  ;;  %3634 = vst.msk [vmem:[#allocation3 + $0xa8] sm:$0xff] %vm3612_vm11, %v3559_v7 }
 0x5bc   : > { %3633 = vst.msk [vmem:[#allocation3 + $0xa0] sm:$0xff] %vm3612_vm11, %v3557_v48  ;;  %3520 = vrot.lane.b32.xlu0 %v3454_v0, %s4693_s10 }
 0x5bd   : > { %3574 = vrot.lane.b32.xlu1 %v6967_v40, %s4693_s10 }
 0x5be   : > { %v3563_v51 = vpop.permute.xlu0 %3562 }
 0x5bf   : > { %v3561_v42 = vpop.permute.xlu1 %3560  ;;  %3636 = vst.msk [vmem:[#allocation3 + $0xb8] sm:$0xff] %vm3612_vm11, %v3563_v51 }
 0x5c0   : > { %3635 = vst.msk [vmem:[#allocation3 + $0xb0] sm:$0xff] %vm3612_vm11, %v3561_v42  ;;  %3576 = vrot.lane.b32.xlu0 %v3482_v25, %s4693_s10 }
 0x5c1   : > { %3522 = vrot.lane.b32.xlu1 %v3455_v1, %s4693_s10 }
 0x5c2   : > { %v3752_v10 = vpop.permute.xlu0 %3751 }
 0x5c3   : > { %v3750_v63 = vpop.permute.xlu1 %3749  ;;  %3827 = vst.msk [vmem:[#allocation3 + $0xa8] sm:$0xff] %vm3805_vm12, %v3752_v10 }
 0x5c4   : > { %3826 = vst.msk [vmem:[#allocation3 + $0xa0] sm:$0xff] %vm3805_vm12, %v3750_v63  ;;  %3709 = vrot.lane.b32.xlu0 %v6977_v54, %s4701_s12 }
 0x5c5   : > { %3578 = vrot.lane.b32.xlu1 %v3483_v28, %s4693_s10 }
 0x5c6   : > { %v3756_v4 = vpop.permute.xlu0 %3755 }
 0x5c7   : > { %v3754_v17 = vpop.permute.xlu1 %3753  ;;  %3829 = vst.msk [vmem:[#allocation3 + $0xb8] sm:$0xff] %vm3805_vm12, %v3756_v4 }
 0x5c8   : > { %3828 = vst.msk [vmem:[#allocation3 + $0xb0] sm:$0xff] %vm3805_vm12, %v3754_v17  ;;  %3765 = vrot.lane.b32.xlu0 %v6985_v44, %s4701_s12 }
 0x5c9   : > { %3711 = vrot.lane.b32.xlu1 %v6988_v33, %s4701_s12 }
 0x5ca   : > { %v2987_v24 = vpop.permute.xlu0 %2986  ;;  %v3859_v6 = vld [vmem:[#allocation3 + $0xa8] sm:$0xff] }
 0x5cb   : > { %v2985_v55 = vpop.permute.xlu1 %2984  ;;  %3058 = vst.msk [vmem:[#allocation3 + $0xc8] sm:$0xff] %vm3032_vm3, %v2987_v24  ;;  %v3858_v21 = vld [vmem:[#allocation3 + $0xa0] sm:$0xff] }
 0x5cc   : > { %3057 = vst.msk [vmem:[#allocation3 + $0xc0] sm:$0xff] %vm3032_vm3, %v2985_v55  ;;  %3713 = vrot.lane.b32.xlu0 %v3647_v5, %s4701_s12  ;;  %v3880_v59 = vpack.c.bf16 %v3859_v6, %v3858_v21 }
 0x5cd   : > { %3767 = vrot.lane.b32.xlu1 %v6996_v46, %s4701_s12  ;;  %v7084_v46 = vld [vmem:[%s7275_s3 + $0x3] ss:$0 sm:$0xff] }
 0x5ce   : > { %4582 = vmatprep.mubr.msk.bf16.mxu1 %vm3941_vm14, %v3880_v59  ;;  %v2991_v43 = vpop.permute.xlu0 %2990  ;;  %v3861_v2 = vld [vmem:[#allocation3 + $0xb8] sm:$0xff] }
 0x5cf   : > { %v2989_v31 = vpop.permute.xlu1 %2988  ;;  %3060 = vst.msk [vmem:[#allocation3 + $0xd8] sm:$0xff] %vm3032_vm3, %v2991_v43  ;;  %v3860_v26 = vld [vmem:[#allocation3 + $0xb0] sm:$0xff] }
 0x5d0   : > { %3059 = vst.msk [vmem:[#allocation3 + $0xd0] sm:$0xff] %vm3032_vm3, %v2989_v31  ;;  %v3881_v16 = vpack.c.bf16 %v3861_v2, %v3860_v26  ;;  %3769 = vrot.lane.b32.xlu0 %v3675_v30, %s4701_s12 }
 0x5d1   : > { %3715 = vrot.lane.b32.xlu1 %v3648_v41, %s4701_s12 }
 0x5d2   : > { %4583 = vmatmul.mubr.msk.bf16.gmra.mxu1 %vm3941_vm14, %v3881_v16  ;;  %v3180_v23 = vpop.permute.xlu0 %3179 }
 0x5d3   : > { %v3178_v18 = vpop.permute.xlu1 %3177  ;;  %3251 = vst.msk [vmem:[#allocation3 + $0xc8] sm:$0xff] %vm3225_vm9, %v3180_v23 }
 0x5d4   : > { %3250 = vst.msk [vmem:[#allocation3 + $0xc0] sm:$0xff] %vm3225_vm9, %v3178_v18 }
 0x5d5   : > { %3771 = vrot.lane.b32.xlu1 %v3676_v11, %s4701_s12 }
 0x5d6   : > { %v3184_v40 = vpop.permute.xlu0 %3183 }
 0x5d7   : > { %v3182_v34 = vpop.permute.xlu1 %3181  ;;  %3253 = vst.msk [vmem:[#allocation3 + $0xd8] sm:$0xff] %vm3225_vm9, %v3184_v40 }
 0x5d8   : > { %3252 = vst.msk [vmem:[#allocation3 + $0xd0] sm:$0xff] %vm3225_vm9, %v3182_v34 }
 0x5da   : > { %v3374_v36 = vpop.permute.xlu0 %3373 }
 0x5db   : > { %v3372_v53 = vpop.permute.xlu1 %3371  ;;  %3445 = vst.msk [vmem:[#allocation3 + $0xc8] sm:$0xff] %vm3419_vm10, %v3374_v36 }
 0x5dc   : > { %3444 = vst.msk [vmem:[#allocation3 + $0xc0] sm:$0xff] %vm3419_vm10, %v3372_v53 }
 0x5de   : > { %v3378_v37 = vpop.permute.xlu0 %3377 }
 0x5df   : > { %v3376_v9 = vpop.permute.xlu1 %3375  ;;  %3447 = vst.msk [vmem:[#allocation3 + $0xd8] sm:$0xff] %vm3419_vm10, %v3378_v37 }
 0x5e0   : > { %3446 = vst.msk [vmem:[#allocation3 + $0xd0] sm:$0xff] %vm3419_vm10, %v3376_v9 }
 0x5e2   : > { %v3567_v54 = vpop.permute.xlu0 %3566 }
 0x5e3   : > { %v3565_v50 = vpop.permute.xlu1 %3564  ;;  %3638 = vst.msk [vmem:[#allocation3 + $0xc8] sm:$0xff] %vm3612_vm11, %v3567_v54 }
 0x5e4   : > { %3637 = vst.msk [vmem:[#allocation3 + $0xc0] sm:$0xff] %vm3612_vm11, %v3565_v50 }
 0x5e6   : > { %v3571_v49 = vpop.permute.xlu0 %3570 }
 0x5e7   : > { %v3569_v44 = vpop.permute.xlu1 %3568  ;;  %3640 = vst.msk [vmem:[#allocation3 + $0xd8] sm:$0xff] %vm3612_vm11, %v3571_v49 }
 0x5e8   : > { %3639 = vst.msk [vmem:[#allocation3 + $0xd0] sm:$0xff] %vm3612_vm11, %v3569_v44 }
 0x5ea   : > { %v3760_v33 = vpop.permute.xlu0 %3759 }
 0x5eb   : > { %v3758_v14 = vpop.permute.xlu1 %3757  ;;  %3831 = vst.msk [vmem:[#allocation3 + $0xc8] sm:$0xff] %vm3805_vm12, %v3760_v33 }
 0x5ec   : > { %3830 = vst.msk [vmem:[#allocation3 + $0xc0] sm:$0xff] %vm3805_vm12, %v3758_v14 }
 0x5ee   : > { %v3764_v3 = vpop.permute.xlu0 %3763 }
 0x5ef   : > { %v3762_v15 = vpop.permute.xlu1 %3761  ;;  %3833 = vst.msk [vmem:[#allocation3 + $0xd8] sm:$0xff] %vm3805_vm12, %v3764_v3 }
 0x5f0   : > { %3832 = vst.msk [vmem:[#allocation3 + $0xd0] sm:$0xff] %vm3805_vm12, %v3762_v15 }
 0x5f2   : > { %v4568_v19 = vpop.f32.mrf.mxu1  ;;  %v2804_v35 = vpop.permute.xlu0 %2803  ;;  %v3863_v27 = vld [vmem:[#allocation3 + $0xc8] sm:$0xff] }
 0x5f3   : > { %v4165_v56 = vmul.f32 %v4568_v19, %v7079_v58  ;;  %v2802_v45 = vpop.permute.xlu1 %2801  ;;  %2870 = vst.msk [vmem:[#allocation3 + $0xf0] sm:$0xff] %vm2839_vm0, %v2804_v35  ;;  %v3862_v32 = vld [vmem:[#allocation3 + $0xc0] sm:$0xff] }
 0x5f4   : > { %2869 = vst.msk [vmem:[#allocation3 + $0xe8] sm:$0xff] %vm2839_vm0, %v2802_v45  ;;  %v4043_v60 = vpop.f32.mrf.mxu1  ;;  %v3882_v8 = vpack.c.bf16 %v3863_v27, %v3862_v32 }
 0x5f5   : > { %v4202_v52 = vadd.f32 %v7084_v46, %v4165_v56  ;;  %v4163_v22 = vmul.f32 %v7079_v58, %v4043_v60 }
 0x5f6   : > { %v4569_v39 = vpop.f32.mrf.mxu1  ;;  %4586 = vmatprep.mubr.msk.bf16.mxu1 %vm3941_vm14, %v3882_v8  ;;  %v2937_v13 = vpop.permute.xlu0 %2936  ;;  %v3865_v47 = vld [vmem:[#allocation3 + $0xd8] sm:$0xff] }
 0x5f7   : > { %vm4234_vm15 = vcmp.gt.f32.partialorder %v4202_v52, 0.0  ;;  %v4266_v61 = vmul.f32 0.1, %v4202_v52  ;;  %v4200_v62 = vadd.f32 %v7084_v46, %v4163_v22  ;;  %v4166_v29 = vmul.f32 %v4569_v39, %v7079_v58  ;;  %v2806_v38 = vpop.permute.xlu1 %2805  ;;  %3033 = vst.msk [vmem:[#allocation3] sm:$0xff] %vm3032_vm3, %v2937_v13  ;;  %v3864_v57 = vld [vmem:[#allocation3 + $0xd0] sm:$0xff] }
 0x5f8   : > { %2871 = vst.msk [vmem:[#allocation3 + $0xf8] sm:$0xff] %vm2839_vm0, %v2806_v38  ;;  %v4046_v12 = vpop.f32.mrf.mxu1  ;;  %v3883_v20 = vpack.c.bf16 %v3865_v47, %v3864_v57 }
 0x5f9   : > { %v4298_v7 = vsel %vm4234_vm15, %v4202_v52, %v4266_v61  ;;  %vm4232_vm1 = vcmp.gt.f32.partialorder %v4200_v62, 0.0  ;;  %v4264_v48 = vmul.f32 0.1, %v4200_v62  ;;  %v4203_v0 = vadd.f32 %v7084_v46, %v4166_v29 }
 0x5fa   : > { %4330 = vst.msk [vmem:[%s7096_s21 + $0x30] sm:$0xff] %vm199_vm13, %v4298_v7  ;;  %v4164_v25 = vmul.f32 %v7079_v58, %v4046_v12  ;;  %4587 = vmatmul.mubr.msk.bf16.gmra.mxu1 %vm3941_vm14, %v3883_v20  ;;  %v2993_v51 = vpop.permute.xlu0 %2992 }
 0x5fb   : > { %v4296_v42 = vsel %vm4232_vm1, %v4200_v62, %v4264_v48  ;;  %vm4235_vm2 = vcmp.gt.f32.partialorder %v4203_v0, 0.0  ;;  %v4267_v1 = vmul.f32 0.1, %v4203_v0  ;;  %v2939_v10 = vpop.permute.xlu1 %2938  ;;  %3061 = vst.msk [vmem:[#allocation3 + $0xe0] sm:$0xff] %vm3032_vm3, %v2993_v51 }
 0x5fc   : > { %4328 = vst.msk [vmem:[%s7096_s21 + $0x20] sm:$0xff] %vm199_vm13, %v4296_v42  ;;  %v4201_v28 = vadd.f32 %v7084_v46, %v4164_v25 }
 0x5fd   : > { %3034 = vst.msk [vmem:[#allocation3 + $0x8] sm:$0xff] %vm3032_vm3, %v2939_v10  ;;  %v4299_v63 = vsel %vm4235_vm2, %v4203_v0, %v4267_v1 }
 0x5fe   : > { %4331 = vst.msk [vmem:[%s7096_s21 + $0x38] sm:$0xff] %vm199_vm13, %v4299_v63  ;;  %vm4233_vm4 = vcmp.gt.f32.partialorder %v4201_v28, 0.0  ;;  %v4265_v4 = vmul.f32 0.1, %v4201_v28  ;;  %v2941_v17 = vpop.permute.xlu0 %2940 }
 0x5ff   : > { %v2995_v24 = vpop.permute.xlu1 %2994  ;;  %3035 = vst.msk [vmem:[#allocation3 + $0x10] sm:$0xff] %vm3032_vm3, %v2941_v17 }
 0x600   : > { %v4297_v6 = vsel %vm4233_vm4, %v4201_v28, %v4265_v4  ;;  %3062 = vst.msk [vmem:[#allocation3 + $0xe8] sm:$0xff] %vm3032_vm3, %v2995_v24 }
 0x601   : > { %4329 = vst.msk [vmem:[%s7096_s21 + $0x28] sm:$0xff] %vm199_vm13, %v4297_v6 }
 0x602   : > { %v2997_v55 = vpop.permute.xlu0 %2996 }
 0x603   : > { %v2943_v5 = vpop.permute.xlu1 %2942  ;;  %3063 = vst.msk [vmem:[#allocation3 + $0xf0] sm:$0xff] %vm3032_vm3, %v2997_v55 }
 0x604   : > { %3036 = vst.msk [vmem:[#allocation3 + $0x18] sm:$0xff] %vm3032_vm3, %v2943_v5 }
 0x606   : > { %v3130_v21 = vpop.permute.xlu0 %3129 }
 0x607   : > { %v2999_v59 = vpop.permute.xlu1 %2998  ;;  %3226 = vst.msk [vmem:[#allocation3] sm:$0xff] %vm3225_vm9, %v3130_v21 }
 0x608   : > { %3064 = vst.msk [vmem:[#allocation3 + $0xf8] sm:$0xff] %vm3032_vm3, %v2999_v59 }
 0x60a   : > { %v3186_v30 = vpop.permute.xlu0 %3185 }
 0x60b   : > { %v3132_v43 = vpop.permute.xlu1 %3131  ;;  %3254 = vst.msk [vmem:[#allocation3 + $0xe0] sm:$0xff] %vm3225_vm9, %v3186_v30 }
 0x60c   : > { %3227 = vst.msk [vmem:[#allocation3 + $0x8] sm:$0xff] %vm3225_vm9, %v3132_v43 }
 0x60e   : > { %v3134_v2 = vpop.permute.xlu0 %3133 }
 0x60f   : > { %v3188_v31 = vpop.permute.xlu1 %3187  ;;  %3228 = vst.msk [vmem:[#allocation3 + $0x10] sm:$0xff] %vm3225_vm9, %v3134_v2 }
 0x610   : > { %3255 = vst.msk [vmem:[#allocation3 + $0xe8] sm:$0xff] %vm3225_vm9, %v3188_v31 }
 0x612   : > { %v3190_v26 = vpop.permute.xlu0 %3189 }
 0x613   : > { %v3136_v41 = vpop.permute.xlu1 %3135  ;;  %3256 = vst.msk [vmem:[#allocation3 + $0xf0] sm:$0xff] %vm3225_vm9, %v3190_v26 }
 0x614   : > { %3229 = vst.msk [vmem:[#allocation3 + $0x18] sm:$0xff] %vm3225_vm9, %v3136_v41 }
 0x616   : > { %v3324_v16 = vpop.permute.xlu0 %3323 }
 0x617   : > { %v3192_v23 = vpop.permute.xlu1 %3191  ;;  %3420 = vst.msk [vmem:[#allocation3] sm:$0xff] %vm3419_vm10, %v3324_v16 }
 0x618   : > { %3257 = vst.msk [vmem:[#allocation3 + $0xf8] sm:$0xff] %vm3225_vm9, %v3192_v23 }
 0x61a   : > { %v4572_v11 = vpop.f32.mrf.mxu1  ;;  %v3380_v18 = vpop.permute.xlu0 %3379 }
 0x61b   : > { %v4169_v40 = vmul.f32 %v4572_v11, %v7079_v58  ;;  %v3326_v34 = vpop.permute.xlu1 %3325  ;;  %3448 = vst.msk [vmem:[#allocation3 + $0xe0] sm:$0xff] %vm3419_vm10, %v3380_v18 }
 0x61c   : > { %3421 = vst.msk [vmem:[#allocation3 + $0x8] sm:$0xff] %vm3419_vm10, %v3326_v34  ;;  %v4059_v36 = vpop.f32.mrf.mxu1 }
 0x61d   : > { %v4206_v53 = vadd.f32 %v7084_v46, %v4169_v40  ;;  %v4167_v37 = vmul.f32 %v7079_v58, %v4059_v36 }
 0x61e   : > { %v4573_v9 = vpop.f32.mrf.mxu1  ;;  %v3328_v54 = vpop.permute.xlu0 %3327 }
 0x61f   : > { %vm4238_vm5 = vcmp.gt.f32.partialorder %v4206_v53, 0.0  ;;  %v4270_v50 = vmul.f32 0.1, %v4206_v53  ;;  %v4204_v49 = vadd.f32 %v7084_v46, %v4167_v37  ;;  %v4170_v44 = vmul.f32 %v4573_v9, %v7079_v58  ;;  %v3382_v33 = vpop.permute.xlu1 %3381  ;;  %3422 = vst.msk [vmem:[#allocation3 + $0x10] sm:$0xff] %vm3419_vm10, %v3328_v54 }
 0x620   : > { %3449 = vst.msk [vmem:[#allocation3 + $0xe8] sm:$0xff] %vm3419_vm10, %v3382_v33  ;;  %v4062_v14 = vpop.f32.mrf.mxu1 }
 0x621   : > { %v4302_v3 = vsel %vm4238_vm5, %v4206_v53, %v4270_v50  ;;  %vm4236_vm6 = vcmp.gt.f32.partialorder %v4204_v49, 0.0  ;;  %v4268_v15 = vmul.f32 0.1, %v4204_v49  ;;  %v4207_v19 = vadd.f32 %v7084_v46, %v4170_v44 }
 0x622   : > { %4334 = vst.msk [vmem:[%s7096_s21 + $0x50] sm:$0xff] %vm199_vm13, %v4302_v3  ;;  %v4168_v35 = vmul.f32 %v7079_v58, %v4062_v14  ;;  %v3384_v27 = vpop.permute.xlu0 %3383 }
 0x623   : > { %v4300_v56 = vsel %vm4236_vm6, %v4204_v49, %v4268_v15  ;;  %vm4239_vm7 = vcmp.gt.f32.partialorder %v4207_v19, 0.0  ;;  %v4271_v45 = vmul.f32 0.1, %v4207_v19  ;;  %v3330_v32 = vpop.permute.xlu1 %3329  ;;  %3450 = vst.msk [vmem:[#allocation3 + $0xf0] sm:$0xff] %vm3419_vm10, %v3384_v27 }
 0x624   : > { %4332 = vst.msk [vmem:[%s7096_s21 + $0x40] sm:$0xff] %vm199_vm13, %v4300_v56  ;;  %v4205_v60 = vadd.f32 %v7084_v46, %v4168_v35 }
 0x625   : > { %3423 = vst.msk [vmem:[#allocation3 + $0x18] sm:$0xff] %vm3419_vm10, %v3330_v32  ;;  %v4303_v8 = vsel %vm4239_vm7, %v4207_v19, %v4271_v45 }
 0x626   : > { %4335 = vst.msk [vmem:[%s7096_s21 + $0x58] sm:$0xff] %vm199_vm13, %v4303_v8  ;;  %vm4237_vm8 = vcmp.gt.f32.partialorder %v4205_v60, 0.0  ;;  %v4269_v52 = vmul.f32 0.1, %v4205_v60  ;;  %v3517_v22 = vpop.permute.xlu0 %3516 }
 0x627   : > { %v3386_v39 = vpop.permute.xlu1 %3385  ;;  %3613 = vst.msk [vmem:[#allocation3] sm:$0xff] %vm3612_vm11, %v3517_v22 }
 0x628   : > { %v4301_v13 = vsel %vm4237_vm8, %v4205_v60, %v4269_v52  ;;  %3451 = vst.msk [vmem:[#allocation3 + $0xf8] sm:$0xff] %vm3419_vm10, %v3386_v39 }
 0x629   : > { %4333 = vst.msk [vmem:[%s7096_s21 + $0x48] sm:$0xff] %vm199_vm13, %v4301_v13 }
 0x62a   : > { %v3573_v47 = vpop.permute.xlu0 %3572 }
 0x62b   : > { %v3519_v61 = vpop.permute.xlu1 %3518  ;;  %3641 = vst.msk [vmem:[#allocation3 + $0xe0] sm:$0xff] %vm3612_vm11, %v3573_v47 }
 0x62c   : > { %3614 = vst.msk [vmem:[#allocation3 + $0x8] sm:$0xff] %vm3612_vm11, %v3519_v61 }
 0x62e   : > { %v3521_v62 = vpop.permute.xlu0 %3520 }
 0x62f   : > { %v3575_v29 = vpop.permute.xlu1 %3574  ;;  %3615 = vst.msk [vmem:[#allocation3 + $0x10] sm:$0xff] %vm3612_vm11, %v3521_v62 }
 0x630   : > { %3642 = vst.msk [vmem:[#allocation3 + $0xe8] sm:$0xff] %vm3612_vm11, %v3575_v29 }
 0x632   : > { %v3577_v38 = vpop.permute.xlu0 %3576 }
 0x633   : > { %v3523_v57 = vpop.permute.xlu1 %3522  ;;  %3643 = vst.msk [vmem:[#allocation3 + $0xf0] sm:$0xff] %vm3612_vm11, %v3577_v38 }
 0x634   : > { %3616 = vst.msk [vmem:[#allocation3 + $0x18] sm:$0xff] %vm3612_vm11, %v3523_v57 }
 0x636   : > { %v3710_v12 = vpop.permute.xlu0 %3709 }
 0x637   : > { %v3579_v20 = vpop.permute.xlu1 %3578  ;;  %3806 = vst.msk [vmem:[#allocation3] sm:$0xff] %vm3805_vm12, %v3710_v12 }
 0x638   : > { %3644 = vst.msk [vmem:[#allocation3 + $0xf8] sm:$0xff] %vm3612_vm11, %v3579_v20 }
 0x63a   : > { %v3766_v7 = vpop.permute.xlu0 %3765 }
 0x63b   : > { %v3712_v48 = vpop.permute.xlu1 %3711  ;;  %3834 = vst.msk [vmem:[#allocation3 + $0xe0] sm:$0xff] %vm3805_vm12, %v3766_v7 }
 0x63c   : > { %3807 = vst.msk [vmem:[#allocation3 + $0x8] sm:$0xff] %vm3805_vm12, %v3712_v48 }
 0x63e   : > { %v3714_v0 = vpop.permute.xlu0 %3713  ;;  %v3838_v28 = vld [vmem:[#allocation3] sm:$0xff] }
 0x63f   : > { %v3768_v25 = vpop.permute.xlu1 %3767  ;;  %3808 = vst.msk [vmem:[#allocation3 + $0x10] sm:$0xff] %vm3805_vm12, %v3714_v0 }
 0x640   : > { %3835 = vst.msk [vmem:[#allocation3 + $0xe8] sm:$0xff] %vm3805_vm12, %v3768_v25 }
 0x642   : > { %v4576_v51 = vpop.f32.mrf.mxu1  ;;  %v3770_v42 = vpop.permute.xlu0 %3769  ;;  %v3866_v43 = vld [vmem:[#allocation3 + $0xe0] sm:$0xff] }
 0x643   : > { %v4173_v1 = vmul.f32 %v4576_v51, %v7079_v58  ;;  %v3716_v10 = vpop.permute.xlu1 %3715  ;;  %v3839_v63 = vld [vmem:[#allocation3 + $0x8] sm:$0xff]  ;;  %3836 = vst.msk [vmem:[#allocation3 + $0xf0] sm:$0xff] %vm3805_vm12, %v3770_v42 }
 0x644   : > { %3809 = vst.msk [vmem:[#allocation3 + $0x18] sm:$0xff] %vm3805_vm12, %v3716_v10  ;;  %v4075_v4 = vpop.f32.mrf.mxu1  ;;  %v3870_v17 = vpack.c.bf16 %v3839_v63, %v3838_v28 }
 0x645   : > { %v4210_v24 = vadd.f32 %v7084_v46, %v4173_v1  ;;  %v4171_v6 = vmul.f32 %v7079_v58, %v4075_v4 }
 0x646   : > { %4562 = vmatprep.mubr.msk.bf16.mxu0 %vm3941_vm14, %v3870_v17  ;;  %v4577_v55 = vpop.f32.mrf.mxu1  ;;  %v3840_v34 = vld [vmem:[#allocation3 + $0x10] sm:$0xff] }
 0x647   : > { %vm4242_vm0 = vcmp.gt.f32.partialorder %v4210_v24, 0.0  ;;  %v4274_v5 = vmul.f32 0.1, %v4210_v24  ;;  %v4208_v21 = vadd.f32 %v7084_v46, %v4171_v6  ;;  %v4174_v59 = vmul.f32 %v4577_v55, %v7079_v58  ;;  %v3772_v30 = vpop.permute.xlu1 %3771  ;;  %v3867_v2 = vld [vmem:[#allocation3 + $0xe8] sm:$0xff] }
 0x648   : > { %3837 = vst.msk [vmem:[#allocation3 + $0xf8] sm:$0xff] %vm3805_vm12, %v3772_v30  ;;  %v4078_v31 = vpop.f32.mrf.mxu1  ;;  %v3884_v26 = vpack.c.bf16 %v3867_v2, %v3866_v43 }
 0x649   : > { %v4306_v41 = vsel %vm4242_vm0, %v4210_v24, %v4274_v5  ;;  %vm4240_vm3 = vcmp.gt.f32.partialorder %v4208_v21, 0.0  ;;  %v4272_v16 = vmul.f32 0.1, %v4208_v21  ;;  %v4211_v23 = vadd.f32 %v7084_v46, %v4174_v59 }
 0x64a   : > { %4338 = vst.msk [vmem:[%s7096_s21 + $0x70] sm:$0xff] %vm199_vm13, %v4306_v41  ;;  %v4172_v11 = vmul.f32 %v7079_v58, %v4078_v31  ;;  %4590 = vmatprep.mubr.msk.bf16.mxu1 %vm3941_vm14, %v3884_v26  ;;  %v3868_v54 = vld [vmem:[#allocation3 + $0xf0] sm:$0xff] }
 0x64b   : > { %v4304_v18 = vsel %vm4240_vm3, %v4208_v21, %v4272_v16  ;;  %vm4243_vm9 = vcmp.gt.f32.partialorder %v4211_v23, 0.0  ;;  %v4275_v40 = vmul.f32 0.1, %v4211_v23  ;;  %v3841_v36 = vld [vmem:[#allocation3 + $0x18] sm:$0xff] }
 0x64c   : > { %4336 = vst.msk [vmem:[%s7096_s21 + $0x60] sm:$0xff] %vm199_vm13, %v4304_v18  ;;  %v4209_v53 = vadd.f32 %v7084_v46, %v4172_v11  ;;  %v3871_v37 = vpack.c.bf16 %v3841_v36, %v3840_v34 }
 0x64d   : > { %v4307_v9 = vsel %vm4243_vm9, %v4211_v23, %v4275_v40 }
 0x64e   : > { %4339 = vst.msk [vmem:[%s7096_s21 + $0x78] sm:$0xff] %vm199_vm13, %v4307_v9  ;;  %vm4241_vm10 = vcmp.gt.f32.partialorder %v4209_v53, 0.0  ;;  %v4273_v50 = vmul.f32 0.1, %v4209_v53  ;;  %4563 = vmatmul.mubr.msk.bf16.vlgmr.msra.gmra.mxu0 %vm3941_vm14, %v3871_v37 }
 0x64f   : > { %v3869_v49 = vld [vmem:[#allocation3 + $0xf8] sm:$0xff] }
 0x650   : > { %v4305_v44 = vsel %vm4241_vm10, %v4209_v53, %v4273_v50  ;;  %v3885_v33 = vpack.c.bf16 %v3869_v49, %v3868_v54 }
 0x651   : > { %4337 = vst.msk [vmem:[%s7096_s21 + $0x68] sm:$0xff] %vm199_vm13, %v4305_v44 }
 0x652   : > { %4591 = vmatmul.mubr.msk.bf16.gmra.mxu1 %vm3941_vm14, %v3885_v33 }
 0x66a   : > { %v4580_v14 = vpop.f32.mrf.mxu1 }
 0x66b   : > { %v4177_v3 = vmul.f32 %v4580_v14, %v7079_v58 }
 0x66c   : > { %v4091_v15 = vpop.f32.mrf.mxu1 }
 0x66d   : > { %v4214_v19 = vadd.f32 %v7084_v46, %v4177_v3  ;;  %v4175_v35 = vmul.f32 %v7079_v58, %v4091_v15 }
 0x66e   : > { %v4581_v27 = vpop.f32.mrf.mxu1 }
 0x66f   : > { %vm4246_vm11 = vcmp.gt.f32.partialorder %v4214_v19, 0.0  ;;  %v4278_v56 = vmul.f32 0.1, %v4214_v19  ;;  %v4212_v45 = vadd.f32 %v7084_v46, %v4175_v35  ;;  %v4178_v32 = vmul.f32 %v4581_v27, %v7079_v58 }
 0x670   : > { %v4094_v60 = vpop.f32.mrf.mxu1 }
 0x671   : > { %v4310_v8 = vsel %vm4246_vm11, %v4214_v19, %v4278_v56  ;;  %vm4244_vm12 = vcmp.gt.f32.partialorder %v4212_v45, 0.0  ;;  %v4276_v52 = vmul.f32 0.1, %v4212_v45  ;;  %v4215_v22 = vadd.f32 %v7084_v46, %v4178_v32 }
 0x672   : > { %4342 = vst.msk [vmem:[%s7096_s21 + $0x90] sm:$0xff] %vm199_vm13, %v4310_v8  ;;  %v4176_v39 = vmul.f32 %v7079_v58, %v4094_v60 }
 0x673   : > { %v4308_v13 = vsel %vm4244_vm12, %v4212_v45, %v4276_v52  ;;  %vm4247_vm14 = vcmp.gt.f32.partialorder %v4215_v22, 0.0  ;;  %v4279_v47 = vmul.f32 0.1, %v4215_v22 }
 0x674   : > { %4340 = vst.msk [vmem:[%s7096_s21 + $0x80] sm:$0xff] %vm199_vm13, %v4308_v13  ;;  %v4213_v61 = vadd.f32 %v7084_v46, %v4176_v39 }
 0x675   : > { %v4311_v62 = vsel %vm4247_vm14, %v4215_v22, %v4279_v47 }
 0x676   : > { %4343 = vst.msk [vmem:[%s7096_s21 + $0x98] sm:$0xff] %vm199_vm13, %v4311_v62  ;;  %vm4245_vm15 = vcmp.gt.f32.partialorder %v4213_v61, 0.0  ;;  %v4277_v29 = vmul.f32 0.1, %v4213_v61 }
 0x678   : > { %v4309_v38 = vsel %vm4245_vm15, %v4213_v61, %v4277_v29 }
 0x679   : > { %4341 = vst.msk [vmem:[%s7096_s21 + $0x88] sm:$0xff] %vm199_vm13, %v4309_v38 }
 0x692   : > { %v4584_v57 = vpop.f32.mrf.mxu1 }
 0x693   : > { %v4181_v12 = vmul.f32 %v4584_v57, %v7079_v58 }
 0x694   : > { %v4107_v20 = vpop.f32.mrf.mxu1 }
 0x695   : > { %v4218_v7 = vadd.f32 %v7084_v46, %v4181_v12  ;;  %v4179_v48 = vmul.f32 %v7079_v58, %v4107_v20 }
 0x696   : > { %v4585_v0 = vpop.f32.mrf.mxu1 }
 0x697   : > { %vm4250_vm1 = vcmp.gt.f32.partialorder %v4218_v7, 0.0  ;;  %v4282_v25 = vmul.f32 0.1, %v4218_v7  ;;  %v4216_v51 = vadd.f32 %v7084_v46, %v4179_v48  ;;  %v4182_v42 = vmul.f32 %v4585_v0, %v7079_v58 }
 0x698   : > { %v4110_v1 = vpop.f32.mrf.mxu1 }
 0x699   : > { %v4314_v10 = vsel %vm4250_vm1, %v4218_v7, %v4282_v25  ;;  %vm4248_vm2 = vcmp.gt.f32.partialorder %v4216_v51, 0.0  ;;  %v4280_v28 = vmul.f32 0.1, %v4216_v51  ;;  %v4219_v63 = vadd.f32 %v7084_v46, %v4182_v42 }
 0x69a   : > { %4346 = vst.msk [vmem:[%s7096_s21 + $0xb0] sm:$0xff] %vm199_vm13, %v4314_v10  ;;  %v4180_v4 = vmul.f32 %v7079_v58, %v4110_v1 }
 0x69b   : > { %v4312_v17 = vsel %vm4248_vm2, %v4216_v51, %v4280_v28  ;;  %vm4251_vm4 = vcmp.gt.f32.partialorder %v4219_v63, 0.0  ;;  %v4283_v24 = vmul.f32 0.1, %v4219_v63 }
 0x69c   : > { %4344 = vst.msk [vmem:[%s7096_s21 + $0xa0] sm:$0xff] %vm199_vm13, %v4312_v17  ;;  %v4217_v6 = vadd.f32 %v7084_v46, %v4180_v4 }
 0x69d   : > { %v4315_v55 = vsel %vm4251_vm4, %v4219_v63, %v4283_v24 }
 0x69e   : > { %4347 = vst.msk [vmem:[%s7096_s21 + $0xb8] sm:$0xff] %vm199_vm13, %v4315_v55  ;;  %vm4249_vm5 = vcmp.gt.f32.partialorder %v4217_v6, 0.0  ;;  %v4281_v5 = vmul.f32 0.1, %v4217_v6 }
 0x6a0   : > { %v4313_v21 = vsel %vm4249_vm5, %v4217_v6, %v4281_v5 }
 0x6a1   : > { %4345 = vst.msk [vmem:[%s7096_s21 + $0xa8] sm:$0xff] %vm199_vm13, %v4313_v21 }
 0x6ba   : > { %v4588_v59 = vpop.f32.mrf.mxu1 }
 0x6bb   : > { %v4185_v30 = vmul.f32 %v4588_v59, %v7079_v58 }
 0x6bc   : > { %v4123_v43 = vpop.f32.mrf.mxu1 }
 0x6bd   : > { %v4222_v2 = vadd.f32 %v7084_v46, %v4185_v30  ;;  %v4183_v31 = vmul.f32 %v7079_v58, %v4123_v43 }
 0x6be   : > { %v4589_v26 = vpop.f32.mrf.mxu1 }
 0x6bf   : > { %vm4254_vm6 = vcmp.gt.f32.partialorder %v4222_v2, 0.0  ;;  %v4286_v41 = vmul.f32 0.1, %v4222_v2  ;;  %v4220_v16 = vadd.f32 %v7084_v46, %v4183_v31  ;;  %v4186_v23 = vmul.f32 %v4589_v26, %v7079_v58 }
 0x6c0   : > { %v4126_v11 = vpop.f32.mrf.mxu1 }
 0x6c1   : > { %v4318_v18 = vsel %vm4254_vm6, %v4222_v2, %v4286_v41  ;;  %vm4252_vm7 = vcmp.gt.f32.partialorder %v4220_v16, 0.0  ;;  %v4284_v40 = vmul.f32 0.1, %v4220_v16  ;;  %v4223_v34 = vadd.f32 %v7084_v46, %v4186_v23 }
 0x6c2   : > { %4350 = vst.msk [vmem:[%s7096_s21 + $0xd0] sm:$0xff] %vm199_vm13, %v4318_v18  ;;  %v4184_v36 = vmul.f32 %v7079_v58, %v4126_v11 }
 0x6c3   : > { %v4316_v53 = vsel %vm4252_vm7, %v4220_v16, %v4284_v40  ;;  %vm4255_vm8 = vcmp.gt.f32.partialorder %v4223_v34, 0.0  ;;  %v4287_v37 = vmul.f32 0.1, %v4223_v34 }
 0x6c4   : > { %4348 = vst.msk [vmem:[%s7096_s21 + $0xc0] sm:$0xff] %vm199_vm13, %v4316_v53  ;;  %v4221_v9 = vadd.f32 %v7084_v46, %v4184_v36 }
 0x6c5   : > { %v4319_v54 = vsel %vm4255_vm8, %v4223_v34, %v4287_v37 }
 0x6c6   : > { %4351 = vst.msk [vmem:[%s7096_s21 + $0xd8] sm:$0xff] %vm199_vm13, %v4319_v54  ;;  %vm4253_vm0 = vcmp.gt.f32.partialorder %v4221_v9, 0.0  ;;  %v4285_v50 = vmul.f32 0.1, %v4221_v9 }
 0x6c8   : > { %v4317_v49 = vsel %vm4253_vm0, %v4221_v9, %v4285_v50 }
 0x6c9   : > { %4349 = vst.msk [vmem:[%s7096_s21 + $0xc8] sm:$0xff] %vm199_vm13, %v4317_v49 }
 0x70e   : > { %v4564_v44 = vpop.f32.mrf.mxu0 }
 0x70f   : > { %v4161_v33 = vmul.f32 %v4564_v44, %v7079_v58 }
 0x710   : > { %v4027_v14 = vpop.f32.mrf.mxu0 }
 0x711   : > { %v4198_v3 = vadd.f32 %v7084_v46, %v4161_v33  ;;  %v4159_v15 = vmul.f32 %v7079_v58, %v4027_v14 }
 0x712   : > { %v4565_v19 = vpop.f32.mrf.mxu0  ;;  %v4592_v35 = vpop.f32.mrf.mxu1 }
 0x713   : > { %vm4230_vm3 = vcmp.gt.f32.partialorder %v4198_v3, 0.0  ;;  %v4262_v27 = vmul.f32 0.1, %v4198_v3  ;;  %v4196_v56 = vadd.f32 %v7084_v46, %v4159_v15  ;;  %v4162_v45 = vmul.f32 %v4565_v19, %v7079_v58 }
 0x714   : > { %v4189_v32 = vmul.f32 %v4592_v35, %v7079_v58  ;;  %v4030_v60 = vpop.f32.mrf.mxu0  ;;  %v4139_v8 = vpop.f32.mrf.mxu1 }
 0x715   : > { %v4294_v52 = vsel %vm4230_vm3, %v4198_v3, %v4262_v27  ;;  %vm4228_vm9 = vcmp.gt.f32.partialorder %v4196_v56, 0.0  ;;  %v4260_v22 = vmul.f32 0.1, %v4196_v56  ;;  %v4199_v39 = vadd.f32 %v7084_v46, %v4162_v45 }
 0x716   : > { %4326 = vst.msk [vmem:[%s7096_s21 + $0x10] sm:$0xff] %vm199_vm13, %v4294_v52  ;;  %v4226_v13 = vadd.f32 %v7084_v46, %v4189_v32  ;;  %v4160_v47 = vmul.f32 %v7079_v58, %v4030_v60  ;;  %v4187_v61 = vmul.f32 %v7079_v58, %v4139_v8  ;;  %v4593_v62 = vpop.f32.mrf.mxu1 }
 0x717   : > { %v4292_v29 = vsel %vm4228_vm9, %v4196_v56, %v4260_v22  ;;  %vm4231_vm10 = vcmp.gt.f32.partialorder %v4199_v39, 0.0  ;;  %v4263_v38 = vmul.f32 0.1, %v4199_v39  ;;  %v4190_v57 = vmul.f32 %v4593_v62, %v7079_v58 }
 0x718   : > { %4324 = vst.msk [vmem:[%s7096_s21] sm:$0xff] %vm199_vm13, %v4292_v29  ;;  %vm4258_vm11 = vcmp.gt.f32.partialorder %v4226_v13, 0.0  ;;  %v4290_v12 = vmul.f32 0.1, %v4226_v13  ;;  %v4197_v20 = vadd.f32 %v7084_v46, %v4160_v47  ;;  %v4224_v7 = vadd.f32 %v7084_v46, %v4187_v61  ;;  %v4142_v48 = vpop.f32.mrf.mxu1 }
 0x719   : > { %v4295_v0 = vsel %vm4231_vm10, %v4199_v39, %v4263_v38  ;;  %v4227_v25 = vadd.f32 %v7084_v46, %v4190_v57  ;;  %v4188_v51 = vmul.f32 %v7079_v58, %v4142_v48 }
 0x71a   : > { %4327 = vst.msk [vmem:[%s7096_s21 + $0x18] sm:$0xff] %vm199_vm13, %v4295_v0  ;;  %v4322_v42 = vsel %vm4258_vm11, %v4226_v13, %v4290_v12  ;;  %vm4229_vm12 = vcmp.gt.f32.partialorder %v4197_v20, 0.0  ;;  %v4261_v1 = vmul.f32 0.1, %v4197_v20  ;;  %vm4256_vm14 = vcmp.gt.f32.partialorder %v4224_v7, 0.0 }
 0x71b   : > { %4354 = vst.msk [vmem:[%s7096_s21 + $0xf0] sm:$0xff] %vm199_vm13, %v4322_v42  ;;  %v4288_v10 = vmul.f32 0.1, %v4224_v7  ;;  %vm4259_vm15 = vcmp.gt.f32.partialorder %v4227_v25, 0.0  ;;  %v4291_v28 = vmul.f32 0.1, %v4227_v25  ;;  %v4225_v63 = vadd.f32 %v7084_v46, %v4188_v51 }
 0x71c   : > { %v4293_v4 = vsel %vm4229_vm12, %v4197_v20, %v4261_v1 }
 0x71d   : > { %4325 = vst.msk [vmem:[%s7096_s21 + $0x8] sm:$0xff] %vm199_vm13, %v4293_v4  ;;  %v4320_v58 = vsel %vm4256_vm14, %v4224_v7, %v4288_v10  ;;  %v4323_v17 = vsel %vm4259_vm15, %v4227_v25, %v4291_v28  ;;  %vm4257_vm1 = vcmp.gt.f32.partialorder %v4225_v63, 0.0  ;;  %v4289_v24 = vmul.f32 0.1, %v4225_v63 }
 0x71e   : > { %4352 = vst.msk [vmem:[%s7096_s21 + $0xe0] sm:$0xff] %vm199_vm13, %v4320_v58  ;;  %4355 = vst.msk [vmem:[%s7096_s21 + $0xf8] sm:$0xff] %vm199_vm13, %v4323_v17 }
 0x71f   : > { %v4321_v6 = vsel %vm4257_vm1, %v4225_v63, %v4289_v24 }
 0x720   : > { %4353 = vst.msk [vmem:[%s7096_s21 + $0xe8] sm:$0xff] %vm199_vm13, %v4321_v6 }
 0x721 PF: > { %s14_s15 = sadd.s32 1, %s4682_s15  }
 0x722   : > { %p11_p4 = scmp.ge.s32.totalorder %s14_s15, 4  }
 0x724   :  { %13 = sbr.rel (!%p11_p4) target bundleno = 1 (0x1), region = 69 }

</bundles_post_ra>
